<compile_context>
chip_gen: v6e
topology: v6e:2x2x1
jax: 0.10.0
libtpu: 0.0.40
codegen_flags: <defaults>
</compile_context>

<pallas_src>
import jax
import jax.numpy as jnp
from jax.experimental import pallas as pl
from jax.experimental.pallas import tpu as pltpu


# ---------------------------------------------------------------------------
# Fused kernel builder (all configuration is static / trace-time)
# ---------------------------------------------------------------------------
def _make_prcn_kernel(Cin, OC, K, pad, H, W, TILE_H, group_of):
    expansion = Cin * OC
    KK = K * K
    Hout = H + 2 * pad - K + 1
    Wout = W + 2 * pad - K + 1
    n_max = expansion // 2                 # channels after MaxPool3d((2,1,1))
    B_avg = max(Cin // 2, 1)               # AvgPool3d kernel along channels
    Cout = n_max // B_avg                  # final output channels (== OC)

    SR = TILE_H + K - 1                    # scratch rows  (tile + row halo)
    SC = W + 2 * pad                       # scratch cols  (width + col halo)
    MID = SR - 2 * pad                     # scratch rows that are always in-bounds
    assert MID > 0, "row tile too small for this padding"

    def kernel(x_ref, w_ref, o_ref, pad_ref):
        t = pl.program_id(1)
        row0 = t * TILE_H                  # first output row of this tile
        if TILE_H % 8 == 0:
            row0 = pl.multiple_of(row0, 8)

        # ---- per-tile zero-padded halo scratch (only the thin frame + tile) --
        if pad > 0:
            # thin left/right column halo, rewritten every step (megacore-safe)
            pad_ref[:, :, 0:pad] = jnp.zeros((Cin, SR, pad), jnp.float32)
            pad_ref[:, :, pad + W:SC] = jnp.zeros((Cin, SR, pad), jnp.float32)

        # interior rows of the tile window: always valid for every tile
        pad_ref[:, pad:pad + MID, pad:pad + W] = (
            x_ref[0, :, pl.ds(row0, MID), :].astype(jnp.float32))

        # top / bottom halo rows: masked with zeros outside the image
        for r in range(pad):
            g = row0 - pad + r                                   # top halo row
            gc = jnp.clip(g, 0, H - 1)
            ok = jnp.logical_and(g >= 0, g < H).astype(jnp.float32)
            row = x_ref[0, :, pl.ds(gc, 1), :].astype(jnp.float32)
            pad_ref[:, r:r + 1, pad:pad + W] = row * ok

            rb = SR - pad + r                                    # bottom halo row
            g2 = row0 - pad + rb
            gc2 = jnp.clip(g2, 0, H - 1)
            ok2 = jnp.logical_and(g2 >= 0, g2 < H).astype(jnp.float32)
            row2 = x_ref[0, :, pl.ds(gc2, 1), :].astype(jnp.float32)
            pad_ref[:, rb:rb + 1, pad:pad + W] = row2 * ok2

        # ---- streamed depthwise conv -> channel max -> channel avg -----------
        def conv_plane(i):
            # permuted output channel i; weights already hold the 1/B_avg scale
            cin = group_of[i]              # static: source input channel
            acc = None
            for dy in range(K):
                for dx in range(K):
                    win = pad_ref[cin, dy:dy + TILE_H, dx:dx + Wout]
                    term = w_ref[i * KK + dy * K + dx] * win
                    acc = term if acc is None else acc + term
            return acc

        for j in range(Cout):
            acc = None
            for p in range(B_avg):
                c0 = 2 * (j * B_avg + p)
                m = jnp.maximum(conv_plane(c0), conv_plane(c0 + 1))
                acc = m if acc is None else acc + m
            o_ref[0, j] = acc.astype(o_ref.dtype)

    return kernel, Hout, Wout, Cout, SR, SC


# ---------------------------------------------------------------------------
# Wrapper: NCHW in / NCHW out, grid = (batch, output-row tiles)
# ---------------------------------------------------------------------------
def prcn_layer_forward(x_nchw, conv_w, index, *, nChannels, outchannels,
                       kernel_size, padding=0):
    N, Cin, H, W = x_nchw.shape
    assert Cin == nChannels
    OC, K = outchannels, kernel_size
    expansion = nChannels * OC
    B_avg = max(nChannels // 2, 1)

    Hout = H + 2 * padding - K + 1
    Wout = W + 2 * padding - K + 1
    assert Hout > 0 and Wout > 0

    # The permutation is a fixed module buffer -> fold it into the weight table
    # + a static group map (zero runtime gather).  Also fold the AvgPool scale
    # 1/B_avg into the weights (max commutes with a positive scale, conv is
    # linear), so the kernel never multiplies by 1/B_avg.
    index = [int(i) for i in index]
    w_perm = jnp.asarray(conv_w, jnp.float32)[jnp.asarray(index, jnp.int32)]
    w_flat = w_perm.reshape(expansion * K * K) * (1.0 / float(B_avg))
    group_of = tuple(idx // OC for idx in index)

    # Spatial tiling over output rows (halo handled in-kernel); tunable.
    TILE_H = 8 if Hout % 8 == 0 else Hout
    n_tiles = Hout // TILE_H

    kernel, Hout, Wout, Cout, SR, SC = _make_prcn_kernel(
        Cin, OC, K, padding, H, W, TILE_H, group_of)

    out = pl.pallas_call(
        kernel,
        out_shape=jax.ShapeDtypeStruct((N, Cout, Hout, Wout), x_nchw.dtype),
        grid=(N, n_tiles),
        in_specs=[
            # Full image per batch element, resident in VMEM across that
            # batch's row tiles (DMA'd once per batch); native dtype, up-cast
            # happens in-kernel when filling the halo scratch.
            pl.BlockSpec((1, Cin, H, W), lambda n, t: (n, 0, 0, 0)),
            pl.BlockSpec(memory_space=pltpu.MemorySpace.SMEM),   # weight table
        ],
        out_specs=pl.BlockSpec((1, Cout, TILE_H, Wout),
                               lambda n, t: (n, 0, t, 0)),
        scratch_shapes=[pltpu.VMEM((Cin, SR, SC), jnp.float32)],
        compiler_params=pltpu.CompilerParams(
            dimension_semantics=("parallel", "parallel"),
            vmem_limit_bytes=32 * 1024 * 1024),
    )(x_nchw, w_flat)
    return out


# ---------------------------------------------------------------------------
# Pure-JAX reference (NCHW, grouped conv via lax.conv) for verification
# ---------------------------------------------------------------------------
def reference_nchw(x, w, index, nChannels, padding):
    out = jax.lax.conv_general_dilated(
        x, w, window_strides=(1, 1),
        padding=((padding, padding), (padding, padding)),
        feature_group_count=nChannels,
        dimension_numbers=("NCHW", "OIHW", "NCHW"))
    out = out[:, jnp.asarray(index, jnp.int32), :, :]
    N, C, Ho, Wo = out.shape
    # MaxPool3d((2,1,1)) on a 4-D tensor pools the channel dim with stride 2.
    m = out[:, :(C // 2) * 2].reshape(N, C // 2, 2, Ho, Wo).max(axis=2)
    # AvgPool3d((nChannels//2,1,1)) pools the channel dim in blocks.
    B = max(nChannels // 2, 1)
    C2 = m.shape[1]
    a = m[:, :(C2 // B) * B].reshape(N, C2 // B, B, Ho, Wo).mean(axis=2)
    return a


if __name__ == "__main__":
    key = jax.random.PRNGKey(0)
    kx, kw, ki = jax.random.split(key, 3)

    # PRCN_layer(nChannels=4, outchannels=4, kernel_size=3, padding=1)
    nChannels, outchannels, kernel_size, padding = 4, 4, 3, 1
    N, H, W = 2, 16, 16
    expansion = nChannels * outchannels

    x = jax.random.normal(kx, (N, nChannels, H, W), jnp.float32)          # NCHW
    w = 0.3 * jax.random.normal(kw, (expansion, 1, kernel_size, kernel_size),
                                jnp.float32)                              # OIHW
    index = [int(v) for v in jax.random.permutation(ki, expansion)]       # fixed perm

    out = prcn_layer_forward(x, w, index, nChannels=nChannels,
                             outchannels=outchannels, kernel_size=kernel_size,
                             padding=padding)
    out = jax.block_until_ready(out)

    ref = jax.block_until_ready(reference_nchw(x, w, index, nChannels, padding))
    assert out.shape == ref.shape == (N, outchannels, H, W), (out.shape, ref.shape)
    assert jnp.allclose(out, ref, atol=1e-5, rtol=1e-5), float(
        jnp.max(jnp.abs(out - ref)))

    print("KERNEL_OK")
</pallas_src>

<mosaic_0001>
module attributes {stable_mosaic.version = 11 : i64} {
  func.func @kernel(%arg0: i32, %arg1: i32, %arg2: memref<1x4x16x16xf32, #tpu.memory_space<vmem>>, %arg3: memref<144xf32, #tpu.memory_space<smem>>, %arg4: memref<1x4x8x16xf32, #tpu.memory_space<vmem>>, %arg5: memref<4x10x18xf32, #tpu.memory_space<vmem>>) attributes {dimension_semantics = [#tpu.dimension_semantics<parallel>, #tpu.dimension_semantics<parallel>], iteration_bounds = array<i64: 2, 2>, scalar_prefetch = 0 : i64, scratch_operands = 1 : i64, tpu.core_type = #tpu.core_type<tc>, window_params = [{transform_indices = @transform_0, window_bounds = array<i64: 1, 4, 16, 16>}, {transform_indices = @transform_1, window_bounds = array<i64: 144>}, {transform_indices = @transform_2, window_bounds = array<i64: 1, 4, 8, 16>}]} {
    %c8_i32 = arith.constant 8 : i32
    %0 = arith.muli %arg1, %c8_i32 : i32
    %1 = tpu.assume_multiple %0, 8 : i32
    %cst = arith.constant 0.000000e+00 : f32
    %2 = vector.broadcast %cst : f32 to vector<4x10x1xf32>
    %c0 = arith.constant 0 : index
    %c0_0 = arith.constant 0 : index
    %c0_1 = arith.constant 0 : index
    %3 = vector.load %arg5[%c0, %c0_0, %c0_1] : memref<4x10x18xf32, #tpu.memory_space<vmem>>, vector<4x10x1xf32>
    tpu.vector_store %arg5[%c0, %c0_0, %c0_1], %2 {strides = array<i32>} : memref<4x10x18xf32, #tpu.memory_space<vmem>>, vector<4x10x1xf32>,
    %cst_2 = arith.constant 0.000000e+00 : f32
    %4 = vector.broadcast %cst_2 : f32 to vector<4x10x1xf32>
    %c0_3 = arith.constant 0 : index
    %c0_4 = arith.constant 0 : index
    %c17 = arith.constant 17 : index
    %5 = vector.load %arg5[%c0_3, %c0_4, %c17] : memref<4x10x18xf32, #tpu.memory_space<vmem>>, vector<4x10x1xf32>
    tpu.vector_store %arg5[%c0_3, %c0_4, %c17], %4 {strides = array<i32>} : memref<4x10x18xf32, #tpu.memory_space<vmem>>, vector<4x10x1xf32>,
    %c0_5 = arith.constant 0 : index
    %c0_6 = arith.constant 0 : index
    %6 = arith.index_cast %1 : i32 to index
    %c0_7 = arith.constant 0 : index
    %7 = vector.load %arg2[%c0_5, %c0_6, %6, %c0_7] : memref<1x4x16x16xf32, #tpu.memory_space<vmem>>, vector<1x4x8x16xf32>
    %8 = vector.shape_cast %7 : vector<1x4x8x16xf32> to vector<4x8x16xf32>
    %c0_8 = arith.constant 0 : index
    %c1 = arith.constant 1 : index
    %c1_9 = arith.constant 1 : index
    %9 = vector.load %arg5[%c0_8, %c1, %c1_9] : memref<4x10x18xf32, #tpu.memory_space<vmem>>, vector<4x8x16xf32>
    tpu.vector_store %arg5[%c0_8, %c1, %c1_9], %8 {strides = array<i32>} : memref<4x10x18xf32, #tpu.memory_space<vmem>>, vector<4x8x16xf32>,
    %c1_i32 = arith.constant 1 : i32
    %10 = arith.subi %1, %c1_i32 : i32
    %c0_i32 = arith.constant 0 : i32
    %11 = arith.addi %10, %c0_i32 : i32
    %c0_i32_10 = arith.constant 0 : i32
    %c15_i32 = arith.constant 15 : i32
    %12 = arith.maxsi %c0_i32_10, %11 : i32
    %13 = arith.minsi %c15_i32, %12 : i32
    %c0_i32_11 = arith.constant 0 : i32
    %14 = arith.cmpi sge, %11, %c0_i32_11 : i32
    %c16_i32 = arith.constant 16 : i32
    %15 = arith.cmpi slt, %11, %c16_i32 : i32
    %16 = arith.andi %14, %15 : i1
    %17 = arith.extui %16 : i1 to i32
    %18 = arith.sitofp %17 : i32 to f32
    %c0_12 = arith.constant 0 : index
    %c0_13 = arith.constant 0 : index
    %19 = arith.index_cast %13 : i32 to index
    %c0_14 = arith.constant 0 : index
    %20 = vector.load %arg2[%c0_12, %c0_13, %19, %c0_14] : memref<1x4x16x16xf32, #tpu.memory_space<vmem>>, vector<1x4x1x16xf32>
    %21 = vector.shape_cast %20 : vector<1x4x1x16xf32> to vector<4x1x16xf32>
    %22 = vector.broadcast %18 : f32 to vector<4x1x16xf32>
    %23 = arith.mulf %21, %22 : vector<4x1x16xf32>
    %c0_15 = arith.constant 0 : index
    %c0_16 = arith.constant 0 : index
    %c1_17 = arith.constant 1 : index
    %24 = vector.load %arg5[%c0_15, %c0_16, %c1_17] : memref<4x10x18xf32, #tpu.memory_space<vmem>>, vector<4x1x16xf32>
    tpu.vector_store %arg5[%c0_15, %c0_16, %c1_17], %23 {strides = array<i32>} : memref<4x10x18xf32, #tpu.memory_space<vmem>>, vector<4x1x16xf32>,
    %c1_i32_18 = arith.constant 1 : i32
    %25 = arith.subi %1, %c1_i32_18 : i32
    %c9_i32 = arith.constant 9 : i32
    %26 = arith.addi %25, %c9_i32 : i32
    %c0_i32_19 = arith.constant 0 : i32
    %c15_i32_20 = arith.constant 15 : i32
    %27 = arith.maxsi %c0_i32_19, %26 : i32
    %28 = arith.minsi %c15_i32_20, %27 : i32
    %c0_i32_21 = arith.constant 0 : i32
    %29 = arith.cmpi sge, %26, %c0_i32_21 : i32
    %c16_i32_22 = arith.constant 16 : i32
    %30 = arith.cmpi slt, %26, %c16_i32_22 : i32
    %31 = arith.andi %29, %30 : i1
    %32 = arith.extui %31 : i1 to i32
    %33 = arith.sitofp %32 : i32 to f32
    %c0_23 = arith.constant 0 : index
    %c0_24 = arith.constant 0 : index
    %34 = arith.index_cast %28 : i32 to index
    %c0_25 = arith.constant 0 : index
    %35 = vector.load %arg2[%c0_23, %c0_24, %34, %c0_25] : memref<1x4x16x16xf32, #tpu.memory_space<vmem>>, vector<1x4x1x16xf32>
    %36 = vector.shape_cast %35 : vector<1x4x1x16xf32> to vector<4x1x16xf32>
    %37 = vector.broadcast %33 : f32 to vector<4x1x16xf32>
    %38 = arith.mulf %36, %37 : vector<4x1x16xf32>
    %c0_26 = arith.constant 0 : index
    %c9 = arith.constant 9 : index
    %c1_27 = arith.constant 1 : index
    %39 = vector.load %arg5[%c0_26, %c9, %c1_27] : memref<4x10x18xf32, #tpu.memory_space<vmem>>, vector<4x1x16xf32>
    tpu.vector_store %arg5[%c0_26, %c9, %c1_27], %38 {strides = array<i32>} : memref<4x10x18xf32, #tpu.memory_space<vmem>>, vector<4x1x16xf32>,
    %c1_28 = arith.constant 1 : index
    %c0_29 = arith.constant 0 : index
    %c0_30 = arith.constant 0 : index
    %40 = vector.load %arg5[%c1_28, %c0_29, %c0_30] : memref<4x10x18xf32, #tpu.memory_space<vmem>>, vector<1x8x16xf32>
    %41 = vector.shape_cast %40 : vector<1x8x16xf32> to vector<8x16xf32>
    %c0_31 = arith.constant 0 : index
    %42 = memref.load %arg3[%c0_31] : memref<144xf32, #tpu.memory_space<smem>>
    %43 = vector.broadcast %42 : f32 to vector<8x16xf32>
    %44 = arith.mulf %43, %41 : vector<8x16xf32>
    %c1_32 = arith.constant 1 : index
    %c0_33 = arith.constant 0 : index
    %c1_34 = arith.constant 1 : index
    %45 = vector.load %arg5[%c1_32, %c0_33, %c1_34] : memref<4x10x18xf32, #tpu.memory_space<vmem>>, vector<1x8x16xf32>
    %46 = vector.shape_cast %45 : vector<1x8x16xf32> to vector<8x16xf32>
    %c1_35 = arith.constant 1 : index
    %47 = memref.load %arg3[%c1_35] : memref<144xf32, #tpu.memory_space<smem>>
    %48 = vector.broadcast %47 : f32 to vector<8x16xf32>
    %49 = arith.mulf %48, %46 : vector<8x16xf32>
    %50 = arith.addf %44, %49 : vector<8x16xf32>
    %c1_36 = arith.constant 1 : index
    %c0_37 = arith.constant 0 : index
    %c2 = arith.constant 2 : index
    %51 = vector.load %arg5[%c1_36, %c0_37, %c2] : memref<4x10x18xf32, #tpu.memory_space<vmem>>, vector<1x8x16xf32>
    %52 = vector.shape_cast %51 : vector<1x8x16xf32> to vector<8x16xf32>
    %c2_38 = arith.constant 2 : index
    %53 = memref.load %arg3[%c2_38] : memref<144xf32, #tpu.memory_space<smem>>
    %54 = vector.broadcast %53 : f32 to vector<8x16xf32>
    %55 = arith.mulf %54, %52 : vector<8x16xf32>
    %56 = arith.addf %50, %55 : vector<8x16xf32>
    %c1_39 = arith.constant 1 : index
    %c1_40 = arith.constant 1 : index
    %c0_41 = arith.constant 0 : index
    %57 = vector.load %arg5[%c1_39, %c1_40, %c0_41] : memref<4x10x18xf32, #tpu.memory_space<vmem>>, vector<1x8x16xf32>
    %58 = vector.shape_cast %57 : vector<1x8x16xf32> to vector<8x16xf32>
    %c3 = arith.constant 3 : index
    %59 = memref.load %arg3[%c3] : memref<144xf32, #tpu.memory_space<smem>>
    %60 = vector.broadcast %59 : f32 to vector<8x16xf32>
    %61 = arith.mulf %60, %58 : vector<8x16xf32>
    %62 = arith.addf %56, %61 : vector<8x16xf32>
    %c1_42 = arith.constant 1 : index
    %c1_43 = arith.constant 1 : index
    %c1_44 = arith.constant 1 : index
    %63 = vector.load %arg5[%c1_42, %c1_43, %c1_44] : memref<4x10x18xf32, #tpu.memory_space<vmem>>, vector<1x8x16xf32>
    %64 = vector.shape_cast %63 : vector<1x8x16xf32> to vector<8x16xf32>
    %c4 = arith.constant 4 : index
    %65 = memref.load %arg3[%c4] : memref<144xf32, #tpu.memory_space<smem>>
    %66 = vector.broadcast %65 : f32 to vector<8x16xf32>
    %67 = arith.mulf %66, %64 : vector<8x16xf32>
    %68 = arith.addf %62, %67 : vector<8x16xf32>
    %c1_45 = arith.constant 1 : index
    %c1_46 = arith.constant 1 : index
    %c2_47 = arith.constant 2 : index
    %69 = vector.load %arg5[%c1_45, %c1_46, %c2_47] : memref<4x10x18xf32, #tpu.memory_space<vmem>>, vector<1x8x16xf32>
    %70 = vector.shape_cast %69 : vector<1x8x16xf32> to vector<8x16xf32>
    %c5 = arith.constant 5 : index
    %71 = memref.load %arg3[%c5] : memref<144xf32, #tpu.memory_space<smem>>
    %72 = vector.broadcast %71 : f32 to vector<8x16xf32>
    %73 = arith.mulf %72, %70 : vector<8x16xf32>
    %74 = arith.addf %68, %73 : vector<8x16xf32>
    %c1_48 = arith.constant 1 : index
    %c2_49 = arith.constant 2 : index
    %c0_50 = arith.constant 0 : index
    %75 = vector.load %arg5[%c1_48, %c2_49, %c0_50] : memref<4x10x18xf32, #tpu.memory_space<vmem>>, vector<1x8x16xf32>
    %76 = vector.shape_cast %75 : vector<1x8x16xf32> to vector<8x16xf32>
    %c6 = arith.constant 6 : index
    %77 = memref.load %arg3[%c6] : memref<144xf32, #tpu.memory_space<smem>>
    %78 = vector.broadcast %77 : f32 to vector<8x16xf32>
    %79 = arith.mulf %78, %76 : vector<8x16xf32>
    %80 = arith.addf %74, %79 : vector<8x16xf32>
    %c1_51 = arith.constant 1 : index
    %c2_52 = arith.constant 2 : index
    %c1_53 = arith.constant 1 : index
    %81 = vector.load %arg5[%c1_51, %c2_52, %c1_53] : memref<4x10x18xf32, #tpu.memory_space<vmem>>, vector<1x8x16xf32>
    %82 = vector.shape_cast %81 : vector<1x8x16xf32> to vector<8x16xf32>
    %c7 = arith.constant 7 : index
    %83 = memref.load %arg3[%c7] : memref<144xf32, #tpu.memory_space<smem>>
    %84 = vector.broadcast %83 : f32 to vector<8x16xf32>
    %85 = arith.mulf %84, %82 : vector<8x16xf32>
    %86 = arith.addf %80, %85 : vector<8x16xf32>
    %c1_54 = arith.constant 1 : index
    %c2_55 = arith.constant 2 : index
    %c2_56 = arith.constant 2 : index
    %87 = vector.load %arg5[%c1_54, %c2_55, %c2_56] : memref<4x10x18xf32, #tpu.memory_space<vmem>>, vector<1x8x16xf32>
    %88 = vector.shape_cast %87 : vector<1x8x16xf32> to vector<8x16xf32>
    %c8 = arith.constant 8 : index
    %89 = memref.load %arg3[%c8] : memref<144xf32, #tpu.memory_space<smem>>
    %90 = vector.broadcast %89 : f32 to vector<8x16xf32>
    %91 = arith.mulf %90, %88 : vector<8x16xf32>
    %92 = arith.addf %86, %91 : vector<8x16xf32>
    %c1_57 = arith.constant 1 : index
    %c0_58 = arith.constant 0 : index
    %c0_59 = arith.constant 0 : index
    %93 = vector.load %arg5[%c1_57, %c0_58, %c0_59] : memref<4x10x18xf32, #tpu.memory_space<vmem>>, vector<1x8x16xf32>
    %94 = vector.shape_cast %93 : vector<1x8x16xf32> to vector<8x16xf32>
    %c9_60 = arith.constant 9 : index
    %95 = memref.load %arg3[%c9_60] : memref<144xf32, #tpu.memory_space<smem>>
    %96 = vector.broadcast %95 : f32 to vector<8x16xf32>
    %97 = arith.mulf %96, %94 : vector<8x16xf32>
    %c1_61 = arith.constant 1 : index
    %c0_62 = arith.constant 0 : index
    %c1_63 = arith.constant 1 : index
    %98 = vector.load %arg5[%c1_61, %c0_62, %c1_63] : memref<4x10x18xf32, #tpu.memory_space<vmem>>, vector<1x8x16xf32>
    %99 = vector.shape_cast %98 : vector<1x8x16xf32> to vector<8x16xf32>
    %c10 = arith.constant 10 : index
    %100 = memref.load %arg3[%c10] : memref<144xf32, #tpu.memory_space<smem>>
    %101 = vector.broadcast %100 : f32 to vector<8x16xf32>
    %102 = arith.mulf %101, %99 : vector<8x16xf32>
    %103 = arith.addf %97, %102 : vector<8x16xf32>
    %c1_64 = arith.constant 1 : index
    %c0_65 = arith.constant 0 : index
    %c2_66 = arith.constant 2 : index
    %104 = vector.load %arg5[%c1_64, %c0_65, %c2_66] : memref<4x10x18xf32, #tpu.memory_space<vmem>>, vector<1x8x16xf32>
    %105 = vector.shape_cast %104 : vector<1x8x16xf32> to vector<8x16xf32>
    %c11 = arith.constant 11 : index
    %106 = memref.load %arg3[%c11] : memref<144xf32, #tpu.memory_space<smem>>
    %107 = vector.broadcast %106 : f32 to vector<8x16xf32>
    %108 = arith.mulf %107, %105 : vector<8x16xf32>
    %109 = arith.addf %103, %108 : vector<8x16xf32>
    %c1_67 = arith.constant 1 : index
    %c1_68 = arith.constant 1 : index
    %c0_69 = arith.constant 0 : index
    %110 = vector.load %arg5[%c1_67, %c1_68, %c0_69] : memref<4x10x18xf32, #tpu.memory_space<vmem>>, vector<1x8x16xf32>
    %111 = vector.shape_cast %110 : vector<1x8x16xf32> to vector<8x16xf32>
    %c12 = arith.constant 12 : index
    %112 = memref.load %arg3[%c12] : memref<144xf32, #tpu.memory_space<smem>>
    %113 = vector.broadcast %112 : f32 to vector<8x16xf32>
    %114 = arith.mulf %113, %111 : vector<8x16xf32>
    %115 = arith.addf %109, %114 : vector<8x16xf32>
    %c1_70 = arith.constant 1 : index
    %c1_71 = arith.constant 1 : index
    %c1_72 = arith.constant 1 : index
    %116 = vector.load %arg5[%c1_70, %c1_71, %c1_72] : memref<4x10x18xf32, #tpu.memory_space<vmem>>, vector<1x8x16xf32>
    %117 = vector.shape_cast %116 : vector<1x8x16xf32> to vector<8x16xf32>
    %c13 = arith.constant 13 : index
    %118 = memref.load %arg3[%c13] : memref<144xf32, #tpu.memory_space<smem>>
    %119 = vector.broadcast %118 : f32 to vector<8x16xf32>
    %120 = arith.mulf %119, %117 : vector<8x16xf32>
    %121 = arith.addf %115, %120 : vector<8x16xf32>
    %c1_73 = arith.constant 1 : index
    %c1_74 = arith.constant 1 : index
    %c2_75 = arith.constant 2 : index
    %122 = vector.load %arg5[%c1_73, %c1_74, %c2_75] : memref<4x10x18xf32, #tpu.memory_space<vmem>>, vector<1x8x16xf32>
    %123 = vector.shape_cast %122 : vector<1x8x16xf32> to vector<8x16xf32>
    %c14 = arith.constant 14 : index
    %124 = memref.load %arg3[%c14] : memref<144xf32, #tpu.memory_space<smem>>
    %125 = vector.broadcast %124 : f32 to vector<8x16xf32>
    %126 = arith.mulf %125, %123 : vector<8x16xf32>
    %127 = arith.addf %121, %126 : vector<8x16xf32>
    %c1_76 = arith.constant 1 : index
    %c2_77 = arith.constant 2 : index
    %c0_78 = arith.constant 0 : index
    %128 = vector.load %arg5[%c1_76, %c2_77, %c0_78] : memref<4x10x18xf32, #tpu.memory_space<vmem>>, vector<1x8x16xf32>
    %129 = vector.shape_cast %128 : vector<1x8x16xf32> to vector<8x16xf32>
    %c15 = arith.constant 15 : index
    %130 = memref.load %arg3[%c15] : memref<144xf32, #tpu.memory_space<smem>>
    %131 = vector.broadcast %130 : f32 to vector<8x16xf32>
    %132 = arith.mulf %131, %129 : vector<8x16xf32>
    %133 = arith.addf %127, %132 : vector<8x16xf32>
    %c1_79 = arith.constant 1 : index
    %c2_80 = arith.constant 2 : index
    %c1_81 = arith.constant 1 : index
    %134 = vector.load %arg5[%c1_79, %c2_80, %c1_81] : memref<4x10x18xf32, #tpu.memory_space<vmem>>, vector<1x8x16xf32>
    %135 = vector.shape_cast %134 : vector<1x8x16xf32> to vector<8x16xf32>
    %c16 = arith.constant 16 : index
    %136 = memref.load %arg3[%c16] : memref<144xf32, #tpu.memory_space<smem>>
    %137 = vector.broadcast %136 : f32 to vector<8x16xf32>
    %138 = arith.mulf %137, %135 : vector<8x16xf32>
    %139 = arith.addf %133, %138 : vector<8x16xf32>
    %c1_82 = arith.constant 1 : index
    %c2_83 = arith.constant 2 : index
    %c2_84 = arith.constant 2 : index
    %140 = vector.load %arg5[%c1_82, %c2_83, %c2_84] : memref<4x10x18xf32, #tpu.memory_space<vmem>>, vector<1x8x16xf32>
    %141 = vector.shape_cast %140 : vector<1x8x16xf32> to vector<8x16xf32>
    %c17_85 = arith.constant 17 : index
    %142 = memref.load %arg3[%c17_85] : memref<144xf32, #tpu.memory_space<smem>>
    %143 = vector.broadcast %142 : f32 to vector<8x16xf32>
    %144 = arith.mulf %143, %141 : vector<8x16xf32>
    %145 = arith.addf %139, %144 : vector<8x16xf32>
    %146 = arith.maximumf %92, %145 : vector<8x16xf32>
    %c3_86 = arith.constant 3 : index
    %c0_87 = arith.constant 0 : index
    %c0_88 = arith.constant 0 : index
    %147 = vector.load %arg5[%c3_86, %c0_87, %c0_88] : memref<4x10x18xf32, #tpu.memory_space<vmem>>, vector<1x8x16xf32>
    %148 = vector.shape_cast %147 : vector<1x8x16xf32> to vector<8x16xf32>
    %c18 = arith.constant 18 : index
    %149 = memref.load %arg3[%c18] : memref<144xf32, #tpu.memory_space<smem>>
    %150 = vector.broadcast %149 : f32 to vector<8x16xf32>
    %151 = arith.mulf %150, %148 : vector<8x16xf32>
    %c3_89 = arith.constant 3 : index
    %c0_90 = arith.constant 0 : index
    %c1_91 = arith.constant 1 : index
    %152 = vector.load %arg5[%c3_89, %c0_90, %c1_91] : memref<4x10x18xf32, #tpu.memory_space<vmem>>, vector<1x8x16xf32>
    %153 = vector.shape_cast %152 : vector<1x8x16xf32> to vector<8x16xf32>
    %c19 = arith.constant 19 : index
    %154 = memref.load %arg3[%c19] : memref<144xf32, #tpu.memory_space<smem>>
    %155 = vector.broadcast %154 : f32 to vector<8x16xf32>
    %156 = arith.mulf %155, %153 : vector<8x16xf32>
    %157 = arith.addf %151, %156 : vector<8x16xf32>
    %c3_92 = arith.constant 3 : index
    %c0_93 = arith.constant 0 : index
    %c2_94 = arith.constant 2 : index
    %158 = vector.load %arg5[%c3_92, %c0_93, %c2_94] : memref<4x10x18xf32, #tpu.memory_space<vmem>>, vector<1x8x16xf32>
    %159 = vector.shape_cast %158 : vector<1x8x16xf32> to vector<8x16xf32>
    %c20 = arith.constant 20 : index
    %160 = memref.load %arg3[%c20] : memref<144xf32, #tpu.memory_space<smem>>
    %161 = vector.broadcast %160 : f32 to vector<8x16xf32>
    %162 = arith.mulf %161, %159 : vector<8x16xf32>
    %163 = arith.addf %157, %162 : vector<8x16xf32>
    %c3_95 = arith.constant 3 : index
    %c1_96 = arith.constant 1 : index
    %c0_97 = arith.constant 0 : index
    %164 = vector.load %arg5[%c3_95, %c1_96, %c0_97] : memref<4x10x18xf32, #tpu.memory_space<vmem>>, vector<1x8x16xf32>
    %165 = vector.shape_cast %164 : vector<1x8x16xf32> to vector<8x16xf32>
    %c21 = arith.constant 21 : index
    %166 = memref.load %arg3[%c21] : memref<144xf32, #tpu.memory_space<smem>>
    %167 = vector.broadcast %166 : f32 to vector<8x16xf32>
    %168 = arith.mulf %167, %165 : vector<8x16xf32>
    %169 = arith.addf %163, %168 : vector<8x16xf32>
    %c3_98 = arith.constant 3 : index
    %c1_99 = arith.constant 1 : index
    %c1_100 = arith.constant 1 : index
    %170 = vector.load %arg5[%c3_98, %c1_99, %c1_100] : memref<4x10x18xf32, #tpu.memory_space<vmem>>, vector<1x8x16xf32>
    %171 = vector.shape_cast %170 : vector<1x8x16xf32> to vector<8x16xf32>
    %c22 = arith.constant 22 : index
    %172 = memref.load %arg3[%c22] : memref<144xf32, #tpu.memory_space<smem>>
    %173 = vector.broadcast %172 : f32 to vector<8x16xf32>
    %174 = arith.mulf %173, %171 : vector<8x16xf32>
    %175 = arith.addf %169, %174 : vector<8x16xf32>
    %c3_101 = arith.constant 3 : index
    %c1_102 = arith.constant 1 : index
    %c2_103 = arith.constant 2 : index
    %176 = vector.load %arg5[%c3_101, %c1_102, %c2_103] : memref<4x10x18xf32, #tpu.memory_space<vmem>>, vector<1x8x16xf32>
    %177 = vector.shape_cast %176 : vector<1x8x16xf32> to vector<8x16xf32>
    %c23 = arith.constant 23 : index
    %178 = memref.load %arg3[%c23] : memref<144xf32, #tpu.memory_space<smem>>
    %179 = vector.broadcast %178 : f32 to vector<8x16xf32>
    %180 = arith.mulf %179, %177 : vector<8x16xf32>
    %181 = arith.addf %175, %180 : vector<8x16xf32>
    %c3_104 = arith.constant 3 : index
    %c2_105 = arith.constant 2 : index
    %c0_106 = arith.constant 0 : index
    %182 = vector.load %arg5[%c3_104, %c2_105, %c0_106] : memref<4x10x18xf32, #tpu.memory_space<vmem>>, vector<1x8x16xf32>
    %183 = vector.shape_cast %182 : vector<1x8x16xf32> to vector<8x16xf32>
    %c24 = arith.constant 24 : index
    %184 = memref.load %arg3[%c24] : memref<144xf32, #tpu.memory_space<smem>>
    %185 = vector.broadcast %184 : f32 to vector<8x16xf32>
    %186 = arith.mulf %185, %183 : vector<8x16xf32>
    %187 = arith.addf %181, %186 : vector<8x16xf32>
    %c3_107 = arith.constant 3 : index
    %c2_108 = arith.constant 2 : index
    %c1_109 = arith.constant 1 : index
    %188 = vector.load %arg5[%c3_107, %c2_108, %c1_109] : memref<4x10x18xf32, #tpu.memory_space<vmem>>, vector<1x8x16xf32>
    %189 = vector.shape_cast %188 : vector<1x8x16xf32> to vector<8x16xf32>
    %c25 = arith.constant 25 : index
    %190 = memref.load %arg3[%c25] : memref<144xf32, #tpu.memory_space<smem>>
    %191 = vector.broadcast %190 : f32 to vector<8x16xf32>
    %192 = arith.mulf %191, %189 : vector<8x16xf32>
    %193 = arith.addf %187, %192 : vector<8x16xf32>
    %c3_110 = arith.constant 3 : index
    %c2_111 = arith.constant 2 : index
    %c2_112 = arith.constant 2 : index
    %194 = vector.load %arg5[%c3_110, %c2_111, %c2_112] : memref<4x10x18xf32, #tpu.memory_space<vmem>>, vector<1x8x16xf32>
    %195 = vector.shape_cast %194 : vector<1x8x16xf32> to vector<8x16xf32>
    %c26 = arith.constant 26 : index
    %196 = memref.load %arg3[%c26] : memref<144xf32, #tpu.memory_space<smem>>
    %197 = vector.broadcast %196 : f32 to vector<8x16xf32>
    %198 = arith.mulf %197, %195 : vector<8x16xf32>
    %199 = arith.addf %193, %198 : vector<8x16xf32>
    %c0_113 = arith.constant 0 : index
    %c0_114 = arith.constant 0 : index
    %c0_115 = arith.constant 0 : index
    %200 = vector.load %arg5[%c0_113, %c0_114, %c0_115] : memref<4x10x18xf32, #tpu.memory_space<vmem>>, vector<1x8x16xf32>
    %201 = vector.shape_cast %200 : vector<1x8x16xf32> to vector<8x16xf32>
    %c27 = arith.constant 27 : index
    %202 = memref.load %arg3[%c27] : memref<144xf32, #tpu.memory_space<smem>>
    %203 = vector.broadcast %202 : f32 to vector<8x16xf32>
    %204 = arith.mulf %203, %201 : vector<8x16xf32>
    %c0_116 = arith.constant 0 : index
    %c0_117 = arith.constant 0 : index
    %c1_118 = arith.constant 1 : index
    %205 = vector.load %arg5[%c0_116, %c0_117, %c1_118] : memref<4x10x18xf32, #tpu.memory_space<vmem>>, vector<1x8x16xf32>
    %206 = vector.shape_cast %205 : vector<1x8x16xf32> to vector<8x16xf32>
    %c28 = arith.constant 28 : index
    %207 = memref.load %arg3[%c28] : memref<144xf32, #tpu.memory_space<smem>>
    %208 = vector.broadcast %207 : f32 to vector<8x16xf32>
    %209 = arith.mulf %208, %206 : vector<8x16xf32>
    %210 = arith.addf %204, %209 : vector<8x16xf32>
    %c0_119 = arith.constant 0 : index
    %c0_120 = arith.constant 0 : index
    %c2_121 = arith.constant 2 : index
    %211 = vector.load %arg5[%c0_119, %c0_120, %c2_121] : memref<4x10x18xf32, #tpu.memory_space<vmem>>, vector<1x8x16xf32>
    %212 = vector.shape_cast %211 : vector<1x8x16xf32> to vector<8x16xf32>
    %c29 = arith.constant 29 : index
    %213 = memref.load %arg3[%c29] : memref<144xf32, #tpu.memory_space<smem>>
    %214 = vector.broadcast %213 : f32 to vector<8x16xf32>
    %215 = arith.mulf %214, %212 : vector<8x16xf32>
    %216 = arith.addf %210, %215 : vector<8x16xf32>
    %c0_122 = arith.constant 0 : index
    %c1_123 = arith.constant 1 : index
    %c0_124 = arith.constant 0 : index
    %217 = vector.load %arg5[%c0_122, %c1_123, %c0_124] : memref<4x10x18xf32, #tpu.memory_space<vmem>>, vector<1x8x16xf32>
    %218 = vector.shape_cast %217 : vector<1x8x16xf32> to vector<8x16xf32>
    %c30 = arith.constant 30 : index
    %219 = memref.load %arg3[%c30] : memref<144xf32, #tpu.memory_space<smem>>
    %220 = vector.broadcast %219 : f32 to vector<8x16xf32>
    %221 = arith.mulf %220, %218 : vector<8x16xf32>
    %222 = arith.addf %216, %221 : vector<8x16xf32>
    %c0_125 = arith.constant 0 : index
    %c1_126 = arith.constant 1 : index
    %c1_127 = arith.constant 1 : index
    %223 = vector.load %arg5[%c0_125, %c1_126, %c1_127] : memref<4x10x18xf32, #tpu.memory_space<vmem>>, vector<1x8x16xf32>
    %224 = vector.shape_cast %223 : vector<1x8x16xf32> to vector<8x16xf32>
    %c31 = arith.constant 31 : index
    %225 = memref.load %arg3[%c31] : memref<144xf32, #tpu.memory_space<smem>>
    %226 = vector.broadcast %225 : f32 to vector<8x16xf32>
    %227 = arith.mulf %226, %224 : vector<8x16xf32>
    %228 = arith.addf %222, %227 : vector<8x16xf32>
    %c0_128 = arith.constant 0 : index
    %c1_129 = arith.constant 1 : index
    %c2_130 = arith.constant 2 : index
    %229 = vector.load %arg5[%c0_128, %c1_129, %c2_130] : memref<4x10x18xf32, #tpu.memory_space<vmem>>, vector<1x8x16xf32>
    %230 = vector.shape_cast %229 : vector<1x8x16xf32> to vector<8x16xf32>
    %c32 = arith.constant 32 : index
    %231 = memref.load %arg3[%c32] : memref<144xf32, #tpu.memory_space<smem>>
    %232 = vector.broadcast %231 : f32 to vector<8x16xf32>
    %233 = arith.mulf %232, %230 : vector<8x16xf32>
    %234 = arith.addf %228, %233 : vector<8x16xf32>
    %c0_131 = arith.constant 0 : index
    %c2_132 = arith.constant 2 : index
    %c0_133 = arith.constant 0 : index
    %235 = vector.load %arg5[%c0_131, %c2_132, %c0_133] : memref<4x10x18xf32, #tpu.memory_space<vmem>>, vector<1x8x16xf32>
    %236 = vector.shape_cast %235 : vector<1x8x16xf32> to vector<8x16xf32>
    %c33 = arith.constant 33 : index
    %237 = memref.load %arg3[%c33] : memref<144xf32, #tpu.memory_space<smem>>
    %238 = vector.broadcast %237 : f32 to vector<8x16xf32>
    %239 = arith.mulf %238, %236 : vector<8x16xf32>
    %240 = arith.addf %234, %239 : vector<8x16xf32>
    %c0_134 = arith.constant 0 : index
    %c2_135 = arith.constant 2 : index
    %c1_136 = arith.constant 1 : index
    %241 = vector.load %arg5[%c0_134, %c2_135, %c1_136] : memref<4x10x18xf32, #tpu.memory_space<vmem>>, vector<1x8x16xf32>
    %242 = vector.shape_cast %241 : vector<1x8x16xf32> to vector<8x16xf32>
    %c34 = arith.constant 34 : index
    %243 = memref.load %arg3[%c34] : memref<144xf32, #tpu.memory_space<smem>>
    %244 = vector.broadcast %243 : f32 to vector<8x16xf32>
    %245 = arith.mulf %244, %242 : vector<8x16xf32>
    %246 = arith.addf %240, %245 : vector<8x16xf32>
    %c0_137 = arith.constant 0 : index
    %c2_138 = arith.constant 2 : index
    %c2_139 = arith.constant 2 : index
    %247 = vector.load %arg5[%c0_137, %c2_138, %c2_139] : memref<4x10x18xf32, #tpu.memory_space<vmem>>, vector<1x8x16xf32>
    %248 = vector.shape_cast %247 : vector<1x8x16xf32> to vector<8x16xf32>
    %c35 = arith.constant 35 : index
    %249 = memref.load %arg3[%c35] : memref<144xf32, #tpu.memory_space<smem>>
    %250 = vector.broadcast %249 : f32 to vector<8x16xf32>
    %251 = arith.mulf %250, %248 : vector<8x16xf32>
    %252 = arith.addf %246, %251 : vector<8x16xf32>
    %253 = arith.maximumf %199, %252 : vector<8x16xf32>
    %254 = arith.addf %146, %253 : vector<8x16xf32>
    %c0_140 = arith.constant 0 : index
    %c0_141 = arith.constant 0 : index
    %c0_142 = arith.constant 0 : index
    %c0_143 = arith.constant 0 : index
    %255 = vector.load %arg4[%c0_140, %c0_141, %c0_142, %c0_143] : memref<1x4x8x16xf32, #tpu.memory_space<vmem>>, vector<1x1x8x16xf32>
    %256 = vector.shape_cast %255 : vector<1x1x8x16xf32> to vector<8x16xf32>
    %257 = vector.shape_cast %254 : vector<8x16xf32> to vector<1x1x8x16xf32>
    tpu.vector_store %arg4[%c0_140, %c0_141, %c0_142, %c0_143], %257 {strides = array<i32>} : memref<1x4x8x16xf32, #tpu.memory_space<vmem>>, vector<1x1x8x16xf32>,
    %c2_144 = arith.constant 2 : index
    %c0_145 = arith.constant 0 : index
    %c0_146 = arith.constant 0 : index
    %258 = vector.load %arg5[%c2_144, %c0_145, %c0_146] : memref<4x10x18xf32, #tpu.memory_space<vmem>>, vector<1x8x16xf32>
    %259 = vector.shape_cast %258 : vector<1x8x16xf32> to vector<8x16xf32>
    %c36 = arith.constant 36 : index
    %260 = memref.load %arg3[%c36] : memref<144xf32, #tpu.memory_space<smem>>
    %261 = vector.broadcast %260 : f32 to vector<8x16xf32>
    %262 = arith.mulf %261, %259 : vector<8x16xf32>
    %c2_147 = arith.constant 2 : index
    %c0_148 = arith.constant 0 : index
    %c1_149 = arith.constant 1 : index
    %263 = vector.load %arg5[%c2_147, %c0_148, %c1_149] : memref<4x10x18xf32, #tpu.memory_space<vmem>>, vector<1x8x16xf32>
    %264 = vector.shape_cast %263 : vector<1x8x16xf32> to vector<8x16xf32>
    %c37 = arith.constant 37 : index
    %265 = memref.load %arg3[%c37] : memref<144xf32, #tpu.memory_space<smem>>
    %266 = vector.broadcast %265 : f32 to vector<8x16xf32>
    %267 = arith.mulf %266, %264 : vector<8x16xf32>
    %268 = arith.addf %262, %267 : vector<8x16xf32>
    %c2_150 = arith.constant 2 : index
    %c0_151 = arith.constant 0 : index
    %c2_152 = arith.constant 2 : index
    %269 = vector.load %arg5[%c2_150, %c0_151, %c2_152] : memref<4x10x18xf32, #tpu.memory_space<vmem>>, vector<1x8x16xf32>
    %270 = vector.shape_cast %269 : vector<1x8x16xf32> to vector<8x16xf32>
    %c38 = arith.constant 38 : index
    %271 = memref.load %arg3[%c38] : memref<144xf32, #tpu.memory_space<smem>>
    %272 = vector.broadcast %271 : f32 to vector<8x16xf32>
    %273 = arith.mulf %272, %270 : vector<8x16xf32>
    %274 = arith.addf %268, %273 : vector<8x16xf32>
    %c2_153 = arith.constant 2 : index
    %c1_154 = arith.constant 1 : index
    %c0_155 = arith.constant 0 : index
    %275 = vector.load %arg5[%c2_153, %c1_154, %c0_155] : memref<4x10x18xf32, #tpu.memory_space<vmem>>, vector<1x8x16xf32>
    %276 = vector.shape_cast %275 : vector<1x8x16xf32> to vector<8x16xf32>
    %c39 = arith.constant 39 : index
    %277 = memref.load %arg3[%c39] : memref<144xf32, #tpu.memory_space<smem>>
    %278 = vector.broadcast %277 : f32 to vector<8x16xf32>
    %279 = arith.mulf %278, %276 : vector<8x16xf32>
    %280 = arith.addf %274, %279 : vector<8x16xf32>
    %c2_156 = arith.constant 2 : index
    %c1_157 = arith.constant 1 : index
    %c1_158 = arith.constant 1 : index
    %281 = vector.load %arg5[%c2_156, %c1_157, %c1_158] : memref<4x10x18xf32, #tpu.memory_space<vmem>>, vector<1x8x16xf32>
    %282 = vector.shape_cast %281 : vector<1x8x16xf32> to vector<8x16xf32>
    %c40 = arith.constant 40 : index
    %283 = memref.load %arg3[%c40] : memref<144xf32, #tpu.memory_space<smem>>
    %284 = vector.broadcast %283 : f32 to vector<8x16xf32>
    %285 = arith.mulf %284, %282 : vector<8x16xf32>
    %286 = arith.addf %280, %285 : vector<8x16xf32>
    %c2_159 = arith.constant 2 : index
    %c1_160 = arith.constant 1 : index
    %c2_161 = arith.constant 2 : index
    %287 = vector.load %arg5[%c2_159, %c1_160, %c2_161] : memref<4x10x18xf32, #tpu.memory_space<vmem>>, vector<1x8x16xf32>
    %288 = vector.shape_cast %287 : vector<1x8x16xf32> to vector<8x16xf32>
    %c41 = arith.constant 41 : index
    %289 = memref.load %arg3[%c41] : memref<144xf32, #tpu.memory_space<smem>>
    %290 = vector.broadcast %289 : f32 to vector<8x16xf32>
    %291 = arith.mulf %290, %288 : vector<8x16xf32>
    %292 = arith.addf %286, %291 : vector<8x16xf32>
    %c2_162 = arith.constant 2 : index
    %c2_163 = arith.constant 2 : index
    %c0_164 = arith.constant 0 : index
    %293 = vector.load %arg5[%c2_162, %c2_163, %c0_164] : memref<4x10x18xf32, #tpu.memory_space<vmem>>, vector<1x8x16xf32>
    %294 = vector.shape_cast %293 : vector<1x8x16xf32> to vector<8x16xf32>
    %c42 = arith.constant 42 : index
    %295 = memref.load %arg3[%c42] : memref<144xf32, #tpu.memory_space<smem>>
    %296 = vector.broadcast %295 : f32 to vector<8x16xf32>
    %297 = arith.mulf %296, %294 : vector<8x16xf32>
    %298 = arith.addf %292, %297 : vector<8x16xf32>
    %c2_165 = arith.constant 2 : index
    %c2_166 = arith.constant 2 : index
    %c1_167 = arith.constant 1 : index
    %299 = vector.load %arg5[%c2_165, %c2_166, %c1_167] : memref<4x10x18xf32, #tpu.memory_space<vmem>>, vector<1x8x16xf32>
    %300 = vector.shape_cast %299 : vector<1x8x16xf32> to vector<8x16xf32>
    %c43 = arith.constant 43 : index
    %301 = memref.load %arg3[%c43] : memref<144xf32, #tpu.memory_space<smem>>
    %302 = vector.broadcast %301 : f32 to vector<8x16xf32>
    %303 = arith.mulf %302, %300 : vector<8x16xf32>
    %304 = arith.addf %298, %303 : vector<8x16xf32>
    %c2_168 = arith.constant 2 : index
    %c2_169 = arith.constant 2 : index
    %c2_170 = arith.constant 2 : index
    %305 = vector.load %arg5[%c2_168, %c2_169, %c2_170] : memref<4x10x18xf32, #tpu.memory_space<vmem>>, vector<1x8x16xf32>
    %306 = vector.shape_cast %305 : vector<1x8x16xf32> to vector<8x16xf32>
    %c44 = arith.constant 44 : index
    %307 = memref.load %arg3[%c44] : memref<144xf32, #tpu.memory_space<smem>>
    %308 = vector.broadcast %307 : f32 to vector<8x16xf32>
    %309 = arith.mulf %308, %306 : vector<8x16xf32>
    %310 = arith.addf %304, %309 : vector<8x16xf32>
    %c0_171 = arith.constant 0 : index
    %c0_172 = arith.constant 0 : index
    %c0_173 = arith.constant 0 : index
    %311 = vector.load %arg5[%c0_171, %c0_172, %c0_173] : memref<4x10x18xf32, #tpu.memory_space<vmem>>, vector<1x8x16xf32>
    %312 = vector.shape_cast %311 : vector<1x8x16xf32> to vector<8x16xf32>
    %c45 = arith.constant 45 : index
    %313 = memref.load %arg3[%c45] : memref<144xf32, #tpu.memory_space<smem>>
    %314 = vector.broadcast %313 : f32 to vector<8x16xf32>
    %315 = arith.mulf %314, %312 : vector<8x16xf32>
    %c0_174 = arith.constant 0 : index
    %c0_175 = arith.constant 0 : index
    %c1_176 = arith.constant 1 : index
    %316 = vector.load %arg5[%c0_174, %c0_175, %c1_176] : memref<4x10x18xf32, #tpu.memory_space<vmem>>, vector<1x8x16xf32>
    %317 = vector.shape_cast %316 : vector<1x8x16xf32> to vector<8x16xf32>
    %c46 = arith.constant 46 : index
    %318 = memref.load %arg3[%c46] : memref<144xf32, #tpu.memory_space<smem>>
    %319 = vector.broadcast %318 : f32 to vector<8x16xf32>
    %320 = arith.mulf %319, %317 : vector<8x16xf32>
    %321 = arith.addf %315, %320 : vector<8x16xf32>
    %c0_177 = arith.constant 0 : index
    %c0_178 = arith.constant 0 : index
    %c2_179 = arith.constant 2 : index
    %322 = vector.load %arg5[%c0_177, %c0_178, %c2_179] : memref<4x10x18xf32, #tpu.memory_space<vmem>>, vector<1x8x16xf32>
    %323 = vector.shape_cast %322 : vector<1x8x16xf32> to vector<8x16xf32>
    %c47 = arith.constant 47 : index
    %324 = memref.load %arg3[%c47] : memref<144xf32, #tpu.memory_space<smem>>
    %325 = vector.broadcast %324 : f32 to vector<8x16xf32>
    %326 = arith.mulf %325, %323 : vector<8x16xf32>
    %327 = arith.addf %321, %326 : vector<8x16xf32>
    %c0_180 = arith.constant 0 : index
    %c1_181 = arith.constant 1 : index
    %c0_182 = arith.constant 0 : index
    %328 = vector.load %arg5[%c0_180, %c1_181, %c0_182] : memref<4x10x18xf32, #tpu.memory_space<vmem>>, vector<1x8x16xf32>
    %329 = vector.shape_cast %328 : vector<1x8x16xf32> to vector<8x16xf32>
    %c48 = arith.constant 48 : index
    %330 = memref.load %arg3[%c48] : memref<144xf32, #tpu.memory_space<smem>>
    %331 = vector.broadcast %330 : f32 to vector<8x16xf32>
    %332 = arith.mulf %331, %329 : vector<8x16xf32>
    %333 = arith.addf %327, %332 : vector<8x16xf32>
    %c0_183 = arith.constant 0 : index
    %c1_184 = arith.constant 1 : index
    %c1_185 = arith.constant 1 : index
    %334 = vector.load %arg5[%c0_183, %c1_184, %c1_185] : memref<4x10x18xf32, #tpu.memory_space<vmem>>, vector<1x8x16xf32>
    %335 = vector.shape_cast %334 : vector<1x8x16xf32> to vector<8x16xf32>
    %c49 = arith.constant 49 : index
    %336 = memref.load %arg3[%c49] : memref<144xf32, #tpu.memory_space<smem>>
    %337 = vector.broadcast %336 : f32 to vector<8x16xf32>
    %338 = arith.mulf %337, %335 : vector<8x16xf32>
    %339 = arith.addf %333, %338 : vector<8x16xf32>
    %c0_186 = arith.constant 0 : index
    %c1_187 = arith.constant 1 : index
    %c2_188 = arith.constant 2 : index
    %340 = vector.load %arg5[%c0_186, %c1_187, %c2_188] : memref<4x10x18xf32, #tpu.memory_space<vmem>>, vector<1x8x16xf32>
    %341 = vector.shape_cast %340 : vector<1x8x16xf32> to vector<8x16xf32>
    %c50 = arith.constant 50 : index
    %342 = memref.load %arg3[%c50] : memref<144xf32, #tpu.memory_space<smem>>
    %343 = vector.broadcast %342 : f32 to vector<8x16xf32>
    %344 = arith.mulf %343, %341 : vector<8x16xf32>
    %345 = arith.addf %339, %344 : vector<8x16xf32>
    %c0_189 = arith.constant 0 : index
    %c2_190 = arith.constant 2 : index
    %c0_191 = arith.constant 0 : index
    %346 = vector.load %arg5[%c0_189, %c2_190, %c0_191] : memref<4x10x18xf32, #tpu.memory_space<vmem>>, vector<1x8x16xf32>
    %347 = vector.shape_cast %346 : vector<1x8x16xf32> to vector<8x16xf32>
    %c51 = arith.constant 51 : index
    %348 = memref.load %arg3[%c51] : memref<144xf32, #tpu.memory_space<smem>>
    %349 = vector.broadcast %348 : f32 to vector<8x16xf32>
    %350 = arith.mulf %349, %347 : vector<8x16xf32>
    %351 = arith.addf %345, %350 : vector<8x16xf32>
    %c0_192 = arith.constant 0 : index
    %c2_193 = arith.constant 2 : index
    %c1_194 = arith.constant 1 : index
    %352 = vector.load %arg5[%c0_192, %c2_193, %c1_194] : memref<4x10x18xf32, #tpu.memory_space<vmem>>, vector<1x8x16xf32>
    %353 = vector.shape_cast %352 : vector<1x8x16xf32> to vector<8x16xf32>
    %c52 = arith.constant 52 : index
    %354 = memref.load %arg3[%c52] : memref<144xf32, #tpu.memory_space<smem>>
    %355 = vector.broadcast %354 : f32 to vector<8x16xf32>
    %356 = arith.mulf %355, %353 : vector<8x16xf32>
    %357 = arith.addf %351, %356 : vector<8x16xf32>
    %c0_195 = arith.constant 0 : index
    %c2_196 = arith.constant 2 : index
    %c2_197 = arith.constant 2 : index
    %358 = vector.load %arg5[%c0_195, %c2_196, %c2_197] : memref<4x10x18xf32, #tpu.memory_space<vmem>>, vector<1x8x16xf32>
    %359 = vector.shape_cast %358 : vector<1x8x16xf32> to vector<8x16xf32>
    %c53 = arith.constant 53 : index
    %360 = memref.load %arg3[%c53] : memref<144xf32, #tpu.memory_space<smem>>
    %361 = vector.broadcast %360 : f32 to vector<8x16xf32>
    %362 = arith.mulf %361, %359 : vector<8x16xf32>
    %363 = arith.addf %357, %362 : vector<8x16xf32>
    %364 = arith.maximumf %310, %363 : vector<8x16xf32>
    %c3_198 = arith.constant 3 : index
    %c0_199 = arith.constant 0 : index
    %c0_200 = arith.constant 0 : index
    %365 = vector.load %arg5[%c3_198, %c0_199, %c0_200] : memref<4x10x18xf32, #tpu.memory_space<vmem>>, vector<1x8x16xf32>
    %366 = vector.shape_cast %365 : vector<1x8x16xf32> to vector<8x16xf32>
    %c54 = arith.constant 54 : index
    %367 = memref.load %arg3[%c54] : memref<144xf32, #tpu.memory_space<smem>>
    %368 = vector.broadcast %367 : f32 to vector<8x16xf32>
    %369 = arith.mulf %368, %366 : vector<8x16xf32>
    %c3_201 = arith.constant 3 : index
    %c0_202 = arith.constant 0 : index
    %c1_203 = arith.constant 1 : index
    %370 = vector.load %arg5[%c3_201, %c0_202, %c1_203] : memref<4x10x18xf32, #tpu.memory_space<vmem>>, vector<1x8x16xf32>
    %371 = vector.shape_cast %370 : vector<1x8x16xf32> to vector<8x16xf32>
    %c55 = arith.constant 55 : index
    %372 = memref.load %arg3[%c55] : memref<144xf32, #tpu.memory_space<smem>>
    %373 = vector.broadcast %372 : f32 to vector<8x16xf32>
    %374 = arith.mulf %373, %371 : vector<8x16xf32>
    %375 = arith.addf %369, %374 : vector<8x16xf32>
    %c3_204 = arith.constant 3 : index
    %c0_205 = arith.constant 0 : index
    %c2_206 = arith.constant 2 : index
    %376 = vector.load %arg5[%c3_204, %c0_205, %c2_206] : memref<4x10x18xf32, #tpu.memory_space<vmem>>, vector<1x8x16xf32>
    %377 = vector.shape_cast %376 : vector<1x8x16xf32> to vector<8x16xf32>
    %c56 = arith.constant 56 : index
    %378 = memref.load %arg3[%c56] : memref<144xf32, #tpu.memory_space<smem>>
    %379 = vector.broadcast %378 : f32 to vector<8x16xf32>
    %380 = arith.mulf %379, %377 : vector<8x16xf32>
    %381 = arith.addf %375, %380 : vector<8x16xf32>
    %c3_207 = arith.constant 3 : index
    %c1_208 = arith.constant 1 : index
    %c0_209 = arith.constant 0 : index
    %382 = vector.load %arg5[%c3_207, %c1_208, %c0_209] : memref<4x10x18xf32, #tpu.memory_space<vmem>>, vector<1x8x16xf32>
    %383 = vector.shape_cast %382 : vector<1x8x16xf32> to vector<8x16xf32>
    %c57 = arith.constant 57 : index
    %384 = memref.load %arg3[%c57] : memref<144xf32, #tpu.memory_space<smem>>
    %385 = vector.broadcast %384 : f32 to vector<8x16xf32>
    %386 = arith.mulf %385, %383 : vector<8x16xf32>
    %387 = arith.addf %381, %386 : vector<8x16xf32>
    %c3_210 = arith.constant 3 : index
    %c1_211 = arith.constant 1 : index
    %c1_212 = arith.constant 1 : index
    %388 = vector.load %arg5[%c3_210, %c1_211, %c1_212] : memref<4x10x18xf32, #tpu.memory_space<vmem>>, vector<1x8x16xf32>
    %389 = vector.shape_cast %388 : vector<1x8x16xf32> to vector<8x16xf32>
    %c58 = arith.constant 58 : index
    %390 = memref.load %arg3[%c58] : memref<144xf32, #tpu.memory_space<smem>>
    %391 = vector.broadcast %390 : f32 to vector<8x16xf32>
    %392 = arith.mulf %391, %389 : vector<8x16xf32>
    %393 = arith.addf %387, %392 : vector<8x16xf32>
    %c3_213 = arith.constant 3 : index
    %c1_214 = arith.constant 1 : index
    %c2_215 = arith.constant 2 : index
    %394 = vector.load %arg5[%c3_213, %c1_214, %c2_215] : memref<4x10x18xf32, #tpu.memory_space<vmem>>, vector<1x8x16xf32>
    %395 = vector.shape_cast %394 : vector<1x8x16xf32> to vector<8x16xf32>
    %c59 = arith.constant 59 : index
    %396 = memref.load %arg3[%c59] : memref<144xf32, #tpu.memory_space<smem>>
    %397 = vector.broadcast %396 : f32 to vector<8x16xf32>
    %398 = arith.mulf %397, %395 : vector<8x16xf32>
    %399 = arith.addf %393, %398 : vector<8x16xf32>
    %c3_216 = arith.constant 3 : index
    %c2_217 = arith.constant 2 : index
    %c0_218 = arith.constant 0 : index
    %400 = vector.load %arg5[%c3_216, %c2_217, %c0_218] : memref<4x10x18xf32, #tpu.memory_space<vmem>>, vector<1x8x16xf32>
    %401 = vector.shape_cast %400 : vector<1x8x16xf32> to vector<8x16xf32>
    %c60 = arith.constant 60 : index
    %402 = memref.load %arg3[%c60] : memref<144xf32, #tpu.memory_space<smem>>
    %403 = vector.broadcast %402 : f32 to vector<8x16xf32>
    %404 = arith.mulf %403, %401 : vector<8x16xf32>
    %405 = arith.addf %399, %404 : vector<8x16xf32>
    %c3_219 = arith.constant 3 : index
    %c2_220 = arith.constant 2 : index
    %c1_221 = arith.constant 1 : index
    %406 = vector.load %arg5[%c3_219, %c2_220, %c1_221] : memref<4x10x18xf32, #tpu.memory_space<vmem>>, vector<1x8x16xf32>
    %407 = vector.shape_cast %406 : vector<1x8x16xf32> to vector<8x16xf32>
    %c61 = arith.constant 61 : index
    %408 = memref.load %arg3[%c61] : memref<144xf32, #tpu.memory_space<smem>>
    %409 = vector.broadcast %408 : f32 to vector<8x16xf32>
    %410 = arith.mulf %409, %407 : vector<8x16xf32>
    %411 = arith.addf %405, %410 : vector<8x16xf32>
    %c3_222 = arith.constant 3 : index
    %c2_223 = arith.constant 2 : index
    %c2_224 = arith.constant 2 : index
    %412 = vector.load %arg5[%c3_222, %c2_223, %c2_224] : memref<4x10x18xf32, #tpu.memory_space<vmem>>, vector<1x8x16xf32>
    %413 = vector.shape_cast %412 : vector<1x8x16xf32> to vector<8x16xf32>
    %c62 = arith.constant 62 : index
    %414 = memref.load %arg3[%c62] : memref<144xf32, #tpu.memory_space<smem>>
    %415 = vector.broadcast %414 : f32 to vector<8x16xf32>
    %416 = arith.mulf %415, %413 : vector<8x16xf32>
    %417 = arith.addf %411, %416 : vector<8x16xf32>
    %c1_225 = arith.constant 1 : index
    %c0_226 = arith.constant 0 : index
    %c0_227 = arith.constant 0 : index
    %418 = vector.load %arg5[%c1_225, %c0_226, %c0_227] : memref<4x10x18xf32, #tpu.memory_space<vmem>>, vector<1x8x16xf32>
    %419 = vector.shape_cast %418 : vector<1x8x16xf32> to vector<8x16xf32>
    %c63 = arith.constant 63 : index
    %420 = memref.load %arg3[%c63] : memref<144xf32, #tpu.memory_space<smem>>
    %421 = vector.broadcast %420 : f32 to vector<8x16xf32>
    %422 = arith.mulf %421, %419 : vector<8x16xf32>
    %c1_228 = arith.constant 1 : index
    %c0_229 = arith.constant 0 : index
    %c1_230 = arith.constant 1 : index
    %423 = vector.load %arg5[%c1_228, %c0_229, %c1_230] : memref<4x10x18xf32, #tpu.memory_space<vmem>>, vector<1x8x16xf32>
    %424 = vector.shape_cast %423 : vector<1x8x16xf32> to vector<8x16xf32>
    %c64 = arith.constant 64 : index
    %425 = memref.load %arg3[%c64] : memref<144xf32, #tpu.memory_space<smem>>
    %426 = vector.broadcast %425 : f32 to vector<8x16xf32>
    %427 = arith.mulf %426, %424 : vector<8x16xf32>
    %428 = arith.addf %422, %427 : vector<8x16xf32>
    %c1_231 = arith.constant 1 : index
    %c0_232 = arith.constant 0 : index
    %c2_233 = arith.constant 2 : index
    %429 = vector.load %arg5[%c1_231, %c0_232, %c2_233] : memref<4x10x18xf32, #tpu.memory_space<vmem>>, vector<1x8x16xf32>
    %430 = vector.shape_cast %429 : vector<1x8x16xf32> to vector<8x16xf32>
    %c65 = arith.constant 65 : index
    %431 = memref.load %arg3[%c65] : memref<144xf32, #tpu.memory_space<smem>>
    %432 = vector.broadcast %431 : f32 to vector<8x16xf32>
    %433 = arith.mulf %432, %430 : vector<8x16xf32>
    %434 = arith.addf %428, %433 : vector<8x16xf32>
    %c1_234 = arith.constant 1 : index
    %c1_235 = arith.constant 1 : index
    %c0_236 = arith.constant 0 : index
    %435 = vector.load %arg5[%c1_234, %c1_235, %c0_236] : memref<4x10x18xf32, #tpu.memory_space<vmem>>, vector<1x8x16xf32>
    %436 = vector.shape_cast %435 : vector<1x8x16xf32> to vector<8x16xf32>
    %c66 = arith.constant 66 : index
    %437 = memref.load %arg3[%c66] : memref<144xf32, #tpu.memory_space<smem>>
    %438 = vector.broadcast %437 : f32 to vector<8x16xf32>
    %439 = arith.mulf %438, %436 : vector<8x16xf32>
    %440 = arith.addf %434, %439 : vector<8x16xf32>
    %c1_237 = arith.constant 1 : index
    %c1_238 = arith.constant 1 : index
    %c1_239 = arith.constant 1 : index
    %441 = vector.load %arg5[%c1_237, %c1_238, %c1_239] : memref<4x10x18xf32, #tpu.memory_space<vmem>>, vector<1x8x16xf32>
    %442 = vector.shape_cast %441 : vector<1x8x16xf32> to vector<8x16xf32>
    %c67 = arith.constant 67 : index
    %443 = memref.load %arg3[%c67] : memref<144xf32, #tpu.memory_space<smem>>
    %444 = vector.broadcast %443 : f32 to vector<8x16xf32>
    %445 = arith.mulf %444, %442 : vector<8x16xf32>
    %446 = arith.addf %440, %445 : vector<8x16xf32>
    %c1_240 = arith.constant 1 : index
    %c1_241 = arith.constant 1 : index
    %c2_242 = arith.constant 2 : index
    %447 = vector.load %arg5[%c1_240, %c1_241, %c2_242] : memref<4x10x18xf32, #tpu.memory_space<vmem>>, vector<1x8x16xf32>
    %448 = vector.shape_cast %447 : vector<1x8x16xf32> to vector<8x16xf32>
    %c68 = arith.constant 68 : index
    %449 = memref.load %arg3[%c68] : memref<144xf32, #tpu.memory_space<smem>>
    %450 = vector.broadcast %449 : f32 to vector<8x16xf32>
    %451 = arith.mulf %450, %448 : vector<8x16xf32>
    %452 = arith.addf %446, %451 : vector<8x16xf32>
    %c1_243 = arith.constant 1 : index
    %c2_244 = arith.constant 2 : index
    %c0_245 = arith.constant 0 : index
    %453 = vector.load %arg5[%c1_243, %c2_244, %c0_245] : memref<4x10x18xf32, #tpu.memory_space<vmem>>, vector<1x8x16xf32>
    %454 = vector.shape_cast %453 : vector<1x8x16xf32> to vector<8x16xf32>
    %c69 = arith.constant 69 : index
    %455 = memref.load %arg3[%c69] : memref<144xf32, #tpu.memory_space<smem>>
    %456 = vector.broadcast %455 : f32 to vector<8x16xf32>
    %457 = arith.mulf %456, %454 : vector<8x16xf32>
    %458 = arith.addf %452, %457 : vector<8x16xf32>
    %c1_246 = arith.constant 1 : index
    %c2_247 = arith.constant 2 : index
    %c1_248 = arith.constant 1 : index
    %459 = vector.load %arg5[%c1_246, %c2_247, %c1_248] : memref<4x10x18xf32, #tpu.memory_space<vmem>>, vector<1x8x16xf32>
    %460 = vector.shape_cast %459 : vector<1x8x16xf32> to vector<8x16xf32>
    %c70 = arith.constant 70 : index
    %461 = memref.load %arg3[%c70] : memref<144xf32, #tpu.memory_space<smem>>
    %462 = vector.broadcast %461 : f32 to vector<8x16xf32>
    %463 = arith.mulf %462, %460 : vector<8x16xf32>
    %464 = arith.addf %458, %463 : vector<8x16xf32>
    %c1_249 = arith.constant 1 : index
    %c2_250 = arith.constant 2 : index
    %c2_251 = arith.constant 2 : index
    %465 = vector.load %arg5[%c1_249, %c2_250, %c2_251] : memref<4x10x18xf32, #tpu.memory_space<vmem>>, vector<1x8x16xf32>
    %466 = vector.shape_cast %465 : vector<1x8x16xf32> to vector<8x16xf32>
    %c71 = arith.constant 71 : index
    %467 = memref.load %arg3[%c71] : memref<144xf32, #tpu.memory_space<smem>>
    %468 = vector.broadcast %467 : f32 to vector<8x16xf32>
    %469 = arith.mulf %468, %466 : vector<8x16xf32>
    %470 = arith.addf %464, %469 : vector<8x16xf32>
    %471 = arith.maximumf %417, %470 : vector<8x16xf32>
    %472 = arith.addf %364, %471 : vector<8x16xf32>
    %c0_252 = arith.constant 0 : index
    %c1_253 = arith.constant 1 : index
    %c0_254 = arith.constant 0 : index
    %c0_255 = arith.constant 0 : index
    %473 = vector.load %arg4[%c0_252, %c1_253, %c0_254, %c0_255] : memref<1x4x8x16xf32, #tpu.memory_space<vmem>>, vector<1x1x8x16xf32>
    %474 = vector.shape_cast %473 : vector<1x1x8x16xf32> to vector<8x16xf32>
    %475 = vector.shape_cast %472 : vector<8x16xf32> to vector<1x1x8x16xf32>
    tpu.vector_store %arg4[%c0_252, %c1_253, %c0_254, %c0_255], %475 {strides = array<i32>} : memref<1x4x8x16xf32, #tpu.memory_space<vmem>>, vector<1x1x8x16xf32>,
    %c3_256 = arith.constant 3 : index
    %c0_257 = arith.constant 0 : index
    %c0_258 = arith.constant 0 : index
    %476 = vector.load %arg5[%c3_256, %c0_257, %c0_258] : memref<4x10x18xf32, #tpu.memory_space<vmem>>, vector<1x8x16xf32>
    %477 = vector.shape_cast %476 : vector<1x8x16xf32> to vector<8x16xf32>
    %c72 = arith.constant 72 : index
    %478 = memref.load %arg3[%c72] : memref<144xf32, #tpu.memory_space<smem>>
    %479 = vector.broadcast %478 : f32 to vector<8x16xf32>
    %480 = arith.mulf %479, %477 : vector<8x16xf32>
    %c3_259 = arith.constant 3 : index
    %c0_260 = arith.constant 0 : index
    %c1_261 = arith.constant 1 : index
    %481 = vector.load %arg5[%c3_259, %c0_260, %c1_261] : memref<4x10x18xf32, #tpu.memory_space<vmem>>, vector<1x8x16xf32>
    %482 = vector.shape_cast %481 : vector<1x8x16xf32> to vector<8x16xf32>
    %c73 = arith.constant 73 : index
    %483 = memref.load %arg3[%c73] : memref<144xf32, #tpu.memory_space<smem>>
    %484 = vector.broadcast %483 : f32 to vector<8x16xf32>
    %485 = arith.mulf %484, %482 : vector<8x16xf32>
    %486 = arith.addf %480, %485 : vector<8x16xf32>
    %c3_262 = arith.constant 3 : index
    %c0_263 = arith.constant 0 : index
    %c2_264 = arith.constant 2 : index
    %487 = vector.load %arg5[%c3_262, %c0_263, %c2_264] : memref<4x10x18xf32, #tpu.memory_space<vmem>>, vector<1x8x16xf32>
    %488 = vector.shape_cast %487 : vector<1x8x16xf32> to vector<8x16xf32>
    %c74 = arith.constant 74 : index
    %489 = memref.load %arg3[%c74] : memref<144xf32, #tpu.memory_space<smem>>
    %490 = vector.broadcast %489 : f32 to vector<8x16xf32>
    %491 = arith.mulf %490, %488 : vector<8x16xf32>
    %492 = arith.addf %486, %491 : vector<8x16xf32>
    %c3_265 = arith.constant 3 : index
    %c1_266 = arith.constant 1 : index
    %c0_267 = arith.constant 0 : index
    %493 = vector.load %arg5[%c3_265, %c1_266, %c0_267] : memref<4x10x18xf32, #tpu.memory_space<vmem>>, vector<1x8x16xf32>
    %494 = vector.shape_cast %493 : vector<1x8x16xf32> to vector<8x16xf32>
    %c75 = arith.constant 75 : index
    %495 = memref.load %arg3[%c75] : memref<144xf32, #tpu.memory_space<smem>>
    %496 = vector.broadcast %495 : f32 to vector<8x16xf32>
    %497 = arith.mulf %496, %494 : vector<8x16xf32>
    %498 = arith.addf %492, %497 : vector<8x16xf32>
    %c3_268 = arith.constant 3 : index
    %c1_269 = arith.constant 1 : index
    %c1_270 = arith.constant 1 : index
    %499 = vector.load %arg5[%c3_268, %c1_269, %c1_270] : memref<4x10x18xf32, #tpu.memory_space<vmem>>, vector<1x8x16xf32>
    %500 = vector.shape_cast %499 : vector<1x8x16xf32> to vector<8x16xf32>
    %c76 = arith.constant 76 : index
    %501 = memref.load %arg3[%c76] : memref<144xf32, #tpu.memory_space<smem>>
    %502 = vector.broadcast %501 : f32 to vector<8x16xf32>
    %503 = arith.mulf %502, %500 : vector<8x16xf32>
    %504 = arith.addf %498, %503 : vector<8x16xf32>
    %c3_271 = arith.constant 3 : index
    %c1_272 = arith.constant 1 : index
    %c2_273 = arith.constant 2 : index
    %505 = vector.load %arg5[%c3_271, %c1_272, %c2_273] : memref<4x10x18xf32, #tpu.memory_space<vmem>>, vector<1x8x16xf32>
    %506 = vector.shape_cast %505 : vector<1x8x16xf32> to vector<8x16xf32>
    %c77 = arith.constant 77 : index
    %507 = memref.load %arg3[%c77] : memref<144xf32, #tpu.memory_space<smem>>
    %508 = vector.broadcast %507 : f32 to vector<8x16xf32>
    %509 = arith.mulf %508, %506 : vector<8x16xf32>
    %510 = arith.addf %504, %509 : vector<8x16xf32>
    %c3_274 = arith.constant 3 : index
    %c2_275 = arith.constant 2 : index
    %c0_276 = arith.constant 0 : index
    %511 = vector.load %arg5[%c3_274, %c2_275, %c0_276] : memref<4x10x18xf32, #tpu.memory_space<vmem>>, vector<1x8x16xf32>
    %512 = vector.shape_cast %511 : vector<1x8x16xf32> to vector<8x16xf32>
    %c78 = arith.constant 78 : index
    %513 = memref.load %arg3[%c78] : memref<144xf32, #tpu.memory_space<smem>>
    %514 = vector.broadcast %513 : f32 to vector<8x16xf32>
    %515 = arith.mulf %514, %512 : vector<8x16xf32>
    %516 = arith.addf %510, %515 : vector<8x16xf32>
    %c3_277 = arith.constant 3 : index
    %c2_278 = arith.constant 2 : index
    %c1_279 = arith.constant 1 : index
    %517 = vector.load %arg5[%c3_277, %c2_278, %c1_279] : memref<4x10x18xf32, #tpu.memory_space<vmem>>, vector<1x8x16xf32>
    %518 = vector.shape_cast %517 : vector<1x8x16xf32> to vector<8x16xf32>
    %c79 = arith.constant 79 : index
    %519 = memref.load %arg3[%c79] : memref<144xf32, #tpu.memory_space<smem>>
    %520 = vector.broadcast %519 : f32 to vector<8x16xf32>
    %521 = arith.mulf %520, %518 : vector<8x16xf32>
    %522 = arith.addf %516, %521 : vector<8x16xf32>
    %c3_280 = arith.constant 3 : index
    %c2_281 = arith.constant 2 : index
    %c2_282 = arith.constant 2 : index
    %523 = vector.load %arg5[%c3_280, %c2_281, %c2_282] : memref<4x10x18xf32, #tpu.memory_space<vmem>>, vector<1x8x16xf32>
    %524 = vector.shape_cast %523 : vector<1x8x16xf32> to vector<8x16xf32>
    %c80 = arith.constant 80 : index
    %525 = memref.load %arg3[%c80] : memref<144xf32, #tpu.memory_space<smem>>
    %526 = vector.broadcast %525 : f32 to vector<8x16xf32>
    %527 = arith.mulf %526, %524 : vector<8x16xf32>
    %528 = arith.addf %522, %527 : vector<8x16xf32>
    %c2_283 = arith.constant 2 : index
    %c0_284 = arith.constant 0 : index
    %c0_285 = arith.constant 0 : index
    %529 = vector.load %arg5[%c2_283, %c0_284, %c0_285] : memref<4x10x18xf32, #tpu.memory_space<vmem>>, vector<1x8x16xf32>
    %530 = vector.shape_cast %529 : vector<1x8x16xf32> to vector<8x16xf32>
    %c81 = arith.constant 81 : index
    %531 = memref.load %arg3[%c81] : memref<144xf32, #tpu.memory_space<smem>>
    %532 = vector.broadcast %531 : f32 to vector<8x16xf32>
    %533 = arith.mulf %532, %530 : vector<8x16xf32>
    %c2_286 = arith.constant 2 : index
    %c0_287 = arith.constant 0 : index
    %c1_288 = arith.constant 1 : index
    %534 = vector.load %arg5[%c2_286, %c0_287, %c1_288] : memref<4x10x18xf32, #tpu.memory_space<vmem>>, vector<1x8x16xf32>
    %535 = vector.shape_cast %534 : vector<1x8x16xf32> to vector<8x16xf32>
    %c82 = arith.constant 82 : index
    %536 = memref.load %arg3[%c82] : memref<144xf32, #tpu.memory_space<smem>>
    %537 = vector.broadcast %536 : f32 to vector<8x16xf32>
    %538 = arith.mulf %537, %535 : vector<8x16xf32>
    %539 = arith.addf %533, %538 : vector<8x16xf32>
    %c2_289 = arith.constant 2 : index
    %c0_290 = arith.constant 0 : index
    %c2_291 = arith.constant 2 : index
    %540 = vector.load %arg5[%c2_289, %c0_290, %c2_291] : memref<4x10x18xf32, #tpu.memory_space<vmem>>, vector<1x8x16xf32>
    %541 = vector.shape_cast %540 : vector<1x8x16xf32> to vector<8x16xf32>
    %c83 = arith.constant 83 : index
    %542 = memref.load %arg3[%c83] : memref<144xf32, #tpu.memory_space<smem>>
    %543 = vector.broadcast %542 : f32 to vector<8x16xf32>
    %544 = arith.mulf %543, %541 : vector<8x16xf32>
    %545 = arith.addf %539, %544 : vector<8x16xf32>
    %c2_292 = arith.constant 2 : index
    %c1_293 = arith.constant 1 : index
    %c0_294 = arith.constant 0 : index
    %546 = vector.load %arg5[%c2_292, %c1_293, %c0_294] : memref<4x10x18xf32, #tpu.memory_space<vmem>>, vector<1x8x16xf32>
    %547 = vector.shape_cast %546 : vector<1x8x16xf32> to vector<8x16xf32>
    %c84 = arith.constant 84 : index
    %548 = memref.load %arg3[%c84] : memref<144xf32, #tpu.memory_space<smem>>
    %549 = vector.broadcast %548 : f32 to vector<8x16xf32>
    %550 = arith.mulf %549, %547 : vector<8x16xf32>
    %551 = arith.addf %545, %550 : vector<8x16xf32>
    %c2_295 = arith.constant 2 : index
    %c1_296 = arith.constant 1 : index
    %c1_297 = arith.constant 1 : index
    %552 = vector.load %arg5[%c2_295, %c1_296, %c1_297] : memref<4x10x18xf32, #tpu.memory_space<vmem>>, vector<1x8x16xf32>
    %553 = vector.shape_cast %552 : vector<1x8x16xf32> to vector<8x16xf32>
    %c85 = arith.constant 85 : index
    %554 = memref.load %arg3[%c85] : memref<144xf32, #tpu.memory_space<smem>>
    %555 = vector.broadcast %554 : f32 to vector<8x16xf32>
    %556 = arith.mulf %555, %553 : vector<8x16xf32>
    %557 = arith.addf %551, %556 : vector<8x16xf32>
    %c2_298 = arith.constant 2 : index
    %c1_299 = arith.constant 1 : index
    %c2_300 = arith.constant 2 : index
    %558 = vector.load %arg5[%c2_298, %c1_299, %c2_300] : memref<4x10x18xf32, #tpu.memory_space<vmem>>, vector<1x8x16xf32>
    %559 = vector.shape_cast %558 : vector<1x8x16xf32> to vector<8x16xf32>
    %c86 = arith.constant 86 : index
    %560 = memref.load %arg3[%c86] : memref<144xf32, #tpu.memory_space<smem>>
    %561 = vector.broadcast %560 : f32 to vector<8x16xf32>
    %562 = arith.mulf %561, %559 : vector<8x16xf32>
    %563 = arith.addf %557, %562 : vector<8x16xf32>
    %c2_301 = arith.constant 2 : index
    %c2_302 = arith.constant 2 : index
    %c0_303 = arith.constant 0 : index
    %564 = vector.load %arg5[%c2_301, %c2_302, %c0_303] : memref<4x10x18xf32, #tpu.memory_space<vmem>>, vector<1x8x16xf32>
    %565 = vector.shape_cast %564 : vector<1x8x16xf32> to vector<8x16xf32>
    %c87 = arith.constant 87 : index
    %566 = memref.load %arg3[%c87] : memref<144xf32, #tpu.memory_space<smem>>
    %567 = vector.broadcast %566 : f32 to vector<8x16xf32>
    %568 = arith.mulf %567, %565 : vector<8x16xf32>
    %569 = arith.addf %563, %568 : vector<8x16xf32>
    %c2_304 = arith.constant 2 : index
    %c2_305 = arith.constant 2 : index
    %c1_306 = arith.constant 1 : index
    %570 = vector.load %arg5[%c2_304, %c2_305, %c1_306] : memref<4x10x18xf32, #tpu.memory_space<vmem>>, vector<1x8x16xf32>
    %571 = vector.shape_cast %570 : vector<1x8x16xf32> to vector<8x16xf32>
    %c88 = arith.constant 88 : index
    %572 = memref.load %arg3[%c88] : memref<144xf32, #tpu.memory_space<smem>>
    %573 = vector.broadcast %572 : f32 to vector<8x16xf32>
    %574 = arith.mulf %573, %571 : vector<8x16xf32>
    %575 = arith.addf %569, %574 : vector<8x16xf32>
    %c2_307 = arith.constant 2 : index
    %c2_308 = arith.constant 2 : index
    %c2_309 = arith.constant 2 : index
    %576 = vector.load %arg5[%c2_307, %c2_308, %c2_309] : memref<4x10x18xf32, #tpu.memory_space<vmem>>, vector<1x8x16xf32>
    %577 = vector.shape_cast %576 : vector<1x8x16xf32> to vector<8x16xf32>
    %c89 = arith.constant 89 : index
    %578 = memref.load %arg3[%c89] : memref<144xf32, #tpu.memory_space<smem>>
    %579 = vector.broadcast %578 : f32 to vector<8x16xf32>
    %580 = arith.mulf %579, %577 : vector<8x16xf32>
    %581 = arith.addf %575, %580 : vector<8x16xf32>
    %582 = arith.maximumf %528, %581 : vector<8x16xf32>
    %c0_310 = arith.constant 0 : index
    %c0_311 = arith.constant 0 : index
    %c0_312 = arith.constant 0 : index
    %583 = vector.load %arg5[%c0_310, %c0_311, %c0_312] : memref<4x10x18xf32, #tpu.memory_space<vmem>>, vector<1x8x16xf32>
    %584 = vector.shape_cast %583 : vector<1x8x16xf32> to vector<8x16xf32>
    %c90 = arith.constant 90 : index
    %585 = memref.load %arg3[%c90] : memref<144xf32, #tpu.memory_space<smem>>
    %586 = vector.broadcast %585 : f32 to vector<8x16xf32>
    %587 = arith.mulf %586, %584 : vector<8x16xf32>
    %c0_313 = arith.constant 0 : index
    %c0_314 = arith.constant 0 : index
    %c1_315 = arith.constant 1 : index
    %588 = vector.load %arg5[%c0_313, %c0_314, %c1_315] : memref<4x10x18xf32, #tpu.memory_space<vmem>>, vector<1x8x16xf32>
    %589 = vector.shape_cast %588 : vector<1x8x16xf32> to vector<8x16xf32>
    %c91 = arith.constant 91 : index
    %590 = memref.load %arg3[%c91] : memref<144xf32, #tpu.memory_space<smem>>
    %591 = vector.broadcast %590 : f32 to vector<8x16xf32>
    %592 = arith.mulf %591, %589 : vector<8x16xf32>
    %593 = arith.addf %587, %592 : vector<8x16xf32>
    %c0_316 = arith.constant 0 : index
    %c0_317 = arith.constant 0 : index
    %c2_318 = arith.constant 2 : index
    %594 = vector.load %arg5[%c0_316, %c0_317, %c2_318] : memref<4x10x18xf32, #tpu.memory_space<vmem>>, vector<1x8x16xf32>
    %595 = vector.shape_cast %594 : vector<1x8x16xf32> to vector<8x16xf32>
    %c92 = arith.constant 92 : index
    %596 = memref.load %arg3[%c92] : memref<144xf32, #tpu.memory_space<smem>>
    %597 = vector.broadcast %596 : f32 to vector<8x16xf32>
    %598 = arith.mulf %597, %595 : vector<8x16xf32>
    %599 = arith.addf %593, %598 : vector<8x16xf32>
    %c0_319 = arith.constant 0 : index
    %c1_320 = arith.constant 1 : index
    %c0_321 = arith.constant 0 : index
    %600 = vector.load %arg5[%c0_319, %c1_320, %c0_321] : memref<4x10x18xf32, #tpu.memory_space<vmem>>, vector<1x8x16xf32>
    %601 = vector.shape_cast %600 : vector<1x8x16xf32> to vector<8x16xf32>
    %c93 = arith.constant 93 : index
    %602 = memref.load %arg3[%c93] : memref<144xf32, #tpu.memory_space<smem>>
    %603 = vector.broadcast %602 : f32 to vector<8x16xf32>
    %604 = arith.mulf %603, %601 : vector<8x16xf32>
    %605 = arith.addf %599, %604 : vector<8x16xf32>
    %c0_322 = arith.constant 0 : index
    %c1_323 = arith.constant 1 : index
    %c1_324 = arith.constant 1 : index
    %606 = vector.load %arg5[%c0_322, %c1_323, %c1_324] : memref<4x10x18xf32, #tpu.memory_space<vmem>>, vector<1x8x16xf32>
    %607 = vector.shape_cast %606 : vector<1x8x16xf32> to vector<8x16xf32>
    %c94 = arith.constant 94 : index
    %608 = memref.load %arg3[%c94] : memref<144xf32, #tpu.memory_space<smem>>
    %609 = vector.broadcast %608 : f32 to vector<8x16xf32>
    %610 = arith.mulf %609, %607 : vector<8x16xf32>
    %611 = arith.addf %605, %610 : vector<8x16xf32>
    %c0_325 = arith.constant 0 : index
    %c1_326 = arith.constant 1 : index
    %c2_327 = arith.constant 2 : index
    %612 = vector.load %arg5[%c0_325, %c1_326, %c2_327] : memref<4x10x18xf32, #tpu.memory_space<vmem>>, vector<1x8x16xf32>
    %613 = vector.shape_cast %612 : vector<1x8x16xf32> to vector<8x16xf32>
    %c95 = arith.constant 95 : index
    %614 = memref.load %arg3[%c95] : memref<144xf32, #tpu.memory_space<smem>>
    %615 = vector.broadcast %614 : f32 to vector<8x16xf32>
    %616 = arith.mulf %615, %613 : vector<8x16xf32>
    %617 = arith.addf %611, %616 : vector<8x16xf32>
    %c0_328 = arith.constant 0 : index
    %c2_329 = arith.constant 2 : index
    %c0_330 = arith.constant 0 : index
    %618 = vector.load %arg5[%c0_328, %c2_329, %c0_330] : memref<4x10x18xf32, #tpu.memory_space<vmem>>, vector<1x8x16xf32>
    %619 = vector.shape_cast %618 : vector<1x8x16xf32> to vector<8x16xf32>
    %c96 = arith.constant 96 : index
    %620 = memref.load %arg3[%c96] : memref<144xf32, #tpu.memory_space<smem>>
    %621 = vector.broadcast %620 : f32 to vector<8x16xf32>
    %622 = arith.mulf %621, %619 : vector<8x16xf32>
    %623 = arith.addf %617, %622 : vector<8x16xf32>
    %c0_331 = arith.constant 0 : index
    %c2_332 = arith.constant 2 : index
    %c1_333 = arith.constant 1 : index
    %624 = vector.load %arg5[%c0_331, %c2_332, %c1_333] : memref<4x10x18xf32, #tpu.memory_space<vmem>>, vector<1x8x16xf32>
    %625 = vector.shape_cast %624 : vector<1x8x16xf32> to vector<8x16xf32>
    %c97 = arith.constant 97 : index
    %626 = memref.load %arg3[%c97] : memref<144xf32, #tpu.memory_space<smem>>
    %627 = vector.broadcast %626 : f32 to vector<8x16xf32>
    %628 = arith.mulf %627, %625 : vector<8x16xf32>
    %629 = arith.addf %623, %628 : vector<8x16xf32>
    %c0_334 = arith.constant 0 : index
    %c2_335 = arith.constant 2 : index
    %c2_336 = arith.constant 2 : index
    %630 = vector.load %arg5[%c0_334, %c2_335, %c2_336] : memref<4x10x18xf32, #tpu.memory_space<vmem>>, vector<1x8x16xf32>
    %631 = vector.shape_cast %630 : vector<1x8x16xf32> to vector<8x16xf32>
    %c98 = arith.constant 98 : index
    %632 = memref.load %arg3[%c98] : memref<144xf32, #tpu.memory_space<smem>>
    %633 = vector.broadcast %632 : f32 to vector<8x16xf32>
    %634 = arith.mulf %633, %631 : vector<8x16xf32>
    %635 = arith.addf %629, %634 : vector<8x16xf32>
    %c0_337 = arith.constant 0 : index
    %c0_338 = arith.constant 0 : index
    %c0_339 = arith.constant 0 : index
    %636 = vector.load %arg5[%c0_337, %c0_338, %c0_339] : memref<4x10x18xf32, #tpu.memory_space<vmem>>, vector<1x8x16xf32>
    %637 = vector.shape_cast %636 : vector<1x8x16xf32> to vector<8x16xf32>
    %c99 = arith.constant 99 : index
    %638 = memref.load %arg3[%c99] : memref<144xf32, #tpu.memory_space<smem>>
    %639 = vector.broadcast %638 : f32 to vector<8x16xf32>
    %640 = arith.mulf %639, %637 : vector<8x16xf32>
    %c0_340 = arith.constant 0 : index
    %c0_341 = arith.constant 0 : index
    %c1_342 = arith.constant 1 : index
    %641 = vector.load %arg5[%c0_340, %c0_341, %c1_342] : memref<4x10x18xf32, #tpu.memory_space<vmem>>, vector<1x8x16xf32>
    %642 = vector.shape_cast %641 : vector<1x8x16xf32> to vector<8x16xf32>
    %c100 = arith.constant 100 : index
    %643 = memref.load %arg3[%c100] : memref<144xf32, #tpu.memory_space<smem>>
    %644 = vector.broadcast %643 : f32 to vector<8x16xf32>
    %645 = arith.mulf %644, %642 : vector<8x16xf32>
    %646 = arith.addf %640, %645 : vector<8x16xf32>
    %c0_343 = arith.constant 0 : index
    %c0_344 = arith.constant 0 : index
    %c2_345 = arith.constant 2 : index
    %647 = vector.load %arg5[%c0_343, %c0_344, %c2_345] : memref<4x10x18xf32, #tpu.memory_space<vmem>>, vector<1x8x16xf32>
    %648 = vector.shape_cast %647 : vector<1x8x16xf32> to vector<8x16xf32>
    %c101 = arith.constant 101 : index
    %649 = memref.load %arg3[%c101] : memref<144xf32, #tpu.memory_space<smem>>
    %650 = vector.broadcast %649 : f32 to vector<8x16xf32>
    %651 = arith.mulf %650, %648 : vector<8x16xf32>
    %652 = arith.addf %646, %651 : vector<8x16xf32>
    %c0_346 = arith.constant 0 : index
    %c1_347 = arith.constant 1 : index
    %c0_348 = arith.constant 0 : index
    %653 = vector.load %arg5[%c0_346, %c1_347, %c0_348] : memref<4x10x18xf32, #tpu.memory_space<vmem>>, vector<1x8x16xf32>
    %654 = vector.shape_cast %653 : vector<1x8x16xf32> to vector<8x16xf32>
    %c102 = arith.constant 102 : index
    %655 = memref.load %arg3[%c102] : memref<144xf32, #tpu.memory_space<smem>>
    %656 = vector.broadcast %655 : f32 to vector<8x16xf32>
    %657 = arith.mulf %656, %654 : vector<8x16xf32>
    %658 = arith.addf %652, %657 : vector<8x16xf32>
    %c0_349 = arith.constant 0 : index
    %c1_350 = arith.constant 1 : index
    %c1_351 = arith.constant 1 : index
    %659 = vector.load %arg5[%c0_349, %c1_350, %c1_351] : memref<4x10x18xf32, #tpu.memory_space<vmem>>, vector<1x8x16xf32>
    %660 = vector.shape_cast %659 : vector<1x8x16xf32> to vector<8x16xf32>
    %c103 = arith.constant 103 : index
    %661 = memref.load %arg3[%c103] : memref<144xf32, #tpu.memory_space<smem>>
    %662 = vector.broadcast %661 : f32 to vector<8x16xf32>
    %663 = arith.mulf %662, %660 : vector<8x16xf32>
    %664 = arith.addf %658, %663 : vector<8x16xf32>
    %c0_352 = arith.constant 0 : index
    %c1_353 = arith.constant 1 : index
    %c2_354 = arith.constant 2 : index
    %665 = vector.load %arg5[%c0_352, %c1_353, %c2_354] : memref<4x10x18xf32, #tpu.memory_space<vmem>>, vector<1x8x16xf32>
    %666 = vector.shape_cast %665 : vector<1x8x16xf32> to vector<8x16xf32>
    %c104 = arith.constant 104 : index
    %667 = memref.load %arg3[%c104] : memref<144xf32, #tpu.memory_space<smem>>
    %668 = vector.broadcast %667 : f32 to vector<8x16xf32>
    %669 = arith.mulf %668, %666 : vector<8x16xf32>
    %670 = arith.addf %664, %669 : vector<8x16xf32>
    %c0_355 = arith.constant 0 : index
    %c2_356 = arith.constant 2 : index
    %c0_357 = arith.constant 0 : index
    %671 = vector.load %arg5[%c0_355, %c2_356, %c0_357] : memref<4x10x18xf32, #tpu.memory_space<vmem>>, vector<1x8x16xf32>
    %672 = vector.shape_cast %671 : vector<1x8x16xf32> to vector<8x16xf32>
    %c105 = arith.constant 105 : index
    %673 = memref.load %arg3[%c105] : memref<144xf32, #tpu.memory_space<smem>>
    %674 = vector.broadcast %673 : f32 to vector<8x16xf32>
    %675 = arith.mulf %674, %672 : vector<8x16xf32>
    %676 = arith.addf %670, %675 : vector<8x16xf32>
    %c0_358 = arith.constant 0 : index
    %c2_359 = arith.constant 2 : index
    %c1_360 = arith.constant 1 : index
    %677 = vector.load %arg5[%c0_358, %c2_359, %c1_360] : memref<4x10x18xf32, #tpu.memory_space<vmem>>, vector<1x8x16xf32>
    %678 = vector.shape_cast %677 : vector<1x8x16xf32> to vector<8x16xf32>
    %c106 = arith.constant 106 : index
    %679 = memref.load %arg3[%c106] : memref<144xf32, #tpu.memory_space<smem>>
    %680 = vector.broadcast %679 : f32 to vector<8x16xf32>
    %681 = arith.mulf %680, %678 : vector<8x16xf32>
    %682 = arith.addf %676, %681 : vector<8x16xf32>
    %c0_361 = arith.constant 0 : index
    %c2_362 = arith.constant 2 : index
    %c2_363 = arith.constant 2 : index
    %683 = vector.load %arg5[%c0_361, %c2_362, %c2_363] : memref<4x10x18xf32, #tpu.memory_space<vmem>>, vector<1x8x16xf32>
    %684 = vector.shape_cast %683 : vector<1x8x16xf32> to vector<8x16xf32>
    %c107 = arith.constant 107 : index
    %685 = memref.load %arg3[%c107] : memref<144xf32, #tpu.memory_space<smem>>
    %686 = vector.broadcast %685 : f32 to vector<8x16xf32>
    %687 = arith.mulf %686, %684 : vector<8x16xf32>
    %688 = arith.addf %682, %687 : vector<8x16xf32>
    %689 = arith.maximumf %635, %688 : vector<8x16xf32>
    %690 = arith.addf %582, %689 : vector<8x16xf32>
    %c0_364 = arith.constant 0 : index
    %c2_365 = arith.constant 2 : index
    %c0_366 = arith.constant 0 : index
    %c0_367 = arith.constant 0 : index
    %691 = vector.load %arg4[%c0_364, %c2_365, %c0_366, %c0_367] : memref<1x4x8x16xf32, #tpu.memory_space<vmem>>, vector<1x1x8x16xf32>
    %692 = vector.shape_cast %691 : vector<1x1x8x16xf32> to vector<8x16xf32>
    %693 = vector.shape_cast %690 : vector<8x16xf32> to vector<1x1x8x16xf32>
    tpu.vector_store %arg4[%c0_364, %c2_365, %c0_366, %c0_367], %693 {strides = array<i32>} : memref<1x4x8x16xf32, #tpu.memory_space<vmem>>, vector<1x1x8x16xf32>,
    %c3_368 = arith.constant 3 : index
    %c0_369 = arith.constant 0 : index
    %c0_370 = arith.constant 0 : index
    %694 = vector.load %arg5[%c3_368, %c0_369, %c0_370] : memref<4x10x18xf32, #tpu.memory_space<vmem>>, vector<1x8x16xf32>
    %695 = vector.shape_cast %694 : vector<1x8x16xf32> to vector<8x16xf32>
    %c108 = arith.constant 108 : index
    %696 = memref.load %arg3[%c108] : memref<144xf32, #tpu.memory_space<smem>>
    %697 = vector.broadcast %696 : f32 to vector<8x16xf32>
    %698 = arith.mulf %697, %695 : vector<8x16xf32>
    %c3_371 = arith.constant 3 : index
    %c0_372 = arith.constant 0 : index
    %c1_373 = arith.constant 1 : index
    %699 = vector.load %arg5[%c3_371, %c0_372, %c1_373] : memref<4x10x18xf32, #tpu.memory_space<vmem>>, vector<1x8x16xf32>
    %700 = vector.shape_cast %699 : vector<1x8x16xf32> to vector<8x16xf32>
    %c109 = arith.constant 109 : index
    %701 = memref.load %arg3[%c109] : memref<144xf32, #tpu.memory_space<smem>>
    %702 = vector.broadcast %701 : f32 to vector<8x16xf32>
    %703 = arith.mulf %702, %700 : vector<8x16xf32>
    %704 = arith.addf %698, %703 : vector<8x16xf32>
    %c3_374 = arith.constant 3 : index
    %c0_375 = arith.constant 0 : index
    %c2_376 = arith.constant 2 : index
    %705 = vector.load %arg5[%c3_374, %c0_375, %c2_376] : memref<4x10x18xf32, #tpu.memory_space<vmem>>, vector<1x8x16xf32>
    %706 = vector.shape_cast %705 : vector<1x8x16xf32> to vector<8x16xf32>
    %c110 = arith.constant 110 : index
    %707 = memref.load %arg3[%c110] : memref<144xf32, #tpu.memory_space<smem>>
    %708 = vector.broadcast %707 : f32 to vector<8x16xf32>
    %709 = arith.mulf %708, %706 : vector<8x16xf32>
    %710 = arith.addf %704, %709 : vector<8x16xf32>
    %c3_377 = arith.constant 3 : index
    %c1_378 = arith.constant 1 : index
    %c0_379 = arith.constant 0 : index
    %711 = vector.load %arg5[%c3_377, %c1_378, %c0_379] : memref<4x10x18xf32, #tpu.memory_space<vmem>>, vector<1x8x16xf32>
    %712 = vector.shape_cast %711 : vector<1x8x16xf32> to vector<8x16xf32>
    %c111 = arith.constant 111 : index
    %713 = memref.load %arg3[%c111] : memref<144xf32, #tpu.memory_space<smem>>
    %714 = vector.broadcast %713 : f32 to vector<8x16xf32>
    %715 = arith.mulf %714, %712 : vector<8x16xf32>
    %716 = arith.addf %710, %715 : vector<8x16xf32>
    %c3_380 = arith.constant 3 : index
    %c1_381 = arith.constant 1 : index
    %c1_382 = arith.constant 1 : index
    %717 = vector.load %arg5[%c3_380, %c1_381, %c1_382] : memref<4x10x18xf32, #tpu.memory_space<vmem>>, vector<1x8x16xf32>
    %718 = vector.shape_cast %717 : vector<1x8x16xf32> to vector<8x16xf32>
    %c112 = arith.constant 112 : index
    %719 = memref.load %arg3[%c112] : memref<144xf32, #tpu.memory_space<smem>>
    %720 = vector.broadcast %719 : f32 to vector<8x16xf32>
    %721 = arith.mulf %720, %718 : vector<8x16xf32>
    %722 = arith.addf %716, %721 : vector<8x16xf32>
    %c3_383 = arith.constant 3 : index
    %c1_384 = arith.constant 1 : index
    %c2_385 = arith.constant 2 : index
    %723 = vector.load %arg5[%c3_383, %c1_384, %c2_385] : memref<4x10x18xf32, #tpu.memory_space<vmem>>, vector<1x8x16xf32>
    %724 = vector.shape_cast %723 : vector<1x8x16xf32> to vector<8x16xf32>
    %c113 = arith.constant 113 : index
    %725 = memref.load %arg3[%c113] : memref<144xf32, #tpu.memory_space<smem>>
    %726 = vector.broadcast %725 : f32 to vector<8x16xf32>
    %727 = arith.mulf %726, %724 : vector<8x16xf32>
    %728 = arith.addf %722, %727 : vector<8x16xf32>
    %c3_386 = arith.constant 3 : index
    %c2_387 = arith.constant 2 : index
    %c0_388 = arith.constant 0 : index
    %729 = vector.load %arg5[%c3_386, %c2_387, %c0_388] : memref<4x10x18xf32, #tpu.memory_space<vmem>>, vector<1x8x16xf32>
    %730 = vector.shape_cast %729 : vector<1x8x16xf32> to vector<8x16xf32>
    %c114 = arith.constant 114 : index
    %731 = memref.load %arg3[%c114] : memref<144xf32, #tpu.memory_space<smem>>
    %732 = vector.broadcast %731 : f32 to vector<8x16xf32>
    %733 = arith.mulf %732, %730 : vector<8x16xf32>
    %734 = arith.addf %728, %733 : vector<8x16xf32>
    %c3_389 = arith.constant 3 : index
    %c2_390 = arith.constant 2 : index
    %c1_391 = arith.constant 1 : index
    %735 = vector.load %arg5[%c3_389, %c2_390, %c1_391] : memref<4x10x18xf32, #tpu.memory_space<vmem>>, vector<1x8x16xf32>
    %736 = vector.shape_cast %735 : vector<1x8x16xf32> to vector<8x16xf32>
    %c115 = arith.constant 115 : index
    %737 = memref.load %arg3[%c115] : memref<144xf32, #tpu.memory_space<smem>>
    %738 = vector.broadcast %737 : f32 to vector<8x16xf32>
    %739 = arith.mulf %738, %736 : vector<8x16xf32>
    %740 = arith.addf %734, %739 : vector<8x16xf32>
    %c3_392 = arith.constant 3 : index
    %c2_393 = arith.constant 2 : index
    %c2_394 = arith.constant 2 : index
    %741 = vector.load %arg5[%c3_392, %c2_393, %c2_394] : memref<4x10x18xf32, #tpu.memory_space<vmem>>, vector<1x8x16xf32>
    %742 = vector.shape_cast %741 : vector<1x8x16xf32> to vector<8x16xf32>
    %c116 = arith.constant 116 : index
    %743 = memref.load %arg3[%c116] : memref<144xf32, #tpu.memory_space<smem>>
    %744 = vector.broadcast %743 : f32 to vector<8x16xf32>
    %745 = arith.mulf %744, %742 : vector<8x16xf32>
    %746 = arith.addf %740, %745 : vector<8x16xf32>
    %c1_395 = arith.constant 1 : index
    %c0_396 = arith.constant 0 : index
    %c0_397 = arith.constant 0 : index
    %747 = vector.load %arg5[%c1_395, %c0_396, %c0_397] : memref<4x10x18xf32, #tpu.memory_space<vmem>>, vector<1x8x16xf32>
    %748 = vector.shape_cast %747 : vector<1x8x16xf32> to vector<8x16xf32>
    %c117 = arith.constant 117 : index
    %749 = memref.load %arg3[%c117] : memref<144xf32, #tpu.memory_space<smem>>
    %750 = vector.broadcast %749 : f32 to vector<8x16xf32>
    %751 = arith.mulf %750, %748 : vector<8x16xf32>
    %c1_398 = arith.constant 1 : index
    %c0_399 = arith.constant 0 : index
    %c1_400 = arith.constant 1 : index
    %752 = vector.load %arg5[%c1_398, %c0_399, %c1_400] : memref<4x10x18xf32, #tpu.memory_space<vmem>>, vector<1x8x16xf32>
    %753 = vector.shape_cast %752 : vector<1x8x16xf32> to vector<8x16xf32>
    %c118 = arith.constant 118 : index
    %754 = memref.load %arg3[%c118] : memref<144xf32, #tpu.memory_space<smem>>
    %755 = vector.broadcast %754 : f32 to vector<8x16xf32>
    %756 = arith.mulf %755, %753 : vector<8x16xf32>
    %757 = arith.addf %751, %756 : vector<8x16xf32>
    %c1_401 = arith.constant 1 : index
    %c0_402 = arith.constant 0 : index
    %c2_403 = arith.constant 2 : index
    %758 = vector.load %arg5[%c1_401, %c0_402, %c2_403] : memref<4x10x18xf32, #tpu.memory_space<vmem>>, vector<1x8x16xf32>
    %759 = vector.shape_cast %758 : vector<1x8x16xf32> to vector<8x16xf32>
    %c119 = arith.constant 119 : index
    %760 = memref.load %arg3[%c119] : memref<144xf32, #tpu.memory_space<smem>>
    %761 = vector.broadcast %760 : f32 to vector<8x16xf32>
    %762 = arith.mulf %761, %759 : vector<8x16xf32>
    %763 = arith.addf %757, %762 : vector<8x16xf32>
    %c1_404 = arith.constant 1 : index
    %c1_405 = arith.constant 1 : index
    %c0_406 = arith.constant 0 : index
    %764 = vector.load %arg5[%c1_404, %c1_405, %c0_406] : memref<4x10x18xf32, #tpu.memory_space<vmem>>, vector<1x8x16xf32>
    %765 = vector.shape_cast %764 : vector<1x8x16xf32> to vector<8x16xf32>
    %c120 = arith.constant 120 : index
    %766 = memref.load %arg3[%c120] : memref<144xf32, #tpu.memory_space<smem>>
    %767 = vector.broadcast %766 : f32 to vector<8x16xf32>
    %768 = arith.mulf %767, %765 : vector<8x16xf32>
    %769 = arith.addf %763, %768 : vector<8x16xf32>
    %c1_407 = arith.constant 1 : index
    %c1_408 = arith.constant 1 : index
    %c1_409 = arith.constant 1 : index
    %770 = vector.load %arg5[%c1_407, %c1_408, %c1_409] : memref<4x10x18xf32, #tpu.memory_space<vmem>>, vector<1x8x16xf32>
    %771 = vector.shape_cast %770 : vector<1x8x16xf32> to vector<8x16xf32>
    %c121 = arith.constant 121 : index
    %772 = memref.load %arg3[%c121] : memref<144xf32, #tpu.memory_space<smem>>
    %773 = vector.broadcast %772 : f32 to vector<8x16xf32>
    %774 = arith.mulf %773, %771 : vector<8x16xf32>
    %775 = arith.addf %769, %774 : vector<8x16xf32>
    %c1_410 = arith.constant 1 : index
    %c1_411 = arith.constant 1 : index
    %c2_412 = arith.constant 2 : index
    %776 = vector.load %arg5[%c1_410, %c1_411, %c2_412] : memref<4x10x18xf32, #tpu.memory_space<vmem>>, vector<1x8x16xf32>
    %777 = vector.shape_cast %776 : vector<1x8x16xf32> to vector<8x16xf32>
    %c122 = arith.constant 122 : index
    %778 = memref.load %arg3[%c122] : memref<144xf32, #tpu.memory_space<smem>>
    %779 = vector.broadcast %778 : f32 to vector<8x16xf32>
    %780 = arith.mulf %779, %777 : vector<8x16xf32>
    %781 = arith.addf %775, %780 : vector<8x16xf32>
    %c1_413 = arith.constant 1 : index
    %c2_414 = arith.constant 2 : index
    %c0_415 = arith.constant 0 : index
    %782 = vector.load %arg5[%c1_413, %c2_414, %c0_415] : memref<4x10x18xf32, #tpu.memory_space<vmem>>, vector<1x8x16xf32>
    %783 = vector.shape_cast %782 : vector<1x8x16xf32> to vector<8x16xf32>
    %c123 = arith.constant 123 : index
    %784 = memref.load %arg3[%c123] : memref<144xf32, #tpu.memory_space<smem>>
    %785 = vector.broadcast %784 : f32 to vector<8x16xf32>
    %786 = arith.mulf %785, %783 : vector<8x16xf32>
    %787 = arith.addf %781, %786 : vector<8x16xf32>
    %c1_416 = arith.constant 1 : index
    %c2_417 = arith.constant 2 : index
    %c1_418 = arith.constant 1 : index
    %788 = vector.load %arg5[%c1_416, %c2_417, %c1_418] : memref<4x10x18xf32, #tpu.memory_space<vmem>>, vector<1x8x16xf32>
    %789 = vector.shape_cast %788 : vector<1x8x16xf32> to vector<8x16xf32>
    %c124 = arith.constant 124 : index
    %790 = memref.load %arg3[%c124] : memref<144xf32, #tpu.memory_space<smem>>
    %791 = vector.broadcast %790 : f32 to vector<8x16xf32>
    %792 = arith.mulf %791, %789 : vector<8x16xf32>
    %793 = arith.addf %787, %792 : vector<8x16xf32>
    %c1_419 = arith.constant 1 : index
    %c2_420 = arith.constant 2 : index
    %c2_421 = arith.constant 2 : index
    %794 = vector.load %arg5[%c1_419, %c2_420, %c2_421] : memref<4x10x18xf32, #tpu.memory_space<vmem>>, vector<1x8x16xf32>
    %795 = vector.shape_cast %794 : vector<1x8x16xf32> to vector<8x16xf32>
    %c125 = arith.constant 125 : index
    %796 = memref.load %arg3[%c125] : memref<144xf32, #tpu.memory_space<smem>>
    %797 = vector.broadcast %796 : f32 to vector<8x16xf32>
    %798 = arith.mulf %797, %795 : vector<8x16xf32>
    %799 = arith.addf %793, %798 : vector<8x16xf32>
    %800 = arith.maximumf %746, %799 : vector<8x16xf32>
    %c2_422 = arith.constant 2 : index
    %c0_423 = arith.constant 0 : index
    %c0_424 = arith.constant 0 : index
    %801 = vector.load %arg5[%c2_422, %c0_423, %c0_424] : memref<4x10x18xf32, #tpu.memory_space<vmem>>, vector<1x8x16xf32>
    %802 = vector.shape_cast %801 : vector<1x8x16xf32> to vector<8x16xf32>
    %c126 = arith.constant 126 : index
    %803 = memref.load %arg3[%c126] : memref<144xf32, #tpu.memory_space<smem>>
    %804 = vector.broadcast %803 : f32 to vector<8x16xf32>
    %805 = arith.mulf %804, %802 : vector<8x16xf32>
    %c2_425 = arith.constant 2 : index
    %c0_426 = arith.constant 0 : index
    %c1_427 = arith.constant 1 : index
    %806 = vector.load %arg5[%c2_425, %c0_426, %c1_427] : memref<4x10x18xf32, #tpu.memory_space<vmem>>, vector<1x8x16xf32>
    %807 = vector.shape_cast %806 : vector<1x8x16xf32> to vector<8x16xf32>
    %c127 = arith.constant 127 : index
    %808 = memref.load %arg3[%c127] : memref<144xf32, #tpu.memory_space<smem>>
    %809 = vector.broadcast %808 : f32 to vector<8x16xf32>
    %810 = arith.mulf %809, %807 : vector<8x16xf32>
    %811 = arith.addf %805, %810 : vector<8x16xf32>
    %c2_428 = arith.constant 2 : index
    %c0_429 = arith.constant 0 : index
    %c2_430 = arith.constant 2 : index
    %812 = vector.load %arg5[%c2_428, %c0_429, %c2_430] : memref<4x10x18xf32, #tpu.memory_space<vmem>>, vector<1x8x16xf32>
    %813 = vector.shape_cast %812 : vector<1x8x16xf32> to vector<8x16xf32>
    %c128 = arith.constant 128 : index
    %814 = memref.load %arg3[%c128] : memref<144xf32, #tpu.memory_space<smem>>
    %815 = vector.broadcast %814 : f32 to vector<8x16xf32>
    %816 = arith.mulf %815, %813 : vector<8x16xf32>
    %817 = arith.addf %811, %816 : vector<8x16xf32>
    %c2_431 = arith.constant 2 : index
    %c1_432 = arith.constant 1 : index
    %c0_433 = arith.constant 0 : index
    %818 = vector.load %arg5[%c2_431, %c1_432, %c0_433] : memref<4x10x18xf32, #tpu.memory_space<vmem>>, vector<1x8x16xf32>
    %819 = vector.shape_cast %818 : vector<1x8x16xf32> to vector<8x16xf32>
    %c129 = arith.constant 129 : index
    %820 = memref.load %arg3[%c129] : memref<144xf32, #tpu.memory_space<smem>>
    %821 = vector.broadcast %820 : f32 to vector<8x16xf32>
    %822 = arith.mulf %821, %819 : vector<8x16xf32>
    %823 = arith.addf %817, %822 : vector<8x16xf32>
    %c2_434 = arith.constant 2 : index
    %c1_435 = arith.constant 1 : index
    %c1_436 = arith.constant 1 : index
    %824 = vector.load %arg5[%c2_434, %c1_435, %c1_436] : memref<4x10x18xf32, #tpu.memory_space<vmem>>, vector<1x8x16xf32>
    %825 = vector.shape_cast %824 : vector<1x8x16xf32> to vector<8x16xf32>
    %c130 = arith.constant 130 : index
    %826 = memref.load %arg3[%c130] : memref<144xf32, #tpu.memory_space<smem>>
    %827 = vector.broadcast %826 : f32 to vector<8x16xf32>
    %828 = arith.mulf %827, %825 : vector<8x16xf32>
    %829 = arith.addf %823, %828 : vector<8x16xf32>
    %c2_437 = arith.constant 2 : index
    %c1_438 = arith.constant 1 : index
    %c2_439 = arith.constant 2 : index
    %830 = vector.load %arg5[%c2_437, %c1_438, %c2_439] : memref<4x10x18xf32, #tpu.memory_space<vmem>>, vector<1x8x16xf32>
    %831 = vector.shape_cast %830 : vector<1x8x16xf32> to vector<8x16xf32>
    %c131 = arith.constant 131 : index
    %832 = memref.load %arg3[%c131] : memref<144xf32, #tpu.memory_space<smem>>
    %833 = vector.broadcast %832 : f32 to vector<8x16xf32>
    %834 = arith.mulf %833, %831 : vector<8x16xf32>
    %835 = arith.addf %829, %834 : vector<8x16xf32>
    %c2_440 = arith.constant 2 : index
    %c2_441 = arith.constant 2 : index
    %c0_442 = arith.constant 0 : index
    %836 = vector.load %arg5[%c2_440, %c2_441, %c0_442] : memref<4x10x18xf32, #tpu.memory_space<vmem>>, vector<1x8x16xf32>
    %837 = vector.shape_cast %836 : vector<1x8x16xf32> to vector<8x16xf32>
    %c132 = arith.constant 132 : index
    %838 = memref.load %arg3[%c132] : memref<144xf32, #tpu.memory_space<smem>>
    %839 = vector.broadcast %838 : f32 to vector<8x16xf32>
    %840 = arith.mulf %839, %837 : vector<8x16xf32>
    %841 = arith.addf %835, %840 : vector<8x16xf32>
    %c2_443 = arith.constant 2 : index
    %c2_444 = arith.constant 2 : index
    %c1_445 = arith.constant 1 : index
    %842 = vector.load %arg5[%c2_443, %c2_444, %c1_445] : memref<4x10x18xf32, #tpu.memory_space<vmem>>, vector<1x8x16xf32>
    %843 = vector.shape_cast %842 : vector<1x8x16xf32> to vector<8x16xf32>
    %c133 = arith.constant 133 : index
    %844 = memref.load %arg3[%c133] : memref<144xf32, #tpu.memory_space<smem>>
    %845 = vector.broadcast %844 : f32 to vector<8x16xf32>
    %846 = arith.mulf %845, %843 : vector<8x16xf32>
    %847 = arith.addf %841, %846 : vector<8x16xf32>
    %c2_446 = arith.constant 2 : index
    %c2_447 = arith.constant 2 : index
    %c2_448 = arith.constant 2 : index
    %848 = vector.load %arg5[%c2_446, %c2_447, %c2_448] : memref<4x10x18xf32, #tpu.memory_space<vmem>>, vector<1x8x16xf32>
    %849 = vector.shape_cast %848 : vector<1x8x16xf32> to vector<8x16xf32>
    %c134 = arith.constant 134 : index
    %850 = memref.load %arg3[%c134] : memref<144xf32, #tpu.memory_space<smem>>
    %851 = vector.broadcast %850 : f32 to vector<8x16xf32>
    %852 = arith.mulf %851, %849 : vector<8x16xf32>
    %853 = arith.addf %847, %852 : vector<8x16xf32>
    %c2_449 = arith.constant 2 : index
    %c0_450 = arith.constant 0 : index
    %c0_451 = arith.constant 0 : index
    %854 = vector.load %arg5[%c2_449, %c0_450, %c0_451] : memref<4x10x18xf32, #tpu.memory_space<vmem>>, vector<1x8x16xf32>
    %855 = vector.shape_cast %854 : vector<1x8x16xf32> to vector<8x16xf32>
    %c135 = arith.constant 135 : index
    %856 = memref.load %arg3[%c135] : memref<144xf32, #tpu.memory_space<smem>>
    %857 = vector.broadcast %856 : f32 to vector<8x16xf32>
    %858 = arith.mulf %857, %855 : vector<8x16xf32>
    %c2_452 = arith.constant 2 : index
    %c0_453 = arith.constant 0 : index
    %c1_454 = arith.constant 1 : index
    %859 = vector.load %arg5[%c2_452, %c0_453, %c1_454] : memref<4x10x18xf32, #tpu.memory_space<vmem>>, vector<1x8x16xf32>
    %860 = vector.shape_cast %859 : vector<1x8x16xf32> to vector<8x16xf32>
    %c136 = arith.constant 136 : index
    %861 = memref.load %arg3[%c136] : memref<144xf32, #tpu.memory_space<smem>>
    %862 = vector.broadcast %861 : f32 to vector<8x16xf32>
    %863 = arith.mulf %862, %860 : vector<8x16xf32>
    %864 = arith.addf %858, %863 : vector<8x16xf32>
    %c2_455 = arith.constant 2 : index
    %c0_456 = arith.constant 0 : index
    %c2_457 = arith.constant 2 : index
    %865 = vector.load %arg5[%c2_455, %c0_456, %c2_457] : memref<4x10x18xf32, #tpu.memory_space<vmem>>, vector<1x8x16xf32>
    %866 = vector.shape_cast %865 : vector<1x8x16xf32> to vector<8x16xf32>
    %c137 = arith.constant 137 : index
    %867 = memref.load %arg3[%c137] : memref<144xf32, #tpu.memory_space<smem>>
    %868 = vector.broadcast %867 : f32 to vector<8x16xf32>
    %869 = arith.mulf %868, %866 : vector<8x16xf32>
    %870 = arith.addf %864, %869 : vector<8x16xf32>
    %c2_458 = arith.constant 2 : index
    %c1_459 = arith.constant 1 : index
    %c0_460 = arith.constant 0 : index
    %871 = vector.load %arg5[%c2_458, %c1_459, %c0_460] : memref<4x10x18xf32, #tpu.memory_space<vmem>>, vector<1x8x16xf32>
    %872 = vector.shape_cast %871 : vector<1x8x16xf32> to vector<8x16xf32>
    %c138 = arith.constant 138 : index
    %873 = memref.load %arg3[%c138] : memref<144xf32, #tpu.memory_space<smem>>
    %874 = vector.broadcast %873 : f32 to vector<8x16xf32>
    %875 = arith.mulf %874, %872 : vector<8x16xf32>
    %876 = arith.addf %870, %875 : vector<8x16xf32>
    %c2_461 = arith.constant 2 : index
    %c1_462 = arith.constant 1 : index
    %c1_463 = arith.constant 1 : index
    %877 = vector.load %arg5[%c2_461, %c1_462, %c1_463] : memref<4x10x18xf32, #tpu.memory_space<vmem>>, vector<1x8x16xf32>
    %878 = vector.shape_cast %877 : vector<1x8x16xf32> to vector<8x16xf32>
    %c139 = arith.constant 139 : index
    %879 = memref.load %arg3[%c139] : memref<144xf32, #tpu.memory_space<smem>>
    %880 = vector.broadcast %879 : f32 to vector<8x16xf32>
    %881 = arith.mulf %880, %878 : vector<8x16xf32>
    %882 = arith.addf %876, %881 : vector<8x16xf32>
    %c2_464 = arith.constant 2 : index
    %c1_465 = arith.constant 1 : index
    %c2_466 = arith.constant 2 : index
    %883 = vector.load %arg5[%c2_464, %c1_465, %c2_466] : memref<4x10x18xf32, #tpu.memory_space<vmem>>, vector<1x8x16xf32>
    %884 = vector.shape_cast %883 : vector<1x8x16xf32> to vector<8x16xf32>
    %c140 = arith.constant 140 : index
    %885 = memref.load %arg3[%c140] : memref<144xf32, #tpu.memory_space<smem>>
    %886 = vector.broadcast %885 : f32 to vector<8x16xf32>
    %887 = arith.mulf %886, %884 : vector<8x16xf32>
    %888 = arith.addf %882, %887 : vector<8x16xf32>
    %c2_467 = arith.constant 2 : index
    %c2_468 = arith.constant 2 : index
    %c0_469 = arith.constant 0 : index
    %889 = vector.load %arg5[%c2_467, %c2_468, %c0_469] : memref<4x10x18xf32, #tpu.memory_space<vmem>>, vector<1x8x16xf32>
    %890 = vector.shape_cast %889 : vector<1x8x16xf32> to vector<8x16xf32>
    %c141 = arith.constant 141 : index
    %891 = memref.load %arg3[%c141] : memref<144xf32, #tpu.memory_space<smem>>
    %892 = vector.broadcast %891 : f32 to vector<8x16xf32>
    %893 = arith.mulf %892, %890 : vector<8x16xf32>
    %894 = arith.addf %888, %893 : vector<8x16xf32>
    %c2_470 = arith.constant 2 : index
    %c2_471 = arith.constant 2 : index
    %c1_472 = arith.constant 1 : index
    %895 = vector.load %arg5[%c2_470, %c2_471, %c1_472] : memref<4x10x18xf32, #tpu.memory_space<vmem>>, vector<1x8x16xf32>
    %896 = vector.shape_cast %895 : vector<1x8x16xf32> to vector<8x16xf32>
    %c142 = arith.constant 142 : index
    %897 = memref.load %arg3[%c142] : memref<144xf32, #tpu.memory_space<smem>>
    %898 = vector.broadcast %897 : f32 to vector<8x16xf32>
    %899 = arith.mulf %898, %896 : vector<8x16xf32>
    %900 = arith.addf %894, %899 : vector<8x16xf32>
    %c2_473 = arith.constant 2 : index
    %c2_474 = arith.constant 2 : index
    %c2_475 = arith.constant 2 : index
    %901 = vector.load %arg5[%c2_473, %c2_474, %c2_475] : memref<4x10x18xf32, #tpu.memory_space<vmem>>, vector<1x8x16xf32>
    %902 = vector.shape_cast %901 : vector<1x8x16xf32> to vector<8x16xf32>
    %c143 = arith.constant 143 : index
    %903 = memref.load %arg3[%c143] : memref<144xf32, #tpu.memory_space<smem>>
    %904 = vector.broadcast %903 : f32 to vector<8x16xf32>
    %905 = arith.mulf %904, %902 : vector<8x16xf32>
    %906 = arith.addf %900, %905 : vector<8x16xf32>
    %907 = arith.maximumf %853, %906 : vector<8x16xf32>
    %908 = arith.addf %800, %907 : vector<8x16xf32>
    %c0_476 = arith.constant 0 : index
    %c3_477 = arith.constant 3 : index
    %c0_478 = arith.constant 0 : index
    %c0_479 = arith.constant 0 : index
    %909 = vector.load %arg4[%c0_476, %c3_477, %c0_478, %c0_479] : memref<1x4x8x16xf32, #tpu.memory_space<vmem>>, vector<1x1x8x16xf32>
    %910 = vector.shape_cast %909 : vector<1x1x8x16xf32> to vector<8x16xf32>
    %911 = vector.shape_cast %908 : vector<8x16xf32> to vector<1x1x8x16xf32>
    tpu.vector_store %arg4[%c0_476, %c3_477, %c0_478, %c0_479], %911 {strides = array<i32>} : memref<1x4x8x16xf32, #tpu.memory_space<vmem>>, vector<1x1x8x16xf32>,
    return
  }
  func.func @transform_0(%arg0: i32, %arg1: i32) -> (i32, i32, i32, i32) {
    %c0_i32 = arith.constant 0 : i32
    %c0_i32_0 = arith.constant 0 : i32
    %c0_i32_1 = arith.constant 0 : i32
    %c0_i32_2 = arith.constant 0 : i32
    return %arg0, %c0_i32, %c0_i32_0, %c0_i32_1 : i32, i32, i32, i32
  }
  func.func @transform_1(%arg0: i32, %arg1: i32) -> i32 {
    %c0_i32 = arith.constant 0 : i32
    %c0_i32_0 = arith.constant 0 : i32
    return %c0_i32 : i32
  }
  func.func @transform_2(%arg0: i32, %arg1: i32) -> (i32, i32, i32, i32) {
    %c0_i32 = arith.constant 0 : i32
    %c0_i32_0 = arith.constant 0 : i32
    %c0_i32_1 = arith.constant 0 : i32
    return %arg0, %c0_i32, %arg1, %c0_i32_0 : i32, i32, i32, i32
  }
}

</mosaic_0001>

<bundles_post_ra>
// kernel: tpu_custom_call.1
= control target key start
LH: loop header
LB: loop body
LE: loop exit
PB: predicated region body
PF: predicated region fallthrough
CT: control target
= control target key end

     0   :  { %s2779_s0 = inlined_call_operand.hbm [shape: f32[2,4,16,16], index: 0, kind: input, shape index: {}]   ;;  %s2780_s1 = inlined_call_operand.hbm [shape: f32[144], index: 1, kind: input, shape index: {}]   ;;  %s2781_s2 = inlined_call_operand.hbm [shape: f32[2,4,16,16], index: 2, kind: output, shape index: {}]  }
   0x1   :  { %2789 = sst [smem:[#allocation17_spill]] %s2780_s1 }
   0x2   :  { %7 = vsyncpa [#allocation4], 0 }
   0x3   :  { %9 = vsyncpa [#allocation4 + $0x1], 0 }
   0x4   :  { %10 = vsyncpa [#allocation6], 0 }
   0x5   :  { %11 = vsyncpa [#allocation5], 0 }
   0x6   :  { %13 = vsyncpa [#allocation5 + $0x1], 0  ;;  %s1949_s9 = smov 0   ;;  %s1951_s10 = smov 0  }
   0x7   :  { %s1953_s11 = smov 0   ;;  %s1955_s12 = smov 0  }
   0x8   :  { %s1957_s13 = smov 0   ;;  %s1959_s14 = smov 0  }
   0x9   :  { %s1961_s15 = smov 0   ;;  %s1963_s16 = smov 0  }
   0xa   :  { %s1965_s17 = smov 0   ;;  %s1967_s18 = smov 0  }
   0xb   :  { %s1969_s19 = smov 0  }
   0xc LB: > { %2790 = sst [smem:[#allocation12_spill]] %s1880_s9  ;;  %s1441_s20 = sadd.s32 4294967295, %s1920_s19   ;;  %s1920_s19 = sphi %s1969_s19, %s19_s19   ;;  %s1916_s18 = sphi %s1967_s18, %s2821_s18   ;;  %s1912_s17 = sphi %s1965_s17, %s2820_s17   ;;  %s1908_s16 = sphi %s1963_s16, %s2819_s16   ;;  %s1904_s15 = sphi %s1961_s15, %s2811_s15   ;;  %s1900_s14 = sphi %s1959_s14, %s2818_s14   ;;  %s1896_s13 = sphi %s1957_s13, %s2817_s13   ;;  %s1892_s12 = sphi %s1955_s12, %s2816_s12   ;;  %s1888_s11 = sphi %s1953_s11, %s2815_s11   ;;  %s1884_s10 = sphi %s1951_s10, %s2814_s10   ;;  %s1880_s9 = sphi %s1949_s9, %s2813_s9  }
   0xd   : > { %2791 = sst [smem:[#allocation13_spill]] %s1912_s17  ;;  %s1442_s21 = sadd.s32 4294967294, %s1920_s19  }
   0xe   : > { %2792 = sst [smem:[#allocation14_spill]] %s1920_s19  ;;  %p45_p0 = scmp.ne.s32.totalorder %s1900_s14, %s1896_s13 }
   0xf   : > { %p46_p1 = scmp.eq.s32.totalorder %s1920_s19, 0  ;;  %p51_p2 = scmp.ne.s32.totalorder %s1896_s13, %s1892_s12 }
  0x10   : > { %p2009_p3 = scmp.eq.s32.totalorder %s1441_s20, 0  ;;  %p97_p5 = scmp.ne.s32.totalorder %s1888_s11, %s1884_s10 }
  0x11   : > { %p2014_p4 = por %p46_p1, %p45_p0  ;;  %p98_p7 = scmp.eq.s32.totalorder %s1441_s20, 3 }
  0x12   : > { %p2022_p6 = por %p2009_p3, %p51_p2  ;;  %p103_p8 = scmp.ne.s32.totalorder %s1884_s10, %s1880_s9 }
  0x13   : > { %p104_p9 = scmp.eq.s32.totalorder %s1442_s21, 3  ;;  %p2028_p10 = por %p98_p7, %p97_p5 }
  0x14   : > { %p1443_p11 = scmp.ge.s32.totalorder %s1920_s19, 1  ;;  %p111_p13 = scmp.lt.s32.totalorder %s1920_s19, 5 }
  0x15   : > { %s2796_s27 = scalar_select %p2028_p10, 1, 0 }
  0x16   : > { %p2033_p12 = por %p104_p9, %p103_p8  ;;  %p2038_p0 = pnand %p1443_p11, %p111_p13 }
  0x17   : > { %p1644_p1 = scmp.lt.s32.totalorder %s1920_s19, 4  ;;  %s28_s3 = sadd.s32 1, %s1912_s17 }
  0x18   : > { %s2797_s28 = scalar_select %p2033_p12, 1, 0 }
  0x19   : > { %p1631_p2 = pneg %p2038_p0  ;;  %p2047_p5 = pnand %p1644_p1, %p2014_p4 }
  0x1a   : > { %2798 = sst [smem:[#allocation15_spill]] %s2797_s28  ;;  %p29_p8 = scmp.ge.s32.totalorder %s28_s3, 2 }
  0x1b   : > { %p1632_p7 = pnand %p1631_p2, %p2009_p3  ;;  %s1922_s4 = smov [#allocation7]  }
  0x1c   : > { %s2801_s1 = sld [smem:[#allocation17_spill]]  ;;  %s2823_s3 = smov (%p29_p8, %s28_s3), 0 }
  0x1d   : > { %2802 = sst [smem:[#allocation16_spill]] %s2823_s3  ;;  %s31_s7 = sadd.s32 1, %s1916_s18 }
  0x1e   : > { %s133_s8 = sand.u32 1, %s1900_s14   ;;  %s2825_s7 = smov (!%p29_p8, %s31_s7), %s1916_s18 }
  0x1f   : > { %s83_s12 = ssub.s32 %s1912_s17, %s2823_s3  ;;  %p33_p4 = scmp.ge.s32.totalorder %s2825_s7, 2 }
  0x20   : > { %s1446_s20 = sshll.u32 %s133_s8, 6  ;;  %s1618_s21 = sshll.u32 %s1916_s18, 10 }
  0x21   : > { %s2827_s7 = smov (%p33_p4, %s2825_s7), 0  ;;  %s137_s6 = scalar_lea.vmem [#allocation3], %s1446_s20 }
  0x22   : > { %1634 = dma.hbm_to_smem (!%p1632_p7), %s2801_s1, 32, %s1922_s4, [#allocation6]  }
  0x23   : > { %s2070_s4 = scalar_lea.hbm %s2779_s0, %s1618_s21  ;;  %s144_s24 = sshll.u32 %s137_s6, 4  ;;  %s145_s24 = int_to_ptr.vmem [resolvable:$true] %s144_s24 }
  0x24   : > { %s35_s22 = ssub.s32 %s1916_s18, %s2827_s7  ;;  %s2803_s3 = sadd.s32 1, %s1900_s14 }
  0x25   : > { %p36_p9 = scmp.eq.s32.totalorder %s35_s22, 0  ;;  %s84_s1 = sor.u32 %s83_s12, %s35_s22 }
  0x26   : > { %p85_p11 = scmp.eq.s32.totalorder %s84_s1, 0  ;;  %s2804_s28 = sadd.s32 1, %s1888_s11 }
  0x27   : > { %s2077_s17 = scalar_select %p36_p9, %s1900_s14, %s2803_s3  }
  0x28   : > { %s2082_s9 = scalar_select %p85_p11, %s1888_s11, %s2804_s28  }
  0x29   : > { %s134_s19 = scalar_lea.sflag [#allocation4], %s133_s8  ;;  %p1770_p13 = pneg %p2047_p5 }
  0x2a   : > { %s1781_s25 = scalar_lea.vmem %s145_s24, 1024  ;;  %s1923_s20 = smov [#allocation3]  }
  0x2b   : > { %p1782_p1 = scmp.ne.s32.totalorder %s145_s24, %s1781_s25  ;;  %s1786_s21 = sshll.u32 %s1923_s20, 4  ;;  %s1787_s21 = int_to_ptr.vmem [resolvable:$false] %s1786_s21 }
  0x2c   : > { %s1788_s5 = scalar_lea.vmem %s1787_s21, 2048  ;;  %p1789_p8 = scmp.lt.s32.totalorder %s145_s24, %s1787_s21 }
  0x2d   : > { %p1784_p2 = pnand %p1782_p1, %p1770_p13  ;;  %p1790_p4 = scmp.lt.s32.totalorder %s1788_s5, %s1781_s25 }
  0x2f   : > { %p1785_p7 = pneg %p1784_p2  ;;  %p1791_p12 = por %p1790_p4, %p1789_p8 }
  0x31   : > { %p1792_p10 = pnand %p1791_p12, %p1785_p7 }
  0x33   : > { %1795 = shalt.err (!%p1792_p10)
}
  0x34   : > { %s1924_s1 = smov 128   ;;  %s1925_s22 = smov 8  }
  0x35   : > { %1638 = dma.hbm_to_vmem [thread:$0]  (!%p2047_p5), %s2070_s4, 1024, %s145_s24, %s134_s19, %s1924_s1, %s1924_s1, %s1925_s22  }
  0x36   : > { %156 = sbr.rel (%p2038_p0) target bundleno = 520 (0x208), region = 28  ;;  %s158_s28 = sand.u32 (!%p2038_p0), 1, %s1896_s13  }
  0x37   : > { %s1450_s3 = sshll.u32 (!%p2038_p0), %s158_s28, 6  ;;  %s159_s8 = scalar_lea.sflag (!%p2038_p0), [#allocation4], %s158_s28 }
  0x38   : > { %s2092_s12 = scalar_lea.vmem (!%p2038_p0), [#allocation3], %s1450_s3 }
  0x3b   : > { %1867 = dma.done.wait (%p2022_p6), %s159_s8, 1024  }
  0x3c   : > { %1869 = vsyncadd (%p2022_p6), %s159_s8, 4294966272 }
  0x3d   : > { %1871 = dma.done.wait (%p2009_p3), [#allocation6], 32  }
  0x3e   : > { %1873 = vsyncadd (%p2009_p3), [#allocation6], 4294967264 }
  0x3f   : > { %171 = sfence }
  0x40   : > { %s1453_s19 = sshll.u32 %s1904_s15, 3  ;;  %vm189_vm0 = vcmask 7168   ;;  %vm191_vm1 = vcmask 1024   ;;  %vm199_vm2 = vcmask 146568   ;;  %v1926_v0 = vmov 0.0   ;;  %s1927_s26 = smov 1  }
  0x41   : > { %s209_s24 = scalar_lea.vmem %s2092_s12, %s1453_s19 [#allocation3]  ;;  %s2104_s29 = sadd.s32 4294967295, %s1453_s19  ;;  %190 = vst.msk [vmem:[#allocation2] sm:$0xff] %vm189_vm0, %v1926_v0  ;;  %vm201_vm3 = vcmask 140424   ;;  %193 = vst.msk [vmem:[#allocation2 + $0x10] sm:$0xff] %vm189_vm0, %v1926_v0  ;;  %vm230_vm4 = vcmask 138248   ;;  %vm272_vm5 = vcmask 131080  }
  0x42   : > { %192 = vst.msk [vmem:[#allocation2 + $0x8] sm:$0x3] %vm191_vm1, %v1926_v0  ;;  %194 = vst.msk [vmem:[#allocation2 + $0x18] sm:$0x3] %vm191_vm1, %v1926_v0  ;;  %v210_v1 = vld [vmem:[%s209_s24] sm:$0xff]  ;;  %s2106_s23 = sadd.s32 8, %s1453_s19 }
  0x43   : > { %195 = vst.msk [vmem:[#allocation2 + $0x20] sm:$0xff] %vm189_vm0, %v1926_v0  ;;  %197 = vst.msk [vmem:[#allocation2 + $0x30] sm:$0xff] %vm189_vm0, %v1926_v0  ;;  %v212_v2 = vld [vmem:[%s209_s24 + $0x20] sm:$0xff]  ;;  %p236_p3 = scmp.gt.s32.totalorder %s2104_s29, 0  ;;  %218 = vrot.lane.b32.xlu0 %v210_v1, %s1927_s26  ;;  %p1455_p6 = scmp.lt.s32.totalorder %s2104_s29, 15  ;;  %v211_v3 = vld [vmem:[%s209_s24 + $0x10] sm:$0xff] }
  0x44   : > { %196 = vst.msk [vmem:[#allocation2 + $0x28] sm:$0x3] %vm191_vm1, %v1926_v0  ;;  %198 = vst.msk [vmem:[#allocation2 + $0x38] sm:$0x3] %vm191_vm1, %v1926_v0  ;;  %222 = vrot.lane.b32.xlu1 %v212_v2, %s1927_s26  ;;  %p240_p10 = scmp.ge.s32.totalorder %s2104_s29, 0  ;;  %v213_v4 = vld [vmem:[%s209_s24 + $0x30] sm:$0xff] }
  0x45   : > { %200 = vst.msk [vmem:[#allocation2] sm:$0xff] %vm199_vm2, %v1926_v0  ;;  %205 = vst.msk [vmem:[#allocation2 + $0x20] sm:$0xff] %vm199_vm2, %v1926_v0  ;;  %s237_s30 = scalar_select %p236_p3, %s2104_s29, 0  ;;  %vm568_vm6 = vcmask 130048  }
  0x46   : > { %202 = vst.msk [vmem:[#allocation2 + $0x8] sm:$0x3] %vm201_vm3, %v1926_v0  ;;  %206 = vst.msk [vmem:[#allocation2 + $0x28] sm:$0x3] %vm201_vm3, %v1926_v0  ;;  %p241_p12 = scmp.lt.s32.totalorder %s2104_s29, 16  ;;  %p278_p0 = scmp.gt.s32.totalorder %s2106_s23, 0 }
  0x47   : > { %203 = vst.msk [vmem:[#allocation2 + $0x10] sm:$0xff] %vm199_vm2, %v1926_v0  ;;  %207 = vst.msk [vmem:[#allocation2 + $0x30] sm:$0xff] %vm199_vm2, %v1926_v0  ;;  %s2829_s30 = smov (!%p1455_p6, %s237_s30), 15  ;;  %220 = vrot.lane.b32.xlu0 %v211_v3, %s1927_s26  ;;  %p1461_p9 = scmp.lt.s32.totalorder %s2106_s23, 15 }
  0x48   : > { %204 = vst.msk [vmem:[#allocation2 + $0x18] sm:$0x3] %vm201_vm3, %v1926_v0  ;;  %208 = vst.msk [vmem:[#allocation2 + $0x38] sm:$0x3] %vm201_vm3, %v1926_v0  ;;  %224 = vrot.lane.b32.xlu1 %v213_v4, %s1927_s26  ;;  %p242_p5 = pnand %p241_p12, %p240_p10  ;;  %s246_s4 = scalar_lea.vmem %s2092_s12, %s2829_s30 [#allocation3] }
  0x49   : > { %p282_p11 = scmp.ge.s32.totalorder %s2106_s23, 0  ;;  %v248_v5 = vld [vmem:[%s246_s4 + $0x10] sm:$0x1]  ;;  %v247_v6 = vld [vmem:[%s246_s4] sm:$0x1]  ;;  %p283_p13 = scmp.lt.s32.totalorder %s2106_s23, 16 }
  0x4a   : > { %s1460_s6 = scalar_select %p242_p5, 0, 1  ;;  %v250_v8 = vld [vmem:[%s246_s4 + $0x30] sm:$0x1]  ;;  %v249_v9 = vld [vmem:[%s246_s4 + $0x20] sm:$0x1] }
  0x4b   : > { %s279_s25 = scalar_select %p278_p0, %s2106_s23, 0 }
  0x4c   : > { %s245_s20 = scvt.s32.f32 %s1460_s6  ;;  %p284_p1 = pnand %p283_p13, %p282_p11 }
  0x4d   : > { %s2831_s25 = smov (!%p1461_p9, %s279_s25), 15  ;;  %s1471_s22 = sld [smem:[#allocation7 + $0x5]] }
  0x4e   : > { %v251_v7 = vstv %s245_s20  ;;  %s288_s21 = scalar_lea.vmem %s2092_s12, %s2831_s25 [#allocation3]  ;;  %s1470_s28 = sld [smem:[#allocation7 + $0x4]] }
  0x4f   : > { %v253_v10 = vmul.f32 %v251_v7, %v248_v5  ;;  %v252_v11 = vmul.f32 %v251_v7, %v247_v6  ;;  %s1466_s5 = scalar_select %p284_p1, 0, 1  ;;  %v255_v12 = vmul.f32 %v251_v7, %v250_v8  ;;  %v254_v13 = vmul.f32 %v251_v7, %v249_v9  ;;  %v290_v14 = vld [vmem:[%s288_s21 + $0x10] sm:$0x1]  ;;  %v289_v15 = vld [vmem:[%s288_s21] sm:$0x1] }
  0x50   : > { %v292_v19 = vld [vmem:[%s288_s21 + $0x30] sm:$0x1]  ;;  %v291_v20 = vld [vmem:[%s288_s21 + $0x20] sm:$0x1]  ;;  %s1480_s3 = sld [smem:[#allocation7 + $0xe]]  ;;  %s1928_s23 = smov 126  }
  0x51   : > { %262 = vrot.lane.b32.xlu1 %v253_v10, %s1927_s26  ;;  %260 = vrot.lane.b32.xlu0 %v252_v11, %s1927_s26  ;;  %s287_s1 = scvt.s32.f32 %s1466_s5  ;;  %s1479_s8 = sld [smem:[#allocation7 + $0xd]] }
  0x52   : > { %s2142_s12 = sld [smem:[#allocation7 + $0x17]]  ;;  %p2805_p7 = scmp.ne.s32.totalorder %s2796_s27, 0 }
  0x53   : > { %v293_v16 = vstv %s287_s1  ;;  %s2144_s19 = sld [smem:[#allocation7 + $0x16]]  ;;  %v353_v27 = vstv %s1471_s22 }
  0x54   : > { %v295_v17 = vmul.f32 %v293_v16, %v290_v14  ;;  %v294_v18 = vmul.f32 %v293_v16, %v289_v15  ;;  %v297_v21 = vmul.f32 %v293_v16, %v292_v19  ;;  %v296_v22 = vmul.f32 %v293_v16, %v291_v20  ;;  %s2150_s24 = sld [smem:[#allocation7 + $0x20]] }
  0x55   : > { %266 = vrot.lane.b32.xlu1 %v255_v12, %s1927_s26  ;;  %264 = vrot.lane.b32.xlu0 %v254_v13, %s1927_s26  ;;  %v345_v28 = vstv %s1470_s28  ;;  %s2154_s29 = sld [smem:[#allocation7 + $0x1f]] }
  0x56   : > { %v413_v34 = vstv %s1480_s3  ;;  %s2164_s30 = sld [smem:[#allocation7 + $0x29]] }
  0x57   : > { %v405_v35 = vstv %s1479_s8  ;;  %s1506_s4 = sld [smem:[#allocation7 + $0x28]] }
  0x58   : > { %v476_v37 = vstv %s2142_s12  ;;  %s2172_s6 = sld [smem:[#allocation7 + $0x32]] }
  0x59   : > { %304 = vrot.lane.b32.xlu1 %v295_v17, %s1927_s26  ;;  %302 = vrot.lane.b32.xlu0 %v294_v18, %s1927_s26  ;;  %v468_v38 = vstv %s2144_s19  ;;  %s1515_s25 = sld [smem:[#allocation7 + $0x31]] }
  0x5a   : > { %v538_v48 = vstv %s2150_s24  ;;  %s1525_s20 = sld [smem:[#allocation7 + $0x3b]] }
  0x5b   : > { %v530_v49 = vstv %s2154_s29  ;;  %s1524_s21 = sld [smem:[#allocation7 + $0x3a]] }
  0x5c   : > { %v605_v55 = vstv %s2164_s30  ;;  %s1534_s5 = sld [smem:[#allocation7 + $0x44]] }
  0x5d   : > { %308 = vrot.lane.b32.xlu1 %v297_v21, %s1927_s26  ;;  %306 = vrot.lane.b32.xlu0 %v296_v22, %s1927_s26  ;;  %s1929_s26 = smov 127   ;;  %v597_v56 = vstv %s1506_s4  ;;  %s1533_s1 = sld [smem:[#allocation7 + $0x43]] }
  0x5e   : > { %v667_v59 = vstv %s2172_s6  ;;  %s1544_s22 = sld [smem:[#allocation7 + $0x4d]] }
  0x5f   : > { %v659_v60 = vstv %s1515_s25  ;;  %s1543_s28 = sld [smem:[#allocation7 + $0x4c]] }
  0x60   : > { %v730_v63 = vstv %s1525_s20  ;;  %s1552_s3 = sld [smem:[#allocation7 + $0x55]] }
  0x61   : > { %v722_v0 = vstv %s1524_s21  ;;  %s1468_s8 = sld [smem:[#allocation7 + $0x2]] }
  0x62   : > { %v792_v3 = vstv %s1534_s5  ;;  %s1474_s12 = sld [smem:[#allocation7 + $0x8]] }
  0x63   : > { %v784_v4 = vstv %s1533_s1  ;;  %s1467_s19 = sld [smem:[#allocation7 + $0x1]] }
  0x64   : > { %v858_v7 = vstv %s1544_s22  ;;  %s1477_s24 = sld [smem:[#allocation7 + $0xb]] }
  0x65   : > { %v850_v8 = vstv %s1543_s28  ;;  %s1473_s29 = sld [smem:[#allocation7 + $0x7]] }
  0x66   : > { %v912_v11 = vstv %s1552_s3  ;;  %s1483_s30 = sld [smem:[#allocation7 + $0x11]] }
  0x67   : > { %v332_v13 = vstv %s1468_s8  ;;  %s1476_s4 = sld [smem:[#allocation7 + $0xa]] }
  0x68   : > { %v374_v17 = vstv %s1474_s12  ;;  %s1486_s6 = sld [smem:[#allocation7 + $0x14]] }
  0x69   : > { %v324_v18 = vstv %s1467_s19  ;;  %s1482_s25 = sld [smem:[#allocation7 + $0x10]] }
  0x6a   : > { %v393_v21 = vstv %s1477_s24  ;;  %s1492_s20 = sld [smem:[#allocation7 + $0x1a]] }
  0x6b   : > { %v366_v22 = vstv %s1473_s29  ;;  %s1485_s21 = sld [smem:[#allocation7 + $0x13]] }
  0x6c   : > { %s1491_s5 = sld [smem:[#allocation7 + $0x19]] }
  0x6d   : > { %s1495_s1 = sld [smem:[#allocation7 + $0x1d]] }
  0x6e   : > { %s1494_s22 = sld [smem:[#allocation7 + $0x1c]] }
  0x6f   : > { %s1501_s28 = sld [smem:[#allocation7 + $0x23]] }
  0x70   : > { %s1504_s3 = sld [smem:[#allocation7 + $0x26]] }
  0x71   : > { %s1500_s8 = sld [smem:[#allocation7 + $0x22]] }
  0x72   : > { %s1503_s12 = sld [smem:[#allocation7 + $0x25]] }
  0x73   : > { %s1510_s19 = sld [smem:[#allocation7 + $0x2c]] }
  0x74   : > { %s1513_s24 = sld [smem:[#allocation7 + $0x2f]] }
  0x75   : > { %s1509_s29 = sld [smem:[#allocation7 + $0x2b]] }
  0xb5   : > { %v219_v23 = vpop.permute.xlu0 %218 }
  0xb6   : > { %v223_v24 = vpop.permute.xlu1 %222  ;;  %231 = vst.msk [vmem:[#allocation2 + $0x1] sm:$0xff] %vm230_vm4, %v219_v23 }
  0xb7   : > { %233 = vst.msk [vmem:[#allocation2 + $0x21] sm:$0xff] %vm230_vm4, %v223_v24 }
  0xb9   : > { %v221_v25 = vpop.permute.xlu0 %220 }
  0xba   : > { %v225_v26 = vpop.permute.xlu1 %224  ;;  %232 = vst.msk [vmem:[#allocation2 + $0x11] sm:$0xff] %vm230_vm4, %v221_v25  ;;  %v433_v25 = vstv %s1483_s30  ;;  %s1519_s30 = sld [smem:[#allocation7 + $0x35]] }
  0xbb   : > { %234 = vst.msk [vmem:[#allocation2 + $0x31] sm:$0xff] %vm230_vm4, %v225_v26  ;;  %v385_v26 = vstv %s1476_s4  ;;  %s1512_s4 = sld [smem:[#allocation7 + $0x2e]] }
  0xbd   : > { %v2176_v47 = vld [vmem:[#allocation2 + $0x1] sm:$0xff] }
  0xbe   : > { %v539_v52 = vmul.f32 %v538_v48, %v2176_v47  ;;  %v531_v53 = vmul.f32 %v530_v49, %v2176_v47  ;;  %v2186_v54 = vld [vmem:[#allocation2 + $0x21] sm:$0xff]  ;;  %v668_v61 = vmul.f32 %v667_v59, %v2176_v47  ;;  %v660_v62 = vmul.f32 %v659_v60, %v2176_v47 }
  0xbf   : > { %v606_v57 = vmul.f32 %v605_v55, %v2186_v54  ;;  %v598_v58 = vmul.f32 %v597_v56, %v2186_v54  ;;  %v913_v14 = vmul.f32 %v912_v11, %v2186_v54  ;;  %v559_v49 = vstv %s1501_s28  ;;  %s1530_s28 = sld [smem:[#allocation7 + $0x40]] }
  0xc0   : > { %v551_v55 = vstv %s1500_s8  ;;  %v626_v60 = vstv %s1510_s19  ;;  %s1536_s8 = sld [smem:[#allocation7 + $0x46]] }
  0xc1   : > { %v2146_v29 = vld [vmem:[#allocation2 + $0x11] sm:$0xff]  ;;  %s1540_s19 = sld [smem:[#allocation7 + $0x49]] }
  0xc2   : > { %v354_v32 = vmul.f32 %v353_v27, %v2146_v29  ;;  %v346_v33 = vmul.f32 %v345_v28, %v2146_v29  ;;  %v2158_v36 = vld [vmem:[#allocation2 + $0x31] sm:$0xff]  ;;  %v414_v41 = vmul.f32 %v413_v34, %v2146_v29  ;;  %v406_v42 = vmul.f32 %v405_v35, %v2146_v29 }
  0xc3   : > { %v263_v30 = vpop.permute.xlu1 %262  ;;  %v261_v31 = vpop.permute.xlu0 %260  ;;  %v477_v43 = vmul.f32 %v476_v37, %v2158_v36  ;;  %v469_v44 = vmul.f32 %v468_v38, %v2158_v36  ;;  %v731_v1 = vmul.f32 %v730_v63, %v2158_v36  ;;  %v723_v2 = vmul.f32 %v722_v0, %v2158_v36 }
  0xc4   : > { %274 = vst.msk [vmem:[#allocation2 + $0x10] sm:$0x1] %vm272_vm5, %v263_v30  ;;  %273 = vst.msk [vmem:[#allocation2] sm:$0x1] %vm272_vm5, %v261_v31  ;;  %356 = vrot.lane.b32.xlu1 %v354_v32, %s1928_s23  ;;  %348 = vrot.lane.b32.xlu0 %v346_v33, %s1929_s26  ;;  %v793_v5 = vmul.f32 %v792_v3, %v2146_v29  ;;  %v785_v6 = vmul.f32 %v784_v4, %v2146_v29  ;;  %v455_v31 = vstv %s1486_s6  ;;  %s1522_s6 = sld [smem:[#allocation7 + $0x38]] }
  0xc5   : > { %v859_v9 = vmul.f32 %v858_v7, %v2158_v36  ;;  %v851_v10 = vmul.f32 %v850_v8, %v2158_v36  ;;  %v425_v32 = vstv %s1482_s25  ;;  %v497_v37 = vstv %s1492_s20  ;;  %s1518_s25 = sld [smem:[#allocation7 + $0x34]] }
  0xc6   : > { %v447_v38 = vstv %s1485_s21  ;;  %v646_v63 = vstv %s1513_s24  ;;  %v618_v0 = vstv %s1509_s29  ;;  %s1528_s20 = sld [smem:[#allocation7 + $0x3e]]  ;;  %v688_v3 = vstv %s1519_s30 }
  0xc7   : > { %v267_v39 = vpop.permute.xlu1 %266  ;;  %v265_v40 = vpop.permute.xlu0 %264  ;;  %v638_v4 = vstv %s1512_s4  ;;  %s1521_s21 = sld [smem:[#allocation7 + $0x37]] }
  0xc8   : > { %276 = vst.msk [vmem:[#allocation2 + $0x30] sm:$0x1] %vm272_vm5, %v267_v39  ;;  %275 = vst.msk [vmem:[#allocation2 + $0x20] sm:$0x1] %vm272_vm5, %v265_v40  ;;  %416 = vrot.lane.b32.xlu1 %v414_v41, %s1928_s23  ;;  %408 = vrot.lane.b32.xlu0 %v406_v42, %s1929_s26  ;;  %v489_v41 = vstv %s1491_s5  ;;  %s1531_s5 = sld [smem:[#allocation7 + $0x41]] }
  0xc9   : > { %s1550_s24 = sld [smem:[#allocation7 + $0x53]] }
  0xca   : > { %v709_v7 = vstv %s1522_s6  ;;  %s1546_s29 = sld [smem:[#allocation7 + $0x4f]] }
  0xcb   : > { %v305_v45 = vpop.permute.xlu1 %304  ;;  %v303_v46 = vpop.permute.xlu0 %302  ;;  %v2210_v12 = vld [vmem:[#allocation2 + $0x10] sm:$0xff]  ;;  %v2242_v42 = vld [vmem:[#allocation2] sm:$0xff]  ;;  %v680_v8 = vstv %s1518_s25  ;;  %s1558_s30 = sld [smem:[#allocation7 + $0x5b]] }
  0xcc   : > { %315 = vst.msk [vmem:[#allocation2 + $0x19] sm:$0x1] %vm272_vm5, %v305_v45  ;;  %314 = vst.msk [vmem:[#allocation2 + $0x9] sm:$0x1] %vm272_vm5, %v303_v46  ;;  %479 = vrot.lane.b32.xlu1 %v477_v43, %s1928_s23  ;;  %471 = vrot.lane.b32.xlu0 %v469_v44, %s1929_s26  ;;  %v333_v15 = vmul.f32 %v332_v13, %v2210_v12  ;;  %v325_v20 = vmul.f32 %v324_v18, %v2210_v12  ;;  %v517_v43 = vstv %s1495_s1  ;;  %s1527_s1 = sld [smem:[#allocation7 + $0x3d]] }
  0xcd   : > { %v394_v23 = vmul.f32 %v393_v21, %v2210_v12  ;;  %v386_v28 = vmul.f32 %v385_v26, %v2210_v12  ;;  %v518_v45 = vmul.f32 %v517_v43, %v2242_v42  ;;  %v509_v46 = vstv %s1494_s22  ;;  %s1537_s22 = sld [smem:[#allocation7 + $0x47]] }
  0xce   : > { %v751_v11 = vstv %s1528_s20  ;;  %v701_v13 = vstv %s1521_s21  ;;  %v805_v26 = vstv %s1536_s8  ;;  %s1549_s4 = sld [smem:[#allocation7 + $0x52]] }
  0xcf   : > { %v309_v50 = vpop.permute.xlu1 %308  ;;  %v307_v51 = vpop.permute.xlu0 %306  ;;  %v2230_v30 = vld [vmem:[#allocation2 + $0x30] sm:$0xff]  ;;  %s1577_s6 = sld [smem:[#allocation7 + $0x6d]] }
  0xd0   : > { %317 = vst.msk [vmem:[#allocation2 + $0x39] sm:$0x1] %vm272_vm5, %v309_v50  ;;  %316 = vst.msk [vmem:[#allocation2 + $0x29] sm:$0x1] %vm272_vm5, %v307_v51  ;;  %541 = vrot.lane.b32.xlu1 %v539_v52, %s1928_s23  ;;  %533 = vrot.lane.b32.xlu0 %v531_v53, %s1929_s26  ;;  %v456_v33 = vmul.f32 %v455_v31, %v2230_v30  ;;  %v448_v40 = vmul.f32 %v447_v38, %v2230_v30  ;;  %v2254_v52 = vld [vmem:[#allocation2 + $0x20] sm:$0xff]  ;;  %v584_v53 = vstv %s1504_s3  ;;  %s1541_s3 = sld [smem:[#allocation7 + $0x4a]] }
  0xd1   : > { %v510_v50 = vmul.f32 %v509_v46, %v2242_v42  ;;  %v585_v56 = vmul.f32 %v584_v53, %v2254_v52  ;;  %v871_v38 = vstv %s1546_s29  ;;  %s1567_s25 = sld [smem:[#allocation7 + $0x64]] }
  0xd2   : > { %v743_v18 = vstv %s1527_s1  ;;  %s1595_s20 = sld [smem:[#allocation7 + $0x7f]] }
  0xd3   : > { %v2216_v16 = vld [vmem:[#allocation2 + $0x12] sm:$0xff]  ;;  %v2248_v48 = vld [vmem:[#allocation2 + $0x2] sm:$0xff]  ;;  %v813_v21 = vstv %s1537_s22  ;;  %s1586_s21 = sld [smem:[#allocation7 + $0x76]] }
  0xd4   : > { %608 = vrot.lane.b32.xlu1 %v606_v57, %s1928_s23  ;;  %600 = vrot.lane.b32.xlu0 %v598_v58, %s1929_s26  ;;  %v375_v19 = vmul.f32 %v374_v17, %v2216_v16  ;;  %v367_v24 = vmul.f32 %v366_v22, %v2216_v16  ;;  %v434_v27 = vmul.f32 %v433_v25, %v2216_v16  ;;  %v576_v58 = vstv %s1503_s12  ;;  %s1547_s12 = sld [smem:[#allocation7 + $0x50]] }
  0xd5   : > { %v426_v34 = vmul.f32 %v425_v32, %v2216_v16  ;;  %v560_v51 = vmul.f32 %v559_v49, %v2248_v48  ;;  %v552_v57 = vmul.f32 %v551_v55, %v2248_v48  ;;  %v771_v17 = vstv %s1531_s5  ;;  %s1559_s5 = sld [smem:[#allocation7 + $0x5c]] }
  0xd6   : > { %v763_v22 = vstv %s1530_s28  ;;  %v837_v25 = vstv %s1541_s3  ;;  %v829_v32 = vstv %s1540_s19  ;;  %v891_v43 = vstv %s1549_s4  ;;  %s1604_s1 = sld [smem:[#allocation7 + $0x88]] }
  0xd7   : > { %v2236_v35 = vld [vmem:[#allocation2 + $0x32] sm:$0xff]  ;;  %v2260_v59 = vld [vmem:[#allocation2 + $0x22] sm:$0xff]  ;;  %v1079_v46 = vstv %s1577_s6  ;;  %v1015_v49 = vstv %s1567_s25  ;;  %s1578_s22 = sld [smem:[#allocation7 + $0x6e]] }
  0xd8   : > { %670 = vrot.lane.b32.xlu1 %v668_v61, %s1928_s23  ;;  %662 = vrot.lane.b32.xlu0 %v660_v62, %s1929_s26  ;;  %v498_v39 = vmul.f32 %v497_v37, %v2236_v35  ;;  %v490_v44 = vmul.f32 %v489_v41, %v2236_v35  ;;  %v577_v61 = vmul.f32 %v576_v58, %v2254_v52  ;;  %v899_v37 = vstv %s1550_s24  ;;  %s1568_s28 = sld [smem:[#allocation7 + $0x65]] }
  0xd9   : > { %v627_v62 = vmul.f32 %v626_v60, %v2260_v59  ;;  %v954_v41 = vstv %s1558_s30  ;;  %v1080_v53 = vmul.f32 %v1079_v46, %v2230_v30  ;;  %v1016_v55 = vmul.f32 %v1015_v49, %v2242_v42  ;;  %s1596_s3 = sld [smem:[#allocation7 + $0x80]] }
  0xda   : > { %v879_v31 = vstv %s1547_s12  ;;  %s1587_s8 = sld [smem:[#allocation7 + $0x77]] }
  0xdb   : > { %s1561_s12 = sld [smem:[#allocation7 + $0x5e]] }
  0xdc   : > { %733 = vrot.lane.b32.xlu1 %v731_v1, %s1928_s23  ;;  %725 = vrot.lane.b32.xlu0 %v723_v2, %s1929_s26  ;;  %v647_v1 = vmul.f32 %v646_v63, %v2242_v42  ;;  %v619_v2 = vmul.f32 %v618_v0, %v2260_v59  ;;  %v962_v63 = vstv %s1559_s5  ;;  %v1265_v0 = vstv %s1604_s1  ;;  %s1605_s19 = sld [smem:[#allocation7 + $0x89]] }
  0xdd   : > { %s1580_s24 = sld [smem:[#allocation7 + $0x70]] }
  0xde   : > { %s1570_s29 = sld [smem:[#allocation7 + $0x67]] }
  0xdf   : > { %s1598_s30 = sld [smem:[#allocation7 + $0x82]] }
  0xe0   : > { %795 = vrot.lane.b32.xlu1 %v793_v5, %s1928_s23  ;;  %787 = vrot.lane.b32.xlu0 %v785_v6, %s1929_s26  ;;  %v689_v5 = vmul.f32 %v688_v3, %v2248_v48  ;;  %v639_v6 = vmul.f32 %v638_v4, %v2242_v42  ;;  %v963_v3 = vmul.f32 %v962_v63, %v2242_v42  ;;  %s1589_s4 = sld [smem:[#allocation7 + $0x79]] }
  0xe1   : > { %v1266_v4 = vmul.f32 %v1265_v0, %v2254_v52  ;;  %s1553_s6 = sld [smem:[#allocation7 + $0x56]] }
  0xe2   : > { %s1607_s25 = sld [smem:[#allocation7 + $0x8b]] }
  0xe3   : > { %s2366_s5 = sld [smem:[#allocation7]] }
  0xe4   : > { %861 = vrot.lane.b32.xlu1 %v859_v9, %s1928_s23  ;;  %853 = vrot.lane.b32.xlu0 %v851_v10, %s1929_s26  ;;  %v710_v9 = vmul.f32 %v709_v7, %v2230_v30  ;;  %v681_v10 = vmul.f32 %v680_v8, %v2248_v48  ;;  %s2374_s1 = sld [smem:[#allocation7 + $0x7a]] }
  0xe8   : > { %915 = vrot.lane.b32.xlu0 %v913_v14, %s1929_s26  ;;  %335 = vrot.lane.b32.xlu1 %v333_v15, %s1928_s23  ;;  %v752_v14 = vmul.f32 %v751_v11, %v2236_v35  ;;  %v702_v15 = vmul.f32 %v701_v13, %v2230_v30  ;;  %v1212_v11 = vstv %s1596_s3  ;;  %v1149_v13 = vstv %s1587_s8  ;;  %s2388_s3 = sld [smem:[#allocation7 + $0x8c]] }
  0xe9   : > { %s2391_s8 = sld [smem:[#allocation7 + $0x83]]  ;;  %v321_v63 = vstv %s2366_s5 }
  0xea   : > { %v1170_v0 = vstv %s2374_s1  ;;  %s2445_s5 = sld [smem:[#allocation7 + $0xf]] }
  0xeb   : > { %s2449_s1 = sld [smem:[#allocation7 + $0x15]] }
  0xec   : > { %377 = vrot.lane.b32.xlu1 %v375_v19, %s1928_s23  ;;  %327 = vrot.lane.b32.xlu0 %v325_v20, %s1929_s26  ;;  %v772_v19 = vmul.f32 %v771_v17, %v2210_v12  ;;  %v744_v20 = vmul.f32 %v743_v18, %v2236_v35  ;;  %v1213_v17 = vmul.f32 %v1212_v11, %v2254_v52 }
  0xed   : > { %v1150_v18 = vmul.f32 %v1149_v13, %v2210_v12 }
  0xf0   : > { %396 = vrot.lane.b32.xlu1 %v394_v23, %s1928_s23  ;;  %369 = vrot.lane.b32.xlu0 %v367_v24, %s1929_s26  ;;  %v814_v23 = vmul.f32 %v813_v21, %v2216_v16  ;;  %v764_v24 = vmul.f32 %v763_v22, %v2210_v12 }
  0xf4   : > { %436 = vrot.lane.b32.xlu1 %v434_v27, %s1928_s23  ;;  %388 = vrot.lane.b32.xlu0 %v386_v28, %s1929_s26  ;;  %v838_v27 = vmul.f32 %v837_v25, %v2230_v30  ;;  %v806_v28 = vmul.f32 %v805_v26, %v2216_v16  ;;  %v1100_v25 = vstv %s1580_s24  ;;  %v1035_v26 = vstv %s1570_s29  ;;  %s2406_s24 = sld [smem:[#allocation7 + $0x58]] }
  0xf5   : > { %s2410_s29 = sld [smem:[#allocation7 + $0x6]] }
  0xf8   : > { %458 = vrot.lane.b32.xlu1 %v456_v33, %s1928_s23  ;;  %428 = vrot.lane.b32.xlu0 %v426_v34, %s1929_s26  ;;  %v880_v33 = vmul.f32 %v879_v31, %v2236_v35  ;;  %v830_v34 = vmul.f32 %v829_v32, %v2230_v30  ;;  %v1101_v31 = vmul.f32 %v1100_v25, %v2158_v36 }
  0xf9   : > { %v1036_v32 = vmul.f32 %v1035_v26, %v2176_v47 }
  0xfc   : > { %500 = vrot.lane.b32.xlu1 %v498_v39, %s1928_s23  ;;  %450 = vrot.lane.b32.xlu0 %v448_v40, %s1929_s26  ;;  %v900_v39 = vmul.f32 %v899_v37, %v2254_v52  ;;  %v872_v40 = vmul.f32 %v871_v38, %v2236_v35 }
 0x100   : > { %492 = vrot.lane.b32.xlu0 %v490_v44, %s1929_s26  ;;  %520 = vrot.lane.b32.xlu1 %v518_v45, %s1928_s23  ;;  %v955_v44 = vmul.f32 %v954_v41, %v2242_v42  ;;  %v892_v45 = vmul.f32 %v891_v43, %v2254_v52  ;;  %v920_v41 = vstv %s1553_s6  ;;  %v1285_v43 = vstv %s1607_s25  ;;  %s2424_s6 = sld [smem:[#allocation7 + $0x6a]] }
 0x101   : > { %v921_v46 = vmul.f32 %v920_v41, %v2186_v54  ;;  %v1286_v49 = vmul.f32 %v1285_v43, %v2186_v54  ;;  %s2429_s25 = sld [smem:[#allocation7 + $0x12]] }
 0x104   : > { %512 = vrot.lane.b32.xlu0 %v510_v50, %s1929_s26  ;;  %562 = vrot.lane.b32.xlu1 %v560_v51, %s1928_s23 }
 0x108   : > { %587 = vrot.lane.b32.xlu1 %v585_v56, %s1928_s23  ;;  %554 = vrot.lane.b32.xlu0 %v552_v57, %s1929_s26  ;;  %v1204_v56 = vstv %s1595_s20  ;;  %v1141_v57 = vstv %s1586_s21  ;;  %s2362_s20 = sld [smem:[#allocation7 + $0x68]] }
 0x109   : > { %s1562_s21 = sld [smem:[#allocation7 + $0x5f]] }
 0x10c   : > { %579 = vrot.lane.b32.xlu0 %v577_v61, %s1929_s26  ;;  %629 = vrot.lane.b32.xlu1 %v627_v62, %s1928_s23  ;;  %v1205_v61 = vmul.f32 %v1204_v56, %v2254_v52  ;;  %v1142_v62 = vmul.f32 %v1141_v57, %v2210_v12 }
 0x110   : > { %649 = vrot.lane.b32.xlu1 %v647_v1, %s1928_s23  ;;  %621 = vrot.lane.b32.xlu0 %v619_v2, %s1929_s26 }
 0x114   : > { %691 = vrot.lane.b32.xlu1 %v689_v5, %s1928_s23  ;;  %641 = vrot.lane.b32.xlu0 %v639_v6, %s1929_s26  ;;  %v1087_v5 = vstv %s1578_s22  ;;  %v1023_v6 = vstv %s1568_s28  ;;  %s2376_s22 = sld [smem:[#allocation7 + $0x71]] }
 0x115   : > { %s2380_s28 = sld [smem:[#allocation7 + $0x3]] }
 0x118   : > { %712 = vrot.lane.b32.xlu1 %v710_v9, %s1928_s23  ;;  %683 = vrot.lane.b32.xlu0 %v681_v10, %s1929_s26  ;;  %v1088_v9 = vmul.f32 %v1087_v5, %v2230_v30  ;;  %v1024_v10 = vmul.f32 %v1023_v6, %v2242_v42 }
 0x11b   : > { %v341_v6 = vstv %s2380_s28  ;;  %s2462_s28 = sld [smem:[#allocation7 + $0x8e]] }
 0x11c   : > { %754 = vrot.lane.b32.xlu1 %v752_v14, %s1928_s23  ;;  %704 = vrot.lane.b32.xlu0 %v702_v15, %s1929_s26 }
 0x120   : > { %774 = vrot.lane.b32.xlu1 %v772_v19, %s1928_s23  ;;  %746 = vrot.lane.b32.xlu0 %v744_v20, %s1929_s26  ;;  %v975_v19 = vstv %s1561_s12  ;;  %v1273_v20 = vstv %s1605_s19  ;;  %s2395_s12 = sld [smem:[#allocation7 + $0x9]] }
 0x121   : > { %s2402_s19 = sld [smem:[#allocation7 + $0x61]] }
 0x124   : > { %816 = vrot.lane.b32.xlu1 %v814_v23, %s1928_s23  ;;  %766 = vrot.lane.b32.xlu0 %v764_v24, %s1929_s26  ;;  %v976_v23 = vmul.f32 %v975_v19, %v2176_v47  ;;  %v1274_v24 = vmul.f32 %v1273_v20, %v2254_v52  ;;  %v342_v19 = vmul.f32 %v341_v6, %v2146_v29 }
 0x128   : > { %840 = vrot.lane.b32.xlu1 %v838_v27, %s1928_s23  ;;  %808 = vrot.lane.b32.xlu0 %v806_v28, %s1929_s26 }
 0x12c   : > { %882 = vrot.lane.b32.xlu1 %v880_v33, %s1928_s23  ;;  %832 = vrot.lane.b32.xlu0 %v830_v34, %s1929_s26  ;;  %v1225_v33 = vstv %s1598_s30  ;;  %v1162_v34 = vstv %s1589_s4  ;;  %s2413_s30 = sld [smem:[#allocation7 + $0xc]] }
 0x12d   : > { %s2420_s4 = sld [smem:[#allocation7 + $0x73]] }
 0x130   : > { %902 = vrot.lane.b32.xlu1 %v900_v39, %s1928_s23  ;;  %874 = vrot.lane.b32.xlu0 %v872_v40, %s1929_s26  ;;  %v1226_v39 = vmul.f32 %v1225_v33, %v2186_v54  ;;  %v1163_v40 = vmul.f32 %v1162_v34, %v2146_v29  ;;  %v996_v33 = vstv %s2402_s19  ;;  %v933_v34 = vstv %s2406_s24  ;;  %s2478_s19 = sld [smem:[#allocation7 + $0x62]] }
 0x131   : > { %s2483_s24 = sld [smem:[#allocation7 + $0x1e]] }
 0x134   : > { %957 = vrot.lane.b32.xlu1 %v955_v44, %s1929_s26  ;;  %894 = vrot.lane.b32.xlu0 %v892_v45, %s1929_s26 }
 0x136   : > { %v2308_v50 = vpop.permute.xlu1 %356  ;;  %v2310_v51 = vpop.permute.xlu0 %348 }
 0x138   : > { %1082 = vrot.lane.b32.xlu1 %v1080_v53, %s1929_s26  ;;  %1018 = vrot.lane.b32.xlu0 %v1016_v55, %s1929_s26  ;;  %v1043_v53 = vstv %s2362_s20  ;;  %v983_v55 = vstv %s1562_s21  ;;  %s2436_s20 = sld [smem:[#allocation7 + $0x85]] }
 0x139   : > { %s2440_s21 = sld [smem:[#allocation7 + $0x7c]] }
 0x13a   : > { %v2316_v58 = vpop.permute.xlu1 %416  ;;  %v2318_v60 = vpop.permute.xlu0 %408 }
 0x13c   : > { %1207 = vrot.lane.b32.xlu1 %v1205_v61, %s1929_s26  ;;  %1144 = vrot.lane.b32.xlu0 %v1142_v62, %s1929_s26  ;;  %v1044_v61 = vmul.f32 %v1043_v53, %v2176_v47  ;;  %v984_v62 = vmul.f32 %v983_v55, %v2176_v47  ;;  %v997_v53 = vmul.f32 %v996_v33, %v2248_v48 }
 0x13d   : > { %v934_v55 = vmul.f32 %v933_v34, %v2260_v59 }
 0x13e   : > { %v2324_v1 = vpop.permute.xlu1 %479  ;;  %v2326_v2 = vpop.permute.xlu0 %471 }
 0x140   : > { %965 = vrot.lane.b32.xlu1 %v963_v3, %s1928_s23  ;;  %1268 = vrot.lane.b32.xlu0 %v1266_v4, %s1929_s26  ;;  %v1108_v3 = vstv %s2376_s22  ;;  %v322_v4 = vmul.f32 %v321_v63, %v2210_v12  ;;  %s2457_s22 = sld [smem:[#allocation7 + $0x59]]  ;;  %v1055_v63 = vstv %s2424_s6 }
 0x141   : > { %v1109_v11 = vmul.f32 %v1108_v3, %v2158_v36  ;;  %s2509_s6 = sld [smem:[#allocation7 + $0x8f]] }
 0x142   : > { %v2332_v7 = vpop.permute.xlu1 %541  ;;  %v2334_v8 = vpop.permute.xlu0 %533 }
 0x144   : > { %1090 = vrot.lane.b32.xlu1 %v1088_v9, %s1928_s23  ;;  %1026 = vrot.lane.b32.xlu0 %v1024_v10, %s1928_s23  ;;  %v1171_v10 = vmul.f32 %v1170_v0, %v2146_v29 }
 0x146   : > { %v2340_v14 = vpop.permute.xlu1 %608  ;;  %v2342_v15 = vpop.permute.xlu0 %600  ;;  %v941_v33 = vstv %s2457_s22  ;;  %s185_s22 = sand.u32 1, %s1884_s10  }
 0x148   : > { %1215 = vrot.lane.b32.xlu1 %v1213_v17, %s1928_s23  ;;  %1152 = vrot.lane.b32.xlu0 %v1150_v18, %s1928_s23  ;;  %v1293_v17 = vstv %s2388_s3  ;;  %v1233_v18 = vstv %s2391_s8  ;;  %s2466_s3 = sld [smem:[#allocation7 + $0x18]] }
 0x149   : > { %v1294_v25 = vmul.f32 %v1293_v17, %v2186_v54  ;;  %v1234_v26 = vmul.f32 %v1233_v18, %v2186_v54  ;;  %s2469_s8 = sld [smem:[#allocation7 + $0x1b]]  ;;  %v1246_v17 = vstv %s2436_s20  ;;  %v1183_v18 = vstv %s2440_s21 }
 0x14a   : > { %v2348_v21 = vpop.permute.xlu1 %670  ;;  %v2350_v22 = vpop.permute.xlu0 %662  ;;  %s2519_s20 = sld [smem:[#allocation7 + $0x21]] }
 0x14b   : > { %s2545_s21 = sld [smem:[#allocation7 + $0x2d]] }
 0x14c   : > { %978 = vrot.lane.b32.xlu1 %v976_v23, %s1929_s26  ;;  %1276 = vrot.lane.b32.xlu0 %v1274_v24, %s1928_s23 }
 0x14e   : > { %v2356_v27 = vpop.permute.xlu1 %733  ;;  %v2358_v28 = vpop.permute.xlu0 %725 }
 0x150   : > { %1103 = vrot.lane.b32.xlu1 %v1101_v31, %s1929_s26  ;;  %1038 = vrot.lane.b32.xlu0 %v1036_v32, %s1929_s26  ;;  %v382_v31 = vstv %s2395_s12  ;;  %s2474_s12 = sld [smem:[#allocation7 + $0x6b]] }
 0x151   : > { %v383_v41 = vmul.f32 %v382_v31, %v2210_v12  ;;  %v1247_v31 = vmul.f32 %v1246_v17, %v2260_v59 }
 0x152   : > { %v2368_v37 = vpop.permute.xlu1 %795  ;;  %v2370_v38 = vpop.permute.xlu0 %787 }
 0x154   : > { %1228 = vrot.lane.b32.xlu1 %v1226_v39, %s1929_s26  ;;  %1165 = vrot.lane.b32.xlu0 %v1163_v40, %s1929_s26  ;;  %v362_v39 = vstv %s2410_s29  ;;  %s2487_s29 = sld [smem:[#allocation7 + $0x7d]] }
 0x156   : > { %v2382_v44 = vpop.permute.xlu1 %861  ;;  %v2384_v45 = vpop.permute.xlu0 %853 }
 0x158   : > { %923 = vrot.lane.b32.xlu1 %v921_v46, %s1928_s23  ;;  %1288 = vrot.lane.b32.xlu0 %v1286_v49, %s1929_s26  ;;  %v401_v46 = vstv %s2413_s30  ;;  %s2495_s30 = sld [smem:[#allocation7 + $0x74]] }
 0x159   : > { %v402_v3 = vmul.f32 %v401_v46, %v2146_v29  ;;  %v421_v29 = vstv %s2445_s5  ;;  %s2552_s5 = sld [smem:[#allocation7 + $0x2a]] }
 0x15a   : > { %v336_v56 = vpop.permute.xlu1 %335  ;;  %v2397_v57 = vpop.permute.xlu0 %915 }
 0x15c   : > { %1046 = vrot.lane.b32.xlu1 %v1044_v61, %s1928_s23  ;;  %986 = vrot.lane.b32.xlu0 %v984_v62, %s1928_s23 }
 0x15e   : > { %v2415_v5 = vpop.permute.xlu1 %377  ;;  %v328_v9 = vpop.permute.xlu0 %327 }
 0x15f   : > { %v330_v13 = vadd.f32 %v328_v9, %v322_v4 }
 0x160   : > { %1173 = vrot.lane.b32.xlu1 %v1171_v10, %s1928_s23  ;;  %1111 = vrot.lane.b32.xlu0 %v1109_v11, %s1928_s23  ;;  %v1056_v10 = vmul.f32 %v1055_v63, %v2248_v48  ;;  %v444_v11 = vstv %s2429_s25  ;;  %s2513_s25 = sld [smem:[#allocation7 + $0x86]] }
 0x161   : > { %v338_v20 = vadd.f32 %v336_v56, %v330_v13  ;;  %v1121_v56 = vstv %s2420_s4  ;;  %s2504_s4 = sld [smem:[#allocation7 + $0x24]] }
 0x162   : > { %v397_v23 = vpop.permute.xlu1 %396  ;;  %v2431_v24 = vpop.permute.xlu0 %369  ;;  %v1122_v9 = vmul.f32 %v1121_v56, %v2236_v35  ;;  %v942_v56 = vmul.f32 %v941_v33, %v2260_v59 }
 0x163   : > { %v343_v32 = vadd.f32 %v342_v19, %v338_v20  ;;  %v445_v20 = vmul.f32 %v444_v11, %v2230_v30 }
 0x164   : > { %1296 = vrot.lane.b32.xlu1 %v1294_v25, %s1928_s23  ;;  %1236 = vrot.lane.b32.xlu0 %v1234_v26, %s1928_s23  ;;  %v464_v25 = vstv %s2449_s1  ;;  %s2561_s1 = sld [smem:[#allocation7 + $0x30]] }
 0x165   : > { %v351_v40 = vadd.f32 %v2310_v51, %v343_v32  ;;  %v363_v51 = vmul.f32 %v362_v39, %v2216_v16  ;;  %v1184_v32 = vmul.f32 %v1183_v18, %v2216_v16  ;;  %v1191_v18 = vstv %s2487_s29  ;;  %s2601_s29 = sld [smem:[#allocation7 + $0x42]] }
 0x166   : > { %v2451_v43 = vpop.permute.xlu1 %436  ;;  %v389_v49 = vpop.permute.xlu0 %388  ;;  %v1192_v33 = vmul.f32 %v1191_v18, %v2216_v16 }
 0x167   : > { %v359_v61 = vadd.f32 %v2308_v50, %v351_v40  ;;  %v391_v62 = vadd.f32 %v389_v49, %v383_v41  ;;  %v1305_v40 = vstv %s2462_s28  ;;  %v465_v49 = vmul.f32 %v464_v25, %v2158_v36  ;;  %s2570_s28 = sld [smem:[#allocation7 + $0x36]] }
 0x168   : > { %999 = vrot.lane.b32.xlu1 %v997_v53, %s1929_s26  ;;  %936 = vrot.lane.b32.xlu0 %v934_v55, %s1929_s26  ;;  %v485_v36 = vstv %s2466_s3  ;;  %s2573_s3 = sld [smem:[#allocation7 + $0x33]] }
 0x169   : > { %v364_v0 = vadd.f32 %v363_v51, %v359_v61  ;;  %v399_v50 = vadd.f32 %v397_v23, %v391_v62  ;;  %v1306_v61 = vmul.f32 %v1305_v40, %v2260_v59  ;;  %v506_v51 = vstv %s2469_s8  ;;  %s2581_s8 = sld [smem:[#allocation7 + $0x39]] }
 0x16a   : > { %v459_v4 = vpop.permute.xlu1 %458  ;;  %v429_v6 = vpop.permute.xlu0 %428  ;;  %v1254_v40 = vstv %s2513_s25  ;;  %s1548_s25 = sld [smem:[#allocation7 + $0x51]] }
 0x16b   : > { %v403_v13 = vadd.f32 %v402_v3, %v399_v50  ;;  %v372_v41 = vadd.f32 %v2431_v24, %v364_v0  ;;  %v1063_v24 = vstv %s2474_s12  ;;  %v1004_v0 = vstv %s2478_s19  ;;  %s2587_s12 = sld [smem:[#allocation7 + $0x3f]] }
 0x16c   : > { %1124 = vrot.lane.b32.xlu1 %v1122_v9, %s1929_s26  ;;  %1058 = vrot.lane.b32.xlu0 %v1056_v10, %s1929_s26  ;;  %v526_v3 = vstv %s2483_s24  ;;  %v507_v9 = vmul.f32 %v506_v51, %v2242_v42  ;;  %v1005_v17 = vmul.f32 %v1004_v0, %v2248_v48  ;;  %v1255_v51 = vmul.f32 %v1254_v40, %v2260_v59  ;;  %s2594_s24 = sld [smem:[#allocation7 + $0x3c]] }
 0x16d   : > { %v411_v19 = vadd.f32 %v2318_v60, %v403_v13  ;;  %v422_v60 = vmul.f32 %v421_v29, %v2216_v16  ;;  %v2522_v50 = vadd.f32 %v2415_v5, %v372_v41  ;;  %v1064_v13 = vmul.f32 %v1063_v24, %v2248_v48 }
 0x16e   : > { %v2489_v23 = vpop.permute.xlu1 %500  ;;  %v451_v26 = vpop.permute.xlu0 %450  ;;  %v1129_v29 = vstv %s2495_s30  ;;  %v527_v25 = vmul.f32 %v526_v3, %v2176_v47  ;;  %v547_v41 = vstv %s2519_s20  ;;  %s1539_s30 = sld [smem:[#allocation7 + $0x48]] }
 0x16f   : > { %v419_v34 = vadd.f32 %v2316_v58, %v411_v19  ;;  %v453_v39 = vadd.f32 %v451_v26, %v445_v20  ;;  %s2622_s20 = sld [smem:[#allocation7 + $0x4e]] }
 0x170   : > { %1249 = vrot.lane.b32.xlu1 %v1247_v31, %s1929_s26  ;;  %1186 = vrot.lane.b32.xlu0 %v1184_v32, %s1929_s26 }
 0x171   : > { %v423_v46 = vadd.f32 %v422_v60, %v419_v34  ;;  %v461_v53 = vadd.f32 %v459_v4, %v453_v39  ;;  %v573_v34 = vstv %s2504_s4  ;;  %v1313_v39 = vstv %s2509_s6  ;;  %s2610_s4 = sld [smem:[#allocation7 + $0x45]] }
 0x172   : > { %v521_v58 = vpop.permute.xlu1 %520  ;;  %v493_v55 = vpop.permute.xlu0 %492  ;;  %s1542_s6 = sld [smem:[#allocation7 + $0x4b]] }
 0x173   : > { %v431_v62 = vadd.f32 %v429_v6, %v423_v46  ;;  %v466_v63 = vadd.f32 %v465_v49, %v461_v53  ;;  %v574_v49 = vmul.f32 %v573_v34, %v2254_v52  ;;  %v718_v34 = vstv %s2581_s8  ;;  %s2655_s8 = sld [smem:[#allocation7 + $0x6f]] }
 0x174   : > { %944 = vrot.lane.b32.xlu1 %v942_v56, %s1928_s23  ;;  %1308 = vrot.lane.b32.xlu0 %v1306_v61, %s1929_s26  ;;  %s2533_s26 = sld [smem:[#allocation7 + $0x27]]  ;;  %v1314_v61 = vmul.f32 %v1313_v39, %v2260_v59 }
 0x175   : > { %v2525_v4 = vadd.f32 %v2451_v43, %v431_v62  ;;  %v474_v6 = vadd.f32 %v2326_v2, %v466_v63  ;;  %v486_v2 = vmul.f32 %v485_v36, %v2236_v35  ;;  %v548_v63 = vmul.f32 %v547_v41, %v2248_v48 }
 0x176   : > { %v563_v10 = vpop.permute.xlu1 %562  ;;  %v513_v11 = vpop.permute.xlu0 %512 }
 0x177   : > { %v440_v5 = vmax.f32 %v2522_v50, %v2525_v4  ;;  %v482_v43 = vadd.f32 %v2324_v1, %v474_v6  ;;  %v515_v19 = vadd.f32 %v513_v11, %v507_v9  ;;  %v1130_v1 = vmul.f32 %v1129_v29, %v2236_v35 }
 0x178   : > { %1066 = vrot.lane.b32.xlu1 %v1064_v13, %s1928_s23  ;;  %1007 = vrot.lane.b32.xlu0 %v1005_v17, %s1928_s23  ;;  %v635_v6 = vstv %s2545_s21  ;;  %v614_v11 = vstv %s2552_s5  ;;  %s2632_s21 = sld [smem:[#allocation7 + $0x5a]] }
 0x179   : > { %v487_v20 = vadd.f32 %v486_v2, %v482_v43  ;;  %v523_v26 = vadd.f32 %v521_v58, %v515_v19  ;;  %v636_v17 = vmul.f32 %v635_v6, %v2242_v42  ;;  %v655_v29 = vstv %s2561_s1  ;;  %s2637_s5 = sld [smem:[#allocation7 + $0x6c]] }
 0x17a   : > { %v588_v31 = vpop.permute.xlu1 %587  ;;  %v555_v32 = vpop.permute.xlu0 %554  ;;  %v593_v58 = vstv %s2533_s26  ;;  %s2626_s26 = sld [smem:[#allocation7 + $0x54]] }
 0x17b   : > { %v528_v60 = vadd.f32 %v527_v25, %v523_v26  ;;  %v495_v24 = vadd.f32 %v493_v55, %v487_v20  ;;  %v594_v36 = vmul.f32 %v593_v58, %v2186_v54  ;;  %v615_v20 = vmul.f32 %v614_v11, %v2260_v59  ;;  %v2605_v58 = vld [vmem:[#allocation2 + $0x31] sm:$0xff]  ;;  %s2642_s1 = sld [smem:[#allocation7 + $0x63]] }
 0x17c   : > { %1194 = vrot.lane.b32.xlu1 %v1192_v33, %s1928_s23  ;;  %1132 = vrot.lane.b32.xlu0 %v1130_v1, %s1928_s23  ;;  %v698_v33 = vstv %s2570_s28  ;;  %v676_v59 = vstv %s2573_s3  ;;  %s2644_s28 = sld [smem:[#allocation7 + $0x5d]] }
 0x17d   : > { %v536_v46 = vadd.f32 %v2334_v8, %v528_v60  ;;  %v503_v13 = vadd.f32 %v2489_v23, %v495_v24  ;;  %v677_v40 = vmul.f32 %v676_v59, %v2248_v48  ;;  %v739_v24 = vstv %s2594_s24  ;;  %s2646_s3 = sld [smem:[#allocation7 + $0x7e]] }
 0x17e   : > { %v2556_v53 = vpop.permute.xlu1 %629  ;;  %v580_v56 = vpop.permute.xlu0 %579  ;;  %s2664_s24 = sld [smem:[#allocation7 + $0x87]] }
 0x17f   : > { %v544_v62 = vadd.f32 %v2332_v7, %v536_v46  ;;  %v582_v8 = vadd.f32 %v580_v56, %v574_v49 }
 0x180   : > { %1316 = vrot.lane.b32.xlu1 %v1314_v61, %s1928_s23  ;;  %1257 = vrot.lane.b32.xlu0 %v1255_v51, %s1928_s23  ;;  %s1452_s23 = sshll.u32 %s185_s22, 5 }
 0x181   : > { %v549_v0 = vadd.f32 %v548_v63, %v544_v62  ;;  %v590_v3 = vadd.f32 %v588_v31, %v582_v8  ;;  %s2589_s19 = scalar_lea.vmem [#allocation8], %s1452_s23  ;;  %v760_v62 = vstv %s2587_s12  ;;  %s2651_s23 = sld [smem:[#allocation7 + $0x75]] }
 0x182   : > { %v650_v50 = vpop.permute.xlu1 %649  ;;  %v622_v4 = vpop.permute.xlu0 %621  ;;  %s2660_s12 = sld [smem:[#allocation7 + $0x66]] }
 0x183   : > { %v557_v7 = vadd.f32 %v555_v32, %v549_v0  ;;  %v595_v9 = vadd.f32 %v594_v36, %v590_v3  ;;  %v761_v36 = vmul.f32 %v760_v62, %v2210_v12  ;;  %v826_v12 = vstv %s1539_s30  ;;  %s2672_s30 = sld [smem:[#allocation7 + $0x78]] }
 0x185   : > { %v565_v55 = vadd.f32 %v563_v10, %v557_v7  ;;  %v603_v54 = vadd.f32 %v2342_v15, %v595_v9  ;;  %v656_v15 = vmul.f32 %v655_v29, %v2176_v47  ;;  %v699_v47 = vmul.f32 %v698_v33, %v2230_v30 }
 0x186   : > { %v692_v18 = vpop.permute.xlu1 %691  ;;  %v642_v43 = vpop.permute.xlu0 %641  ;;  %v740_v9 = vmul.f32 %v739_v24, %v2236_v35  ;;  %v801_v29 = vstv %s2610_s4  ;;  %s2678_s4 = sld [smem:[#allocation7 + $0x8a]] }
 0x187   : > { %v566_v2 = vmax.f32 %v503_v13, %v565_v55  ;;  %v611_v19 = vadd.f32 %v2340_v14, %v603_v54  ;;  %v644_v23 = vadd.f32 %v642_v43, %v636_v17  ;;  %v2618_v55 = vld [vmem:[#allocation2 + $0x11] sm:$0xff] }
 0x189   : > { %v567_v25 = vadd.f32 %v566_v2, %v440_v5  ;;  %v616_v10 = vadd.f32 %v615_v20, %v611_v19  ;;  %v652_v26 = vadd.f32 %v650_v50, %v644_v23  ;;  %v780_v50 = vstv %s2601_s29  ;;  %s2669_s29 = sld [smem:[#allocation7 + $0x81]] }
 0x18a   : > { %v713_v31 = vpop.permute.xlu1 %712  ;;  %v684_v32 = vpop.permute.xlu0 %683  ;;  %v846_v19 = vstv %s1542_s6  ;;  %s1554_s6 = sld [smem:[#allocation7 + $0x57]] }
 0x18b   : > { %569 = vst.msk [vmem:[%s2589_s19] sm:$0xff] %vm568_vm6, %v567_v25  ;;  %v657_v14 = vadd.f32 %v656_v15, %v652_v26  ;;  %v624_v46 = vadd.f32 %v622_v4, %v616_v10  ;;  %v802_v25 = vmul.f32 %v801_v29, %v2216_v16 }
 0x18d   : > { %v665_v5 = vadd.f32 %v2350_v22, %v657_v14  ;;  %v719_v22 = vmul.f32 %v2605_v58, %v718_v34  ;;  %v632_v48 = vadd.f32 %v2556_v53, %v624_v46  ;;  %v781_v53 = vmul.f32 %v2618_v55, %v780_v50 }
 0x18e   : > { %v2598_v1 = vpop.permute.xlu1 %754  ;;  %v705_v60 = vpop.permute.xlu0 %704 }
 0x18f   : > { %v673_v39 = vadd.f32 %v2348_v21, %v665_v5  ;;  %v707_v41 = vadd.f32 %v705_v60, %v699_v47  ;;  %v867_v5 = vstv %s2622_s20  ;;  %s1572_s20 = sld [smem:[#allocation7 + $0x69]] }
 0x191   : > { %v678_v49 = vadd.f32 %v677_v40, %v673_v39  ;;  %v715_v56 = vadd.f32 %v713_v31, %v707_v41  ;;  %v847_v31 = vmul.f32 %v2605_v58, %v846_v19  ;;  %v908_v40 = vstv %s2626_s26  ;;  %s2688_s26 = sld [smem:[#allocation7 + $0x72]] }
 0x192   : > { %v775_v61 = vpop.permute.xlu1 %774  ;;  %v747_v51 = vpop.permute.xlu0 %746 }
 0x193   : > { %v686_v63 = vadd.f32 %v684_v32, %v678_v49  ;;  %v720_v8 = vadd.f32 %v719_v22, %v715_v56  ;;  %v868_v49 = vmul.f32 %v867_v5, %v2236_v35  ;;  %v2648_v56 = vld [vmem:[#allocation2 + $0x21] sm:$0xff] }
 0x195   : > { %v694_v21 = vadd.f32 %v692_v18, %v686_v63  ;;  %v728_v0 = vadd.f32 %v2358_v28, %v720_v8  ;;  %v951_v63 = vstv %s2632_s21  ;;  %s2690_s21 = sld [smem:[#allocation7 + $0x7b]] }
 0x196   : > { %v817_v3 = vpop.permute.xlu1 %816  ;;  %v767_v4 = vpop.permute.xlu0 %766 }
 0x197   : > { %v695_v6 = vmax.f32 %v632_v48, %v694_v21  ;;  %v736_v7 = vadd.f32 %v2356_v27, %v728_v0  ;;  %v769_v11 = vadd.f32 %v767_v4, %v761_v36  ;;  %v827_v27 = vmul.f32 %v826_v12, %v2230_v30  ;;  %v1748_v4 = vld [vmem:[#allocation2 + $0x30] sm:$0xff] }
 0x198   : > { %v888_v30 = vstv %s1548_s25  ;;  %v952_v21 = vmul.f32 %v951_v63, %v2242_v42  ;;  %v1076_v0 = vstv %s2637_s5  ;;  %v1012_v36 = vstv %s2642_s1  ;;  %s1563_s25 = sld [smem:[#allocation7 + $0x60]] }
 0x199   : > { %v741_v13 = vadd.f32 %v740_v9, %v736_v7  ;;  %v777_v54 = vadd.f32 %v775_v61, %v769_v11  ;;  %v889_v34 = vmul.f32 %v888_v30, %v2254_v52  ;;  %v909_v61 = vmul.f32 %v2648_v56, %v908_v40  ;;  %v1749_v7 = vld [vmem:[#allocation2] sm:$0xff]  ;;  %s2694_s5 = sld [smem:[#allocation7 + $0x84]] }
 0x19a   : > { %v841_v28 = vpop.permute.xlu1 %840  ;;  %v809_v17 = vpop.permute.xlu0 %808  ;;  %v1013_v9 = vmul.f32 %v1749_v7, %v1012_v36  ;;  %v1096_v12 = vstv %s2655_s8  ;;  %v1158_v30 = vstv %s2672_s30  ;;  %s2696_s1 = sld [smem:[#allocation7 + $0x8d]]  ;;  %s1930_s30 = smov [#allocation8]  }
 0x19b   : > { %v782_v18 = vadd.f32 %v781_v53, %v777_v54  ;;  %v749_v15 = vadd.f32 %v747_v51, %v741_v13  ;;  %v1201_v53 = vstv %s2646_s3  ;;  %v1138_v54 = vstv %s2651_s23  ;;  %s1339_s23 = sshll.u32 %s2589_s19, 4  ;;  %s2708_s23 = int_to_ptr.vmem [resolvable:$true] %s1339_s23 }
 0x19d   : > { %v790_v43 = vadd.f32 %v2370_v38, %v782_v18  ;;  %v757_v47 = vadd.f32 %v2598_v1, %v749_v15  ;;  %v1031_v18 = vstv %s2660_s12 }
 0x19e   : > { %v883_v2 = vpop.permute.xlu1 %882  ;;  %v833_v20 = vpop.permute.xlu0 %832 }
 0x19f   : > { %v798_v23 = vadd.f32 %v2368_v37, %v790_v43  ;;  %v835_v10 = vadd.f32 %v833_v20, %v827_v27  ;;  %v1752_v20 = vld [vmem:[#allocation2 + $0x10] sm:$0xff] }
 0x1a1   : > { %v803_v26 = vadd.f32 %v802_v25, %v798_v23  ;;  %v843_v32 = vadd.f32 %v841_v28, %v835_v10  ;;  %v1750_v28 = vld [vmem:[#allocation2 + $0x1] sm:$0xff]  ;;  %v1139_v23 = vmul.f32 %v1752_v20, %v1138_v54  ;;  %v1262_v25 = vstv %s2664_s24 }
 0x1a2   : > { %v903_v38 = vpop.permute.xlu1 %902  ;;  %v875_v33 = vpop.permute.xlu0 %874 }
 0x1a3   : > { %v811_v14 = vadd.f32 %v809_v17, %v803_v26  ;;  %v848_v59 = vadd.f32 %v847_v31, %v843_v32  ;;  %v1097_v32 = vmul.f32 %v2605_v58, %v1096_v12 }
 0x1a5   : > { %v819_v37 = vadd.f32 %v817_v3, %v811_v14  ;;  %v856_v16 = vadd.f32 %v2384_v45, %v848_v59  ;;  %v971_v3 = vstv %s2644_s28  ;;  %s1614_s28 = sshll.u32 %s1908_s16, 3 }
 0x1a6   : > { %v958_v60 = vpop.permute.xlu1 %957  ;;  %v895_v39 = vpop.permute.xlu0 %894  ;;  %v972_v17 = vmul.f32 %v1750_v28, %v971_v3  ;;  %s1336_s3 = sadd.s32 %s1904_s15, %s1614_s28  ;;  %s2719_s15 = scalar_lea.sflag [#allocation5], %s185_s22 }
 0x1a7   : > { %v820_v41 = vmax.f32 %v757_v47, %v819_v37  ;;  %v864_v46 = vadd.f32 %v2382_v44, %v856_v16  ;;  %v897_v22 = vadd.f32 %v895_v39, %v889_v34  ;;  %v960_v50 = vadd.f32 %v958_v60, %v952_v21  ;;  %s1615_s8 = sshll.u32 %s1336_s3, 7 }
 0x1a8   : > { %s2713_s24 = scalar_lea.hbm %s2781_s2, %s1615_s8 }
 0x1a9   : > { %v821_v45 = vadd.f32 %v820_v41, %v695_v6  ;;  %v869_v1 = vadd.f32 %v868_v49, %v864_v46  ;;  %v905_v52 = vadd.f32 %v903_v38, %v897_v22  ;;  %v1077_v6 = vmul.f32 %v1748_v4, %v1076_v0 }
 0x1aa   : > { %v1083_v44 = vpop.permute.xlu1 %1082  ;;  %v1019_v51 = vpop.permute.xlu0 %1018  ;;  %v1032_v38 = vmul.f32 %v1750_v28, %v1031_v18  ;;  %v1159_v41 = vmul.f32 %v2618_v55, %v1158_v30  ;;  %v1281_v46 = vstv %s2678_s4  ;;  %v929_v55 = vstv %s1554_s6  ;;  %s1800_s4 = sshll.u32 %s1930_s30, 4  ;;  %s1801_s4 = int_to_ptr.vmem [resolvable:$false] %s1800_s4 }
 0x1ab   : > { %1538 = vst.msk [vmem:[%s2589_s19 + $0x8] sm:$0xff] %vm568_vm6, %v821_v45  ;;  %v877_v35 = vadd.f32 %v875_v33, %v869_v1  ;;  %v2657_v62 = vadd.f32 %v909_v61, %v905_v52  ;;  %v1085_v29 = vadd.f32 %v1083_v44, %v1077_v6  ;;  %v1021_v43 = vadd.f32 %v1019_v51, %v1013_v9  ;;  %s1802_s6 = scalar_lea.vmem %s1801_s4, 1024  ;;  %p1803_p3 = scmp.lt.s32.totalorder %s2708_s23, %s1801_s4 }
 0x1ac   : > { %v1221_v33 = vstv %s2669_s29  ;;  %v1282_v61 = vmul.f32 %v2648_v56, %v1281_v46  ;;  %v1051_v4 = vstv %s1572_s20  ;;  %v1117_v28 = vstv %s2688_s26  ;;  %s1796_s29 = scalar_lea.vmem %s2708_s23, 512 }
 0x1ad   : > { %v2662_v8 = vadd.f32 %v883_v2, %v877_v35  ;;  %v1751_v2 = vld [vmem:[#allocation2 + $0x20] sm:$0xff]  ;;  %v1222_v40 = vmul.f32 %v2648_v56, %v1221_v33  ;;  %p1797_p2 = scmp.ne.s32.totalorder %s2708_s23, %s1796_s29  ;;  %p1804_p6 = scmp.lt.s32.totalorder %s1802_s6, %s1796_s29 }
 0x1ae   : > { %v1208_v24 = vpop.permute.xlu1 %1207  ;;  %v1145_v48 = vpop.permute.xlu0 %1144  ;;  %v1202_v19 = vmul.f32 %v1751_v2, %v1201_v53  ;;  %v1263_v37 = vmul.f32 %v1751_v2, %v1262_v25  ;;  %v1753_v56 = vld [vmem:[#allocation2 + $0x22] sm:$0xff] }
 0x1af   : > { %v1147_v59 = vadd.f32 %v1145_v48, %v1139_v23  ;;  %v918_v48 = vadd.f32 %v2397_v57, %v2657_v62  ;;  %v930_v3 = vmul.f32 %v1753_v56, %v929_v55  ;;  %v1754_v62 = vld [vmem:[#allocation2 + $0x2] sm:$0xff]  ;;  %v1755_v23 = vld [vmem:[#allocation2 + $0x32] sm:$0xff]  ;;  %p1798_p8 = pnand %p1797_p2, %p2805_p7  ;;  %p1805_p10 = por %p1804_p6, %p1803_p3 }
 0x1b0   : > { %v1210_v14 = vadd.f32 %v1208_v24, %v1202_v19  ;;  %v1118_v25 = vmul.f32 %v1755_v23, %v1117_v28 }
 0x1b1   : > { %p1799_p4 = pneg %p1798_p8 }
 0x1b2   : > { %v966_v11 = vpop.permute.xlu1 %965  ;;  %v1269_v13 = vpop.permute.xlu0 %1268 }
 0x1b3   : > { %v968_v42 = vadd.f32 %v966_v11, %v960_v50  ;;  %v1271_v49 = vadd.f32 %v1269_v13, %v1263_v37  ;;  %v992_v50 = vstv %s1563_s25  ;;  %p1806_p12 = pnand %p1805_p10, %p1799_p4 }
 0x1b4   : > { %v993_v54 = vmul.f32 %v1754_v62, %v992_v50 }
 0x1b5   : > { %v973_v27 = vadd.f32 %v972_v17, %v968_v42  ;;  %v1052_v42 = vmul.f32 %v1754_v62, %v1051_v4  ;;  %v1179_v17 = vstv %s2690_s21 }
 0x1b6   : > { %v1091_v10 = vpop.permute.xlu1 %1090  ;;  %v1027_v15 = vpop.permute.xlu0 %1026 }
 0x1b7   : > { %v1093_v26 = vadd.f32 %v1091_v10, %v1085_v29  ;;  %v1029_v31 = vadd.f32 %v1027_v15, %v1021_v43  ;;  %v1756_v10 = vld [vmem:[#allocation2 + $0x12] sm:$0xff] }
 0x1b8   : > { %v1180_v15 = vmul.f32 %v1756_v10, %v1179_v17 }
 0x1b9   : > { %v1098_v5 = vadd.f32 %v1097_v32, %v1093_v26  ;;  %v1033_v47 = vadd.f32 %v1032_v38, %v1029_v31  ;;  %v1242_v26 = vstv %s2694_s5  ;;  %v1301_v31 = vstv %s2696_s1 }
 0x1ba   : > { %v1216_v16 = vpop.permute.xlu1 %1215  ;;  %v1153_v34 = vpop.permute.xlu0 %1152  ;;  %v1243_v37 = vmul.f32 %v1753_v56, %v1242_v26 }
 0x1bb   : > { %v1218_v60 = vadd.f32 %v1216_v16, %v1210_v14  ;;  %v1155_v39 = vadd.f32 %v1153_v34, %v1147_v59  ;;  %v1302_v16 = vmul.f32 %v1753_v56, %v1301_v31 }
 0x1bd   : > { %v1223_v22 = vadd.f32 %v1222_v40, %v1218_v60  ;;  %v1160_v58 = vadd.f32 %v1159_v41, %v1155_v39 }
 0x1be   : > { %v979_v45 = vpop.permute.xlu1 %978  ;;  %v1277_v1 = vpop.permute.xlu0 %1276 }
 0x1bf   : > { %v1279_v52 = vadd.f32 %v1277_v1, %v1271_v49  ;;  %v981_v6 = vadd.f32 %v979_v45, %v973_v27 }
 0x1c1   : > { %v1283_v44 = vadd.f32 %v1282_v61, %v1279_v52 }
 0x1c2   : > { %v1104_v51 = vpop.permute.xlu1 %1103  ;;  %v1039_v35 = vpop.permute.xlu0 %1038 }
 0x1c3   : > { %v1041_v7 = vadd.f32 %v1039_v35, %v1033_v47  ;;  %v1106_v12 = vadd.f32 %v1104_v51, %v1098_v5 }
 0x1c6   : > { %v1229_v63 = vpop.permute.xlu1 %1228  ;;  %v1166_v24 = vpop.permute.xlu0 %1165 }
 0x1c7   : > { %v1168_v18 = vadd.f32 %v1166_v24, %v1160_v58  ;;  %v1231_v32 = vadd.f32 %v1229_v63, %v1223_v22 }
 0x1ca   : > { %v924_v21 = vpop.permute.xlu1 %923  ;;  %v1289_v0 = vpop.permute.xlu0 %1288 }
 0x1cb   : > { %v926_v36 = vadd.f32 %v924_v21, %v918_v48  ;;  %v1291_v38 = vadd.f32 %v1289_v0, %v1283_v44 }
 0x1cd   : > { %v931_v9 = vadd.f32 %v930_v3, %v926_v36 }
 0x1ce   : > { %v1047_v11 = vpop.permute.xlu1 %1046  ;;  %v987_v13 = vpop.permute.xlu0 %986 }
 0x1cf   : > { %v1049_v53 = vadd.f32 %v1047_v11, %v1041_v7  ;;  %v989_v57 = vadd.f32 %v987_v13, %v981_v6 }
 0x1d1   : > { %v994_v29 = vadd.f32 %v993_v54, %v989_v57  ;;  %v1053_v43 = vadd.f32 %v1052_v42, %v1049_v53 }
 0x1d2   : > { %v1174_v2 = vpop.permute.xlu1 %1173  ;;  %v1112_v19 = vpop.permute.xlu0 %1111 }
 0x1d3   : > { %v1176_v27 = vadd.f32 %v1174_v2, %v1168_v18  ;;  %v1114_v20 = vadd.f32 %v1112_v19, %v1106_v12 }
 0x1d5   : > { %v1119_v33 = vadd.f32 %v1118_v25, %v1114_v20  ;;  %v1181_v30 = vadd.f32 %v1180_v15, %v1176_v27 }
 0x1d6   : > { %v1297_v14 = vpop.permute.xlu1 %1296  ;;  %v1237_v59 = vpop.permute.xlu0 %1236 }
 0x1d7   : > { %v1299_v5 = vadd.f32 %v1297_v14, %v1291_v38  ;;  %v1239_v47 = vadd.f32 %v1237_v59, %v1231_v32 }
 0x1d9   : > { %v1244_v34 = vadd.f32 %v1243_v37, %v1239_v47  ;;  %v1303_v60 = vadd.f32 %v1302_v16, %v1299_v5 }
 0x1da   : > { %v1000_v39 = vpop.permute.xlu1 %999  ;;  %v937_v40 = vpop.permute.xlu0 %936 }
 0x1db   : > { %v939_v45 = vadd.f32 %v937_v40, %v931_v9  ;;  %v1002_v61 = vadd.f32 %v1000_v39, %v994_v29 }
 0x1de   : > { %v1125_v41 = vpop.permute.xlu1 %1124  ;;  %v1059_v46 = vpop.permute.xlu0 %1058 }
 0x1df   : > { %v1061_v44 = vadd.f32 %v1059_v46, %v1053_v43  ;;  %v1127_v48 = vadd.f32 %v1125_v41, %v1119_v33 }
 0x1e2   : > { %v1250_v49 = vpop.permute.xlu1 %1249  ;;  %v1187_v58 = vpop.permute.xlu0 %1186 }
 0x1e3   : > { %v1189_v21 = vadd.f32 %v1187_v58, %v1181_v30  ;;  %v1252_v6 = vadd.f32 %v1250_v49, %v1244_v34 }
 0x1e6   : > { %v945_v22 = vpop.permute.xlu1 %944  ;;  %v1309_v1 = vpop.permute.xlu0 %1308 }
 0x1e7   : > { %v947_v52 = vadd.f32 %v945_v22, %v939_v45 }
 0x1e9   : > { %v948_v51 = vmax.f32 %v2662_v8, %v947_v52  ;;  %v1311_v8 = vadd.f32 %v1309_v1, %v1303_v60 }
 0x1ea   : > { %v1067_v35 = vpop.permute.xlu1 %1066  ;;  %v1008_v63 = vpop.permute.xlu0 %1007 }
 0x1eb   : > { %v1069_v24 = vadd.f32 %v1067_v35, %v1061_v44  ;;  %v1010_v55 = vadd.f32 %v1008_v63, %v1002_v61 }
 0x1ed   : > { %v1070_v0 = vmax.f32 %v1010_v55, %v1069_v24 }
 0x1ee   : > { %v1195_v36 = vpop.permute.xlu1 %1194  ;;  %v1133_v56 = vpop.permute.xlu0 %1132 }
 0x1ef   : > { %v1071_v3 = vadd.f32 %v1070_v0, %v948_v51  ;;  %v1197_v50 = vadd.f32 %v1195_v36, %v1189_v21  ;;  %v1135_v4 = vadd.f32 %v1133_v56, %v1127_v48 }
 0x1f1   : > { %1575 = vst.msk [vmem:[%s2589_s19 + $0x10] sm:$0xff] %vm568_vm6, %v1071_v3  ;;  %v1198_v7 = vmax.f32 %v1135_v4, %v1197_v50 }
 0x1f2   : > { %v1317_v9 = vpop.permute.xlu1 %1316  ;;  %v1258_v11 = vpop.permute.xlu0 %1257 }
 0x1f3   : > { %v1319_v13 = vadd.f32 %v1317_v9, %v1311_v8  ;;  %v1260_v53 = vadd.f32 %v1258_v11, %v1252_v6 }
 0x1f5   : > { %v1320_v57 = vmax.f32 %v1260_v53, %v1319_v13 }
 0x1f7   : > { %v1321_v62 = vadd.f32 %v1320_v57, %v1198_v7 }
 0x1f9   : > { %1612 = vst.msk [vmem:[%s2589_s19 + $0x18] sm:$0xff] %vm568_vm6, %v1321_v62 }
 0x1fa   : > { %1809 = shalt.err (!%p1806_p12)
}
 0x1fb   : > { %s1810_s22 = scalar_lea.hbm %s2713_s24, 512  ;;  %s1814_s20 = scalar_lea.hbm %s2781_s2, 2048 }
 0x1fc   : > { %p1811_p0 = scmp.ne.s32.totalorder %s2713_s24, %s1810_s22  ;;  %p1815_p11 = scmp.lt.s32.totalorder %s2713_s24, %s2781_s2 }
 0x1fd   : > { %p1816_p13 = scmp.lt.s32.totalorder %s1814_s20, %s1810_s22 }
 0x1fe   : > { %p1812_p5 = pnand %p1811_p0, %p2805_p7 }
 0x1ff   : > { %p1817_p1 = por %p1816_p13, %p1815_p11 }
 0x200   : > { %p1813_p9 = pneg %p1812_p5 }
 0x202   : > { %p1818_p2 = pnand %p1817_p1, %p1813_p9 }
 0x204   : > { %1821 = shalt.err (!%p1818_p2)
}
 0x205   : > { %s1931_s5 = smov 128   ;;  %s1932_s1 = smov 256  }
 0x206   : > { %s1933_s28 = smov 8  }
 0x207   : > { %1629 = dma.vmem_to_hbm [thread:$0]  (%p2805_p7), %s2708_s23, 512, %s2713_s24, %s2719_s15, %s1931_s5, %s1932_s1, %s1933_s28  }
 0x208 PF: > { %s2806_s3 = sld [smem:[#allocation14_spill]] }
 0x209   : > { %s2807_s8 = sld [smem:[#allocation12_spill]] }
 0x20a   : > { %s2808_s16 = sld [smem:[#allocation15_spill]] }
 0x20e   : > { %p1646_p8 = scmp.ge.s32.totalorder %s2806_s3, 2 }
 0x20f   : > { %s1354_s12 = sand.u32 1, %s2807_s8  }
 0x210   : > { %p2809_p4 = scmp.ne.s32.totalorder %s2808_s16, 0  ;;  %s1355_s29 = scalar_lea.sflag [#allocation5], %s1354_s12 }
 0x212   : > { %p1640_p3 = pnand %p1646_p8, %p2809_p4 }
 0x214   : > { %p1641_p6 = pneg %p1640_p3 }
 0x216   : > { %1875 = dma.done.wait (%p1641_p6), %s1355_s29, 512  }
 0x217   : > { %1877 = vsyncadd (%p1641_p6), %s1355_s29, 4294966784  ;;  %s19_s19 = sadd.s32 1, %s2806_s3   ;;  %s2810_s30 = smov %s2082_s9 }
 0x218   : > { %p16_p10 = scmp.ge.s32.totalorder %s19_s19, 6   ;;  %s2811_s15 = sld [smem:[#allocation13_spill]] }
 0x219   : > { %s2812_s27 = sld [smem:[#allocation16_spill]]  ;;  %s2813_s9 = smov %s1884_s10 }
 0x21a   : > { %s2814_s10 = smov %s1888_s11  ;;  %s2815_s11 = smov %s2810_s30 }
 0x21b   : > { %s2816_s12 = smov %s1896_s13  ;;  %s2817_s13 = smov %s1900_s14 }
 0x21c   : > { %s2818_s14 = smov %s2077_s17  ;;  %s2819_s16 = smov %s1916_s18 }
 0x21d   : > { %s2821_s18 = smov %s2827_s7  ;;  %18 = sbr.rel (!%p16_p10) target bundleno = 12 (0xc), region = 87 }
 0x21f   : > { %s2820_s17 = smov %s2812_s27 }
 0x222   :  { %1360 = vsyncpa [#allocation4], 1 }
 0x223   :  { %1362 = vsyncpa [#allocation4 + $0x1], 1 }
 0x224   :  { %1363 = vsyncpa [#allocation5], 1 }
 0x225   :  { %1365 = vsyncpa [#allocation5 + $0x1], 1 }
 0x226   :  { %1366 = vsyncpa [#allocation6], 1 }
 0x227   :  { %1368 = vsyncpa [#allocation6 + $0x1], 1 }

</bundles_post_ra>
